<compile_context>
chip_gen: v5e
topology: v5e:2x2
jax: 0.10.0
libtpu: 0.0.40
codegen_flags: <defaults>
</compile_context>

<pallas_src>
import functools

import jax
import jax.numpy as jnp
from jax.experimental import pallas as pl
from jax.experimental.pallas import tpu as pltpu


# ----------------------------------------------------------------------------
# Pallas kernel 1: transposed GEMM  out[Nc, M] = a[Nc, K] @ b[K, M] + bias
# Nc (output channels, small) -> sublanes; M (flattened pixels, large) -> lanes.
# ----------------------------------------------------------------------------
def _gemm_t_kernel(a_ref, b_ref, bias_ref, o_ref, *, act):
    acc = jnp.dot(a_ref[...], b_ref[...], preferred_element_type=jnp.float32)
    acc = acc + bias_ref[...]                     # (Nc, 1) broadcasts over lanes
    if act == "relu":
        acc = jnp.maximum(acc, 0.0)
    o_ref[...] = acc.astype(o_ref.dtype)


# Conservative: under the 32 MiB scoped default everywhere (v7x phys = 64 MiB).
_VMEM_BUDGET = 24 * 1024 * 1024


def gemm_t(a, b, bias=None, act="none", out_dtype=jnp.float32):
    """Lane-dense GEMM: (Nc, K) @ (K, M) + bias[:, None]; bf16 in, f32 acc."""
    Nc, K = a.shape
    M = b.shape[1]
    if bias is None:
        bias = jnp.zeros((Nc,), jnp.float32)
    bias2 = bias.reshape(Nc, 1).astype(jnp.float32)
    a = a.astype(jnp.bfloat16)
    b = b.astype(jnp.bfloat16)
    ob = jnp.dtype(out_dtype).itemsize

    fixed = Nc * K * 2 + Nc * 4                   # A operand + bias
    per_col = 2 * (K * 2 + Nc * ob)               # double-buffered B column + out column
    if fixed + per_col * M <= _VMEM_BUDGET:
        tm, mp = M, M                             # single block: no pad, no slice, 1 step
    else:
        # VMEM-aware fallback tiling (not hit at these toy shapes).
        tm = max(128, ((_VMEM_BUDGET - fixed) // per_col) // 128 * 128)
        mp = pl.cdiv(M, tm) * tm
        if mp != M:
            b = jnp.pad(b, ((0, 0), (0, mp - M)))

    out = pl.pallas_call(
        functools.partial(_gemm_t_kernel, act=act),
        out_shape=jax.ShapeDtypeStruct((Nc, mp), out_dtype),
        grid=(mp // tm,),
        in_specs=[
            pl.BlockSpec((Nc, K), lambda i: (0, 0)),
            pl.BlockSpec((K, tm), lambda i: (0, i)),
            pl.BlockSpec((Nc, 1), lambda i: (0, 0)),
        ],
        out_specs=pl.BlockSpec((Nc, tm), lambda i: (0, i)),
        compiler_params=pltpu.CompilerParams(
            dimension_semantics=("parallel",)),
    )(a, b, bias2)
    return out[:, :M] if mp != M else out


# ----------------------------------------------------------------------------
# Pallas kernel 2: re-associated cross-attention + W (1x1 conv, folded BN).
# Per grid step j (one proto):
#   oq_j = M_j @ theta_query_2d + bW      (c, b*hw)   -- all b queries at once
#   os_j = M_j @ theta_support_j + bW     (c, hw)
# with the per-proto (c,c) matrix M_j precomputed on the host (tiny).
# ----------------------------------------------------------------------------
def _cross_kernel(m_ref, tq_ref, ts_ref, bw_ref, oq_ref, os_ref):
    m = m_ref[...]                                  # (c, c)   f32
    bw = bw_ref[...]                                # (c, 1)   f32
    oq_ref[...] = jnp.dot(m, tq_ref[...],
                          preferred_element_type=jnp.float32) + bw
    os_ref[...] = jnp.dot(m, ts_ref[...],
                          preferred_element_type=jnp.float32) + bw


def cross_attention(m_fold, theta_q2d, theta_sup, b_fold):
    s, c, _ = m_fold.shape
    bhw = theta_q2d.shape[1]
    hw = theta_sup.shape[2]
    bw = b_fold.reshape(c, 1).astype(jnp.float32)
    oq, osup = pl.pallas_call(
        _cross_kernel,
        out_shape=(jax.ShapeDtypeStruct((s, c, bhw), jnp.float32),
                   jax.ShapeDtypeStruct((s, c, hw), jnp.float32)),
        grid=(s,),
        in_specs=[
            pl.BlockSpec((None, c, c), lambda j: (j, 0, 0)),    # M_j
            pl.BlockSpec((c, bhw), lambda j: (0, 0)),           # all queries (lanes)
            pl.BlockSpec((None, c, hw), lambda j: (j, 0, 0)),   # theta_support[j]
            pl.BlockSpec((c, 1), lambda j: (0, 0)),             # folded W bias
        ],
        out_specs=(pl.BlockSpec((None, c, bhw), lambda j: (j, 0, 0)),
                   pl.BlockSpec((None, c, hw), lambda j: (j, 0, 0))),
        compiler_params=pltpu.CompilerParams(
            dimension_semantics=("parallel",)),
    )(m_fold.astype(jnp.float32), theta_q2d.astype(jnp.float32),
      theta_sup.astype(jnp.float32), bw)
    return oq, osup


# ----------------------------------------------------------------------------
# Small JAX glue helpers
# ----------------------------------------------------------------------------
def l1_normalize(x, axis):
    return x / jnp.maximum(jnp.sum(jnp.abs(x), axis=axis, keepdims=True), 1e-12)


def l2_normalize(x, axis):
    return x / jnp.maximum(
        jnp.sqrt(jnp.sum(x * x, axis=axis, keepdims=True)), 1e-12)


def conv3x3_block_cf(x_cf, w_t, b_fold):
    """Conv3x3(pad=1)+BN(folded)+ReLU via transposed-im2col Pallas GEMM, then
    MaxPool2 in XLA.  Channel-first (Cin, N, H, W) in -> (Cout, N, H/2, W/2)
    out: no host transposes between layers; im2col rows ordered (kh, kw, cin)."""
    cin, n, hgt, wid = x_cf.shape
    cout = w_t.shape[0]
    x = x_cf.astype(jnp.bfloat16)
    xp = jnp.pad(x, ((0, 0), (0, 0), (1, 1), (1, 1)))
    cols_t = jnp.stack([xp[:, :, dh:dh + hgt, dw:dw + wid]
                        for dh in range(3) for dw in range(3)], axis=0)
    cols_t = cols_t.reshape(9 * cin, n * hgt * wid)          # rows = (kh, kw, cin)
    y_t = gemm_t(w_t, cols_t, bias=b_fold, act="relu",
                 out_dtype=jnp.bfloat16)                     # (Cout, N*H*W) bf16
    # TODO(synk): 2x2 maxpool (and im2col) could be fused into the GEMM kernel;
    # kept in XLA here to avoid non-(8,128)-aligned in-kernel reshapes.
    return y_t.reshape(cout, n, hgt // 2, 2, wid // 2, 2).max(axis=(3, 5))


def fold_conv3x3_bn(w, bconv, gamma, beta, mean, var, eps=1e-5):
    """(Cout,Cin,3,3) conv + eval-mode BN -> transposed GEMM weight (Cout,9Cin)."""
    scale = gamma / jnp.sqrt(var + eps)
    w_t = jnp.transpose(w, (0, 2, 3, 1)).reshape(w.shape[0], -1)   # (kh, kw, cin)
    return w_t * scale[:, None], (bconv - mean) * scale + beta


def fold_conv1x1_bn(w, bconv, gamma, beta, mean, var, eps=1e-5):
    scale = gamma / jnp.sqrt(var + eps)
    return w[:, :, 0, 0] * scale[:, None], (bconv - mean) * scale + beta


# ----------------------------------------------------------------------------
# PreRelation
# ----------------------------------------------------------------------------
def prerelation(x1, x2, p):
    s, c, h, w = x1.shape
    b = x2.shape[0]
    x1_cf = jnp.transpose(x1, (1, 0, 2, 3))                  # (c, s, h, w)
    x2_cf = jnp.transpose(x2, (1, 0, 2, 3))                  # (c, b, h, w)
    # channel-first pair batches: first c channels = x1[i], last c = x1/x2[j]
    ss_a = jnp.broadcast_to(x1_cf[:, :, None], (c, s, s, h, w)).reshape(c, s * s, h, w)
    ss_b = jnp.broadcast_to(x1_cf[:, None, :], (c, s, s, h, w)).reshape(c, s * s, h, w)
    sq_a = jnp.broadcast_to(x1_cf[:, :, None], (c, s, b, h, w)).reshape(c, s * b, h, w)
    sq_b = jnp.broadcast_to(x2_cf[:, None, :], (c, s, b, h, w)).reshape(c, s * b, h, w)
    pairs = jnp.concatenate(
        [jnp.concatenate([ss_a, sq_a], axis=1),
         jnp.concatenate([ss_b, sq_b], axis=1)], axis=0)     # (2c, s*s+s*b, h, w)

    # shared conv trunk, both pair sets in ONE pass per layer
    y = conv3x3_block_cf(pairs, p["l1_w"], p["l1_b"])        # (c, N, h/2, w/2)
    y = conv3x3_block_cf(y, p["l2_w"], p["l2_b"])            # (c, N, 3, 3)
    n_pairs = y.shape[1]
    flat = jnp.transpose(y, (1, 0, 2, 3)).reshape(n_pairs, -1)   # NCHW flatten
    # fc is tiny (N x 72 @ 72 x 8 @ 8 x 1): plain jnp so XLA fuses it
    h1 = jax.nn.relu(flat @ p["fc1_w"] + p["fc1_b"])
    out = jax.nn.sigmoid(h1 @ p["fc2_w"] + p["fc2_b"])[:, 0]

    outss = l1_normalize(out[:s * s].reshape(s, s), axis=1)   # F.normalize p=1,dim=1
    outsq = l1_normalize(out[s * s:].reshape(s, b), axis=0)   # F.normalize p=1,dim=0
    return outss, outsq


# ----------------------------------------------------------------------------
# TCAModule forward
# ----------------------------------------------------------------------------
def tca_forward(support, query, params):
    b, c, h, w = query.shape
    s = support.shape[0]
    hw = h * w

    Ass, Asq = prerelation(support, query, params["pre"])

    # (torch.no_grad block -- numerics only)
    A = jnp.concatenate([jnp.diag(jnp.diag(Ass)), Asq], axis=1)     # (s, s+b)
    A = l1_normalize(A, axis=1)
    global_data = jnp.concatenate([support, query], axis=0).reshape(s + b, c * hw)
    proto = jnp.matmul(A, global_data).reshape(s, c, h, w)          # tiny: plain jnp

    # theta 1x1 conv on [proto, query, support] fused into ONE lane-dense GEMM
    x_all = jnp.concatenate([proto, query, support], axis=0)        # (2s+b, c, h, w)
    n_all = x_all.shape[0]
    x_t = jnp.transpose(x_all, (1, 0, 2, 3)).reshape(c, n_all * hw)
    theta2d = gemm_t(params["theta_w"], x_t, bias=params["theta_b"])  # (c, n*hw) f32
    theta2d = l2_normalize(theta2d, axis=0)                         # F.normalize dim=1

    # per-proto fold  M_j = Wf @ proto_flat_j @ theta_proto_j^T  (tiny, f32, jnp)
    proto_flat = proto.reshape(s, c, hw)
    tp_csh = theta2d[:, :s * hw].reshape(c, s, hw)                  # theta_proto (native)
    P = jnp.einsum("jah,ejh->jae", proto_flat, tp_csh)              # proto_j @ theta_proto_j^T
    m_fold = jnp.einsum("da,jae->jde", params["W_w"], P)            # (s, c, c)

    theta_q2d = theta2d[:, s * hw:(s + b) * hw]                     # (c, b*hw), no transpose
    theta_sup = jnp.transpose(
        theta2d[:, (s + b) * hw:].reshape(c, s, hw), (1, 0, 2))     # (s, c, hw)

    oq, osup = cross_attention(m_fold, theta_q2d, theta_sup, params["W_b"])
    W_query = oq.reshape(s, c, b, hw).transpose(2, 0, 1, 3).reshape(b * s, c, h, w)
    W_support = osup.reshape(s, c, h, w)

    new_support = jnp.concatenate([support, W_support], axis=1)     # (s, 2c, h, w)
    new_support = jnp.broadcast_to(
        new_support[None], (b, s, 2 * c, h, w)).reshape(b * s, 2 * c, h, w)
    q_rep = jnp.broadcast_to(
        query[:, None], (b, s, c, h, w)).reshape(b * s, c, h, w)
    new_query = jnp.concatenate([q_rep, W_query], axis=1)
    return new_support, new_query, Ass, Asq


# ----------------------------------------------------------------------------
# Deterministic parameter initialization (PyTorch layouts, then folded)
# ----------------------------------------------------------------------------
def init_params(feature_dim, key):
    c = feature_dim
    keys = jax.random.split(key, 12)
    sc = 0.1

    def n(k, shape):
        return sc * jax.random.normal(k, shape, jnp.float32)

    l1_w, l1_cb = n(keys[0], (c, 2 * c, 3, 3)), n(keys[1], (c,))
    l2_w, l2_cb = n(keys[2], (c, c, 3, 3)), n(keys[3], (c,))
    fc1_w, fc1_b = n(keys[4], (8, c * 3 * 3)), n(keys[5], (8,))
    fc2_w, fc2_b = n(keys[6], (1, 8)), n(keys[7], (1,))
    th_w, th_b = n(keys[8], (c, c, 1, 1)), n(keys[9], (c,))
    W_w, W_b = n(keys[10], (c, c, 1, 1)), n(keys[11], (c,))

    ones = jnp.ones((c,), jnp.float32)
    zeros = jnp.zeros((c,), jnp.float32)
    # BatchNorm (eval mode, fresh running stats) folded into GEMM weights.
    l1w, l1b = fold_conv3x3_bn(l1_w, l1_cb, ones, zeros, zeros, ones)
    l2w, l2b = fold_conv3x3_bn(l2_w, l2_cb, ones, zeros, zeros, ones)
    thw, thb = fold_conv1x1_bn(th_w, th_b, ones, zeros, zeros, ones)
    Ww, Wb = fold_conv1x1_bn(W_w, W_b, ones, zeros, zeros, ones)

    return {
        "pre": {
            "l1_w": l1w, "l1_b": l1b,
            "l2_w": l2w, "l2_b": l2b,
            "fc1_w": fc1_w.T, "fc1_b": fc1_b,   # y = x @ W.T + b
            "fc2_w": fc2_w.T, "fc2_b": fc2_b,
        },
        "theta_w": thw, "theta_b": thb,
        "W_w": Ww, "W_b": Wb,
    }


if __name__ == "__main__":
    feature_dim = 8
    s, b, h, w = 5, 4, 12, 12   # h=w=12 -> two pooled conv blocks -> 3x3 (fc expects c*3*3)

    key = jax.random.PRNGKey(0)
    kp, ks, kq = jax.random.split(key, 3)
    params = init_params(feature_dim, kp)
    support = jax.random.normal(ks, (s, feature_dim, h, w), jnp.float32)
    query = jax.random.normal(kq, (b, feature_dim, h, w), jnp.float32)

    fwd = jax.jit(lambda sup, qry: tca_forward(sup, qry, params))
    new_support, new_query, Ass, Asq = fwd(support, query)
    jax.block_until_ready((new_support, new_query, Ass, Asq))

    assert new_support.shape == (b * s, 2 * feature_dim, h, w)
    assert new_query.shape == (b * s, 2 * feature_dim, h, w)
    assert Ass.shape == (s, s) and Asq.shape == (s, b)
    assert bool(jnp.all(jnp.isfinite(new_support)))
    assert bool(jnp.all(jnp.isfinite(new_query)))
    print("KERNEL_OK")
</pallas_src>

<mosaic_0001>
module attributes {stable_mosaic.version = 11 : i64} {
  func.func @_gemm_t_kernel(%arg0: i32, %arg1: memref<8x144xbf16, #tpu.memory_space<vmem>>, %arg2: memref<144x6480xbf16, #tpu.memory_space<vmem>>, %arg3: memref<8x1xf32, #tpu.memory_space<vmem>>, %arg4: memref<8x6480xbf16, #tpu.memory_space<vmem>>) attributes {dimension_semantics = [#tpu.dimension_semantics<parallel>], iteration_bounds = array<i64: 1>, scalar_prefetch = 0 : i64, scratch_operands = 0 : i64, tpu.core_type = #tpu.core_type<tc>, window_params = [{pipeline_mode = #tpu.pipeline_mode<synchronous>, transform_indices = @transform_0, window_bounds = array<i64: 8, 144>}, {transform_indices = @transform_1, window_bounds = array<i64: 144, 6480>}, {pipeline_mode = #tpu.pipeline_mode<synchronous>, transform_indices = @transform_2, window_bounds = array<i64: 8, 1>}, {transform_indices = @transform_3, window_bounds = array<i64: 8, 6480>}]} {
    %c0 = arith.constant 0 : index
    %c0_0 = arith.constant 0 : index
    %0 = vector.load %arg1[%c0, %c0_0] : memref<8x144xbf16, #tpu.memory_space<vmem>>, vector<8x144xbf16>
    %c0_1 = arith.constant 0 : index
    %c0_2 = arith.constant 0 : index
    %1 = vector.load %arg2[%c0_1, %c0_2] : memref<144x6480xbf16, #tpu.memory_space<vmem>>, vector<144x6480xbf16>
    %cst = arith.constant dense<0.000000e+00> : vector<8x6480xf32>
    %2 = tpu.matmul %0, %1, %cst {dimension_numbers = #tpu.dot_dimension_numbers<[1], [0], [0], [1], [0, 0, 1, 1], [], []>} : vector<8x144xbf16>, vector<144x6480xbf16>, vector<8x6480xf32> -> vector<8x6480xf32>
    %c0_3 = arith.constant 0 : index
    %c0_4 = arith.constant 0 : index
    %3 = vector.load %arg3[%c0_3, %c0_4] : memref<8x1xf32, #tpu.memory_space<vmem>>, vector<8x1xf32>
    %4 = vector.broadcast %3 : vector<8x1xf32> to vector<8x6480xf32>
    %5 = arith.addf %2, %4 : vector<8x6480xf32>
    %cst_5 = arith.constant 0.000000e+00 : f32
    %6 = vector.broadcast %cst_5 : f32 to vector<8x6480xf32>
    %7 = arith.maximumf %5, %6 : vector<8x6480xf32>
    %8 = arith.truncf %7 : vector<8x6480xf32> to vector<8x6480xbf16>
    %c0_6 = arith.constant 0 : index
    %c0_7 = arith.constant 0 : index
    %9 = vector.load %arg4[%c0_6, %c0_7] : memref<8x6480xbf16, #tpu.memory_space<vmem>>, vector<8x6480xbf16>
    tpu.vector_store %arg4[%c0_6, %c0_7], %8 {strides = array<i32>} : memref<8x6480xbf16, #tpu.memory_space<vmem>>, vector<8x6480xbf16>,
    return
  }
  func.func @transform_0(%arg0: i32) -> (i32, i32) {
    %c0_i32 = arith.constant 0 : i32
    %c0_i32_0 = arith.constant 0 : i32
    %c0_i32_1 = arith.constant 0 : i32
    return %c0_i32, %c0_i32_0 : i32, i32
  }
  func.func @transform_1(%arg0: i32) -> (i32, i32) {
    %c0_i32 = arith.constant 0 : i32
    %c0_i32_0 = arith.constant 0 : i32
    return %c0_i32, %arg0 : i32, i32
  }
  func.func @transform_2(%arg0: i32) -> (i32, i32) {
    %c0_i32 = arith.constant 0 : i32
    %c0_i32_0 = arith.constant 0 : i32
    %c0_i32_1 = arith.constant 0 : i32
    return %c0_i32, %c0_i32_0 : i32, i32
  }
  func.func @transform_3(%arg0: i32) -> (i32, i32) {
    %c0_i32 = arith.constant 0 : i32
    %c0_i32_0 = arith.constant 0 : i32
    return %c0_i32, %arg0 : i32, i32
  }
}

module attributes {stable_mosaic.version = 11 : i64} {
  func.func @_gemm_t_kernel(%arg0: i32, %arg1: memref<8x72xbf16, #tpu.memory_space<vmem>>, %arg2: memref<72x1620xbf16, #tpu.memory_space<vmem>>, %arg3: memref<8x1xf32, #tpu.memory_space<vmem>>, %arg4: memref<8x1620xbf16, #tpu.memory_space<vmem>>) attributes {dimension_semantics = [#tpu.dimension_semantics<parallel>], iteration_bounds = array<i64: 1>, scalar_prefetch = 0 : i64, scratch_operands = 0 : i64, tpu.core_type = #tpu.core_type<tc>, window_params = [{pipeline_mode = #tpu.pipeline_mode<synchronous>, transform_indices = @transform_0, window_bounds = array<i64: 8, 72>}, {transform_indices = @transform_1, window_bounds = array<i64: 72, 1620>}, {pipeline_mode = #tpu.pipeline_mode<synchronous>, transform_indices = @transform_2, window_bounds = array<i64: 8, 1>}, {transform_indices = @transform_3, window_bounds = array<i64: 8, 1620>}]} {
    %c0 = arith.constant 0 : index
    %c0_0 = arith.constant 0 : index
    %0 = vector.load %arg1[%c0, %c0_0] : memref<8x72xbf16, #tpu.memory_space<vmem>>, vector<8x72xbf16>
    %c0_1 = arith.constant 0 : index
    %c0_2 = arith.constant 0 : index
    %1 = vector.load %arg2[%c0_1, %c0_2] : memref<72x1620xbf16, #tpu.memory_space<vmem>>, vector<72x1620xbf16>
    %cst = arith.constant dense<0.000000e+00> : vector<8x1620xf32>
    %2 = tpu.matmul %0, %1, %cst {dimension_numbers = #tpu.dot_dimension_numbers<[1], [0], [0], [1], [0, 0, 1, 1], [], []>} : vector<8x72xbf16>, vector<72x1620xbf16>, vector<8x1620xf32> -> vector<8x1620xf32>
    %c0_3 = arith.constant 0 : index
    %c0_4 = arith.constant 0 : index
    %3 = vector.load %arg3[%c0_3, %c0_4] : memref<8x1xf32, #tpu.memory_space<vmem>>, vector<8x1xf32>
    %4 = vector.broadcast %3 : vector<8x1xf32> to vector<8x1620xf32>
    %5 = arith.addf %2, %4 : vector<8x1620xf32>
    %cst_5 = arith.constant 0.000000e+00 : f32
    %6 = vector.broadcast %cst_5 : f32 to vector<8x1620xf32>
    %7 = arith.maximumf %5, %6 : vector<8x1620xf32>
    %8 = arith.truncf %7 : vector<8x1620xf32> to vector<8x1620xbf16>
    %c0_6 = arith.constant 0 : index
    %c0_7 = arith.constant 0 : index
    %9 = vector.load %arg4[%c0_6, %c0_7] : memref<8x1620xbf16, #tpu.memory_space<vmem>>, vector<8x1620xbf16>
    tpu.vector_store %arg4[%c0_6, %c0_7], %8 {strides = array<i32>} : memref<8x1620xbf16, #tpu.memory_space<vmem>>, vector<8x1620xbf16>,
    return
  }
  func.func @transform_0(%arg0: i32) -> (i32, i32) {
    %c0_i32 = arith.constant 0 : i32
    %c0_i32_0 = arith.constant 0 : i32
    %c0_i32_1 = arith.constant 0 : i32
    return %c0_i32, %c0_i32_0 : i32, i32
  }
  func.func @transform_1(%arg0: i32) -> (i32, i32) {
    %c0_i32 = arith.constant 0 : i32
    %c0_i32_0 = arith.constant 0 : i32
    return %c0_i32, %arg0 : i32, i32
  }
  func.func @transform_2(%arg0: i32) -> (i32, i32) {
    %c0_i32 = arith.constant 0 : i32
    %c0_i32_0 = arith.constant 0 : i32
    %c0_i32_1 = arith.constant 0 : i32
    return %c0_i32, %c0_i32_0 : i32, i32
  }
  func.func @transform_3(%arg0: i32) -> (i32, i32) {
    %c0_i32 = arith.constant 0 : i32
    %c0_i32_0 = arith.constant 0 : i32
    return %c0_i32, %arg0 : i32, i32
  }
}

module attributes {stable_mosaic.version = 11 : i64} {
  func.func @_gemm_t_kernel(%arg0: i32, %arg1: memref<8x8xbf16, #tpu.memory_space<vmem>>, %arg2: memref<8x2016xbf16, #tpu.memory_space<vmem>>, %arg3: memref<8x1xf32, #tpu.memory_space<vmem>>, %arg4: memref<8x2016xf32, #tpu.memory_space<vmem>>) attributes {dimension_semantics = [#tpu.dimension_semantics<parallel>], iteration_bounds = array<i64: 1>, scalar_prefetch = 0 : i64, scratch_operands = 0 : i64, tpu.core_type = #tpu.core_type<tc>, window_params = [{pipeline_mode = #tpu.pipeline_mode<synchronous>, transform_indices = @transform_0, window_bounds = array<i64: 8, 8>}, {transform_indices = @transform_1, window_bounds = array<i64: 8, 2016>}, {pipeline_mode = #tpu.pipeline_mode<synchronous>, transform_indices = @transform_2, window_bounds = array<i64: 8, 1>}, {transform_indices = @transform_3, window_bounds = array<i64: 8, 2016>}]} {
    %c0 = arith.constant 0 : index
    %c0_0 = arith.constant 0 : index
    %0 = vector.load %arg1[%c0, %c0_0] : memref<8x8xbf16, #tpu.memory_space<vmem>>, vector<8x8xbf16>
    %c0_1 = arith.constant 0 : index
    %c0_2 = arith.constant 0 : index
    %1 = vector.load %arg2[%c0_1, %c0_2] : memref<8x2016xbf16, #tpu.memory_space<vmem>>, vector<8x2016xbf16>
    %cst = arith.constant dense<0.000000e+00> : vector<8x2016xf32>
    %2 = tpu.matmul %0, %1, %cst {dimension_numbers = #tpu.dot_dimension_numbers<[1], [0], [0], [1], [0, 0, 1, 1], [], []>} : vector<8x8xbf16>, vector<8x2016xbf16>, vector<8x2016xf32> -> vector<8x2016xf32>
    %c0_3 = arith.constant 0 : index
    %c0_4 = arith.constant 0 : index
    %3 = vector.load %arg3[%c0_3, %c0_4] : memref<8x1xf32, #tpu.memory_space<vmem>>, vector<8x1xf32>
    %4 = vector.broadcast %3 : vector<8x1xf32> to vector<8x2016xf32>
    %5 = arith.addf %2, %4 : vector<8x2016xf32>
    %c0_5 = arith.constant 0 : index
    %c0_6 = arith.constant 0 : index
    %6 = vector.load %arg4[%c0_5, %c0_6] : memref<8x2016xf32, #tpu.memory_space<vmem>>, vector<8x2016xf32>
    tpu.vector_store %arg4[%c0_5, %c0_6], %5 {strides = array<i32>} : memref<8x2016xf32, #tpu.memory_space<vmem>>, vector<8x2016xf32>,
    return
  }
  func.func @transform_0(%arg0: i32) -> (i32, i32) {
    %c0_i32 = arith.constant 0 : i32
    %c0_i32_0 = arith.constant 0 : i32
    %c0_i32_1 = arith.constant 0 : i32
    return %c0_i32, %c0_i32_0 : i32, i32
  }
  func.func @transform_1(%arg0: i32) -> (i32, i32) {
    %c0_i32 = arith.constant 0 : i32
    %c0_i32_0 = arith.constant 0 : i32
    return %c0_i32, %arg0 : i32, i32
  }
  func.func @transform_2(%arg0: i32) -> (i32, i32) {
    %c0_i32 = arith.constant 0 : i32
    %c0_i32_0 = arith.constant 0 : i32
    %c0_i32_1 = arith.constant 0 : i32
    return %c0_i32, %c0_i32_0 : i32, i32
  }
  func.func @transform_3(%arg0: i32) -> (i32, i32) {
    %c0_i32 = arith.constant 0 : i32
    %c0_i32_0 = arith.constant 0 : i32
    return %c0_i32, %arg0 : i32, i32
  }
}

module attributes {stable_mosaic.version = 11 : i64} {
  func.func @_cross_kernel(%arg0: i32, %arg1: memref<1x8x8xf32, #tpu.memory_space<vmem>>, %arg2: memref<8x576xf32, #tpu.memory_space<vmem>>, %arg3: memref<1x8x144xf32, #tpu.memory_space<vmem>>, %arg4: memref<8x1xf32, #tpu.memory_space<vmem>>, %arg5: memref<1x8x576xf32, #tpu.memory_space<vmem>>, %arg6: memref<1x8x144xf32, #tpu.memory_space<vmem>>) attributes {dimension_semantics = [#tpu.dimension_semantics<parallel>], iteration_bounds = array<i64: 5>, scalar_prefetch = 0 : i64, scratch_operands = 0 : i64, tpu.core_type = #tpu.core_type<tc>, window_params = [{transform_indices = @transform_0, window_bounds = array<i64: 1, 8, 8>}, {pipeline_mode = #tpu.pipeline_mode<synchronous>, transform_indices = @transform_1, window_bounds = array<i64: 8, 576>}, {transform_indices = @transform_2, window_bounds = array<i64: 1, 8, 144>}, {pipeline_mode = #tpu.pipeline_mode<synchronous>, transform_indices = @transform_3, window_bounds = array<i64: 8, 1>}, {transform_indices = @transform_4, window_bounds = array<i64: 1, 8, 576>}, {transform_indices = @transform_5, window_bounds = array<i64: 1, 8, 144>}]} {
    %c0 = arith.constant 0 : index
    %c0_0 = arith.constant 0 : index
    %c0_1 = arith.constant 0 : index
    %0 = vector.load %arg1[%c0, %c0_0, %c0_1] : memref<1x8x8xf32, #tpu.memory_space<vmem>>, vector<1x8x8xf32>
    %1 = vector.shape_cast %0 : vector<1x8x8xf32> to vector<8x8xf32>
    %c0_2 = arith.constant 0 : index
    %c0_3 = arith.constant 0 : index
    %2 = vector.load %arg4[%c0_2, %c0_3] : memref<8x1xf32, #tpu.memory_space<vmem>>, vector<8x1xf32>
    %c0_4 = arith.constant 0 : index
    %c0_5 = arith.constant 0 : index
    %3 = vector.load %arg2[%c0_4, %c0_5] : memref<8x576xf32, #tpu.memory_space<vmem>>, vector<8x576xf32>
    %cst = arith.constant dense<0.000000e+00> : vector<8x576xf32>
    %4 = tpu.matmul %1, %3, %cst {dimension_numbers = #tpu.dot_dimension_numbers<[1], [0], [0], [1], [0, 0, 1, 1], [], []>} : vector<8x8xf32>, vector<8x576xf32>, vector<8x576xf32> -> vector<8x576xf32>
    %5 = vector.broadcast %2 : vector<8x1xf32> to vector<8x576xf32>
    %6 = arith.addf %4, %5 : vector<8x576xf32>
    %c0_6 = arith.constant 0 : index
    %c0_7 = arith.constant 0 : index
    %c0_8 = arith.constant 0 : index
    %7 = vector.load %arg5[%c0_6, %c0_7, %c0_8] : memref<1x8x576xf32, #tpu.memory_space<vmem>>, vector<1x8x576xf32>
    %8 = vector.shape_cast %7 : vector<1x8x576xf32> to vector<8x576xf32>
    %9 = vector.shape_cast %6 : vector<8x576xf32> to vector<1x8x576xf32>
    tpu.vector_store %arg5[%c0_6, %c0_7, %c0_8], %9 {strides = array<i32>} : memref<1x8x576xf32, #tpu.memory_space<vmem>>, vector<1x8x576xf32>,
    %c0_9 = arith.constant 0 : index
    %c0_10 = arith.constant 0 : index
    %c0_11 = arith.constant 0 : index
    %10 = vector.load %arg3[%c0_9, %c0_10, %c0_11] : memref<1x8x144xf32, #tpu.memory_space<vmem>>, vector<1x8x144xf32>
    %11 = vector.shape_cast %10 : vector<1x8x144xf32> to vector<8x144xf32>
    %cst_12 = arith.constant dense<0.000000e+00> : vector<8x144xf32>
    %12 = tpu.matmul %1, %11, %cst_12 {dimension_numbers = #tpu.dot_dimension_numbers<[1], [0], [0], [1], [0, 0, 1, 1], [], []>} : vector<8x8xf32>, vector<8x144xf32>, vector<8x144xf32> -> vector<8x144xf32>
    %13 = vector.broadcast %2 : vector<8x1xf32> to vector<8x144xf32>
    %14 = arith.addf %12, %13 : vector<8x144xf32>
    %c0_13 = arith.constant 0 : index
    %c0_14 = arith.constant 0 : index
    %c0_15 = arith.constant 0 : index
    %15 = vector.load %arg6[%c0_13, %c0_14, %c0_15] : memref<1x8x144xf32, #tpu.memory_space<vmem>>, vector<1x8x144xf32>
    %16 = vector.shape_cast %15 : vector<1x8x144xf32> to vector<8x144xf32>
    %17 = vector.shape_cast %14 : vector<8x144xf32> to vector<1x8x144xf32>
    tpu.vector_store %arg6[%c0_13, %c0_14, %c0_15], %17 {strides = array<i32>} : memref<1x8x144xf32, #tpu.memory_space<vmem>>, vector<1x8x144xf32>,
    return
  }
  func.func @transform_0(%arg0: i32) -> (i32, i32, i32) {
    %c0_i32 = arith.constant 0 : i32
    %c0_i32_0 = arith.constant 0 : i32
    %c0_i32_1 = arith.constant 0 : i32
    return %arg0, %c0_i32, %c0_i32_0 : i32, i32, i32
  }
  func.func @transform_1(%arg0: i32) -> (i32, i32) {
    %c0_i32 = arith.constant 0 : i32
    %c0_i32_0 = arith.constant 0 : i32
    %c0_i32_1 = arith.constant 0 : i32
    return %c0_i32, %c0_i32_0 : i32, i32
  }
  func.func @transform_2(%arg0: i32) -> (i32, i32, i32) {
    %c0_i32 = arith.constant 0 : i32
    %c0_i32_0 = arith.constant 0 : i32
    %c0_i32_1 = arith.constant 0 : i32
    return %arg0, %c0_i32, %c0_i32_0 : i32, i32, i32
  }
  func.func @transform_3(%arg0: i32) -> (i32, i32) {
    %c0_i32 = arith.constant 0 : i32
    %c0_i32_0 = arith.constant 0 : i32
    %c0_i32_1 = arith.constant 0 : i32
    return %c0_i32, %c0_i32_0 : i32, i32
  }
  func.func @transform_4(%arg0: i32) -> (i32, i32, i32) {
    %c0_i32 = arith.constant 0 : i32
    %c0_i32_0 = arith.constant 0 : i32
    %c0_i32_1 = arith.constant 0 : i32
    return %arg0, %c0_i32, %c0_i32_0 : i32, i32, i32
  }
  func.func @transform_5(%arg0: i32) -> (i32, i32, i32) {
    %c0_i32 = arith.constant 0 : i32
    %c0_i32_0 = arith.constant 0 : i32
    %c0_i32_1 = arith.constant 0 : i32
    return %arg0, %c0_i32, %c0_i32_0 : i32, i32, i32
  }
}

</mosaic_0001>

<bundles_post_ra>
// kernel: _lambda_.4
= control target key start
LH: loop header
LB: loop body
LE: loop exit
PB: predicated region body
PF: predicated region fallthrough
CT: control target
= control target key end

     0   :  { %vm2800_vm0 = vcmask 130048   ;;  %vm4232_vm1 = vcmask 650240   ;;  %s9689_s1 = inlined_call_operand.vmem [shape: bf16[144,6480], index: 1, kind: input, shape index: {}]   ;;  %s9690_s0 = inlined_call_operand.vmem [shape: bf16[8,144], index: 0, kind: input, shape index: {}]   ;;  %s9691_s2 = inlined_call_operand.vmem [shape: f32[8,1], index: 2, kind: input, shape index: {}]   ;;  %s9692_s3 = inlined_call_operand.vmem [shape: bf16[8,6480], index: 3, kind: output, shape index: {}]  }
   0x1   :  { %v5872_v0 = vld [vmem:[%s9689_s1 + $0xcc0] sm:$0xf]  ;;  %v6558_v1 = vld [vmem:[%s9689_s1 + $0xd88] sm:$0xf0]  ;;  %v5670_v4 = vld [vmem:[%s9689_s1 + $0xbf4] sm:$0xf0] }
   0x2   :  { %v6482_v2 = vld [vmem:[%s9689_s1 + $0xb2c] sm:$0xf]  ;;  %v5873_v3 = vor.u32 %v6558_v1, %v5872_v0  ;;  %v5668_v5 = vld [vmem:[%s9689_s1 + $0xb28] sm:$0xf]  ;;  %v6507_v6 = vld [vmem:[%s9689_s1 + $0xbf0] sm:$0xf0] }
   0x3   :  { %v5673_v7 = vor.u32 %v6482_v2, %v5670_v4  ;;  %v5669_v8 = vor.u32 %v6507_v6, %v5668_v5  ;;  %v5676_v9 = vld [vmem:[%s9689_s1 + $0xb30] sm:$0xf]  ;;  %v6508_v10 = vld [vmem:[%s9689_s1 + $0xbf8] sm:$0xf0]  ;;  %v6533_v11 = vld [vmem:[%s9689_s1 + $0xcc4] sm:$0xf] }
   0x4   :  { %2824 = vmatpush.bf16.msra.mxu1 %v5873_v3  ;;  %v5677_v12 = vor.u32 %v6508_v10, %v5676_v9  ;;  %v5874_v13 = vld [vmem:[%s9689_s1 + $0xd8c] sm:$0xf0]  ;;  %v6431_v14 = vld [vmem:[%s9689_s1 + $0x994] sm:$0xf]  ;;  %v5466_v15 = vld [vmem:[%s9689_s1 + $0xa5c] sm:$0xf0] }
   0x5   :  { %2830 = vmatpush.bf16.msra.mxu2 %v5673_v7  ;;  %2804 = vmatpush.bf16.msra.mxu0 %v5669_v8  ;;  %v5877_v16 = vor.u32 %v6533_v11, %v5874_v13  ;;  %v5469_v17 = vor.u32 %v6431_v14, %v5466_v15  ;;  %v5464_v18 = vld [vmem:[%s9689_s1 + $0x990] sm:$0xf]  ;;  %v6456_v19 = vld [vmem:[%s9689_s1 + $0xa58] sm:$0xf0]  ;;  %v5472_v20 = vld [vmem:[%s9689_s1 + $0x998] sm:$0xf] }
   0x6   :  { %v5465_v21 = vor.u32 %v6456_v19, %v5464_v18  ;;  %v6457_v22 = vld [vmem:[%s9689_s1 + $0xa60] sm:$0xf0]  ;;  %v5880_v23 = vld [vmem:[%s9689_s1 + $0xcc8] sm:$0xf]  ;;  %v6559_v24 = vld [vmem:[%s9689_s1 + $0xd90] sm:$0xf0] }
   0x7   :  { %2850 = vmatpush.bf16.msra.mxu3 %v5877_v16  ;;  %v5473_v25 = vor.u32 %v6457_v22, %v5472_v20  ;;  %v5881_v26 = vor.u32 %v6559_v24, %v5880_v23  ;;  %v6664_v27 = vld [vmem:[%s9690_s0] sm:$0xff]  ;;  %v6483_v28 = vld [vmem:[%s9689_s1 + $0xb34] sm:$0xf]  ;;  %v6380_v31 = vld [vmem:[%s9689_s1 + $0x7fc] sm:$0xf] }
   0x8   :  { %2856 = vmatpush.bf16.msrb.mxu1 %v5677_v12  ;;  %v5678_v29 = vld [vmem:[%s9689_s1 + $0xbfc] sm:$0xf0]  ;;  %v492_v30 = vunpack.c.h.b16 %v6664_v27  ;;  %v5262_v32 = vld [vmem:[%s9689_s1 + $0x8c4] sm:$0xf0]  ;;  %v5260_v33 = vld [vmem:[%s9689_s1 + $0x7f8] sm:$0xf] }
   0x9   :  { %2831 = vmatpush.bf16.msra.mxu2 %v5469_v17  ;;  %2805 = vmatpush.bf16.msra.mxu0 %v5465_v21  ;;  %v5681_v34 = vor.u32 %v6483_v28, %v5678_v29  ;;  %v5265_v35 = vor.u32 %v6380_v31, %v5262_v32  ;;  %v6405_v36 = vld [vmem:[%s9689_s1 + $0x8c0] sm:$0xf0]  ;;  %v5268_v37 = vld [vmem:[%s9689_s1 + $0x800] sm:$0xf]  ;;  %v6406_v38 = vld [vmem:[%s9689_s1 + $0x8c8] sm:$0xf0] }
   0xa   :  { %v6691_v39 = vpack.c.b16 %v492_v30, %v492_v30  ;;  %v5261_v40 = vor.u32 %v6405_v36, %v5260_v33  ;;  %v5269_v41 = vor.u32 %v6406_v38, %v5268_v37  ;;  %v6432_v42 = vld [vmem:[%s9689_s1 + $0x99c] sm:$0xf]  ;;  %v5474_v43 = vld [vmem:[%s9689_s1 + $0xa64] sm:$0xf0]  ;;  %v6329_v44 = vld [vmem:[%s9689_s1 + $0x664] sm:$0xf]  ;;  %v491_v37 = vunpack.c.l.b16 %v6664_v27 }
   0xb   :  { %2876 = vmatpush.bf16.msrb.mxu3 %v5881_v26  ;;  %v5058_v45 = vld [vmem:[%s9689_s1 + $0x72c] sm:$0xf0]  ;;  %v5056_v46 = vld [vmem:[%s9689_s1 + $0x660] sm:$0xf]  ;;  %v6354_v47 = vld [vmem:[%s9689_s1 + $0x728] sm:$0xf0]  ;;  %v5477_v50 = vor.u32 %v6432_v42, %v5474_v43 }
   0xc   :  { %2857 = vmatpush.bf16.msrb.mxu1 %v5473_v25  ;;  %6075 = vmatmul.msk.bf16.vlgmr.msra.gmra.mxu3 %vm2800_vm0, %v6691_v39  ;;  %v5064_v48 = vld [vmem:[%s9689_s1 + $0x668] sm:$0xf]  ;;  %v6355_v49 = vld [vmem:[%s9689_s1 + $0x730] sm:$0xf0]  ;;  %v5061_v51 = vor.u32 %v6329_v44, %v5058_v45  ;;  %v6381_v52 = vld [vmem:[%s9689_s1 + $0x804] sm:$0xf]  ;;  %v5057_v54 = vor.u32 %v6354_v47, %v5056_v46 }
   0xd   :  { %6074 = vmatmul.msk.bf16.vlgmr.msra.gmra.mxu1 %vm2800_vm0, %v6691_v39  ;;  %2832 = vmatpush.bf16.msra.mxu2 %v5265_v35  ;;  %v5270_v53 = vld [vmem:[%s9689_s1 + $0x8cc] sm:$0xf0]  ;;  %v5065_v55 = vor.u32 %v6355_v49, %v5064_v48  ;;  %v6278_v56 = vld [vmem:[%s9689_s1 + $0x4cc] sm:$0xf]  ;;  %v4854_v57 = vld [vmem:[%s9689_s1 + $0x594] sm:$0xf0] }
   0xe   :  { %2806 = vmatpush.bf16.msra.mxu0 %v5261_v40  ;;  %v4852_v58 = vld [vmem:[%s9689_s1 + $0x4c8] sm:$0xf]  ;;  %v6303_v59 = vld [vmem:[%s9689_s1 + $0x590] sm:$0xf0]  ;;  %v4860_v60 = vld [vmem:[%s9689_s1 + $0x4d0] sm:$0xf]  ;;  %v5273_v62 = vor.u32 %v6381_v52, %v5270_v53  ;;  %v4857_v63 = vor.u32 %v6278_v56, %v4854_v57  ;;  %v6847_v52 = vpack.c.b16 %v491_v37, %v491_v37 }
   0xf   :  { %2882 = vmatpush.bf16.msra.mxu3 %v5681_v34  ;;  %v6304_v61 = vld [vmem:[%s9689_s1 + $0x598] sm:$0xf0]  ;;  %v6330_v0 = vld [vmem:[%s9689_s1 + $0x66c] sm:$0xf]  ;;  %v5066_v1 = vld [vmem:[%s9689_s1 + $0x734] sm:$0xf0]  ;;  %v4853_v2 = vor.u32 %v6303_v59, %v4852_v58 }
  0x10   :  { %2858 = vmatpush.bf16.msrb.mxu1 %v5269_v41  ;;  %v4861_v3 = vor.u32 %v6304_v61, %v4860_v60  ;;  %v6227_v4 = vld [vmem:[%s9689_s1 + $0x334] sm:$0xf]  ;;  %v4650_v5 = vld [vmem:[%s9689_s1 + $0x3fc] sm:$0xf0]  ;;  %v4648_v6 = vld [vmem:[%s9689_s1 + $0x330] sm:$0xf]  ;;  %v5069_v10 = vor.u32 %v6330_v0, %v5066_v1 }
  0x11   :  { %2833 = vmatpush.bf16.msra.mxu2 %v5061_v51  ;;  %v6252_v7 = vld [vmem:[%s9689_s1 + $0x3f8] sm:$0xf0]  ;;  %v4656_v8 = vld [vmem:[%s9689_s1 + $0x338] sm:$0xf]  ;;  %v6253_v9 = vld [vmem:[%s9689_s1 + $0x400] sm:$0xf0]  ;;  %v4653_v11 = vor.u32 %v6227_v4, %v4650_v5 }
  0x12   :  { %2807 = vmatpush.bf16.msra.mxu0 %v5057_v54  ;;  %v6279_v12 = vld [vmem:[%s9689_s1 + $0x4d4] sm:$0xf]  ;;  %v4862_v13 = vld [vmem:[%s9689_s1 + $0x59c] sm:$0xf0]  ;;  %v4649_v14 = vor.u32 %v6252_v7, %v4648_v6  ;;  %v4657_v15 = vor.u32 %v6253_v9, %v4656_v8  ;;  %v6176_v16 = vld [vmem:[%s9689_s1 + $0x19c] sm:$0xf] }
  0x13   :  { %2883 = vmatpush.bf16.msra.mxu3 %v5477_v50  ;;  %v4446_v17 = vld [vmem:[%s9689_s1 + $0x264] sm:$0xf0]  ;;  %v4444_v18 = vld [vmem:[%s9689_s1 + $0x198] sm:$0xf]  ;;  %v6201_v19 = vld [vmem:[%s9689_s1 + $0x260] sm:$0xf0]  ;;  %v4865_v22 = vor.u32 %v6279_v12, %v4862_v13 }
  0x14   :  { %2859 = vmatpush.bf16.msrb.mxu1 %v5065_v55  ;;  %v4452_v20 = vld [vmem:[%s9689_s1 + $0x1a0] sm:$0xf]  ;;  %v6202_v21 = vld [vmem:[%s9689_s1 + $0x268] sm:$0xf0]  ;;  %v4449_v23 = vor.u32 %v6176_v16, %v4446_v17  ;;  %v6228_v24 = vld [vmem:[%s9689_s1 + $0x33c] sm:$0xf]  ;;  %v4445_v28 = vor.u32 %v6201_v19, %v4444_v18 }
  0x15   :  { %2834 = vmatpush.bf16.msra.mxu2 %v4857_v63  ;;  %v4658_v25 = vld [vmem:[%s9689_s1 + $0x404] sm:$0xf0]  ;;  %v6125_v26 = vld [vmem:[%s9689_s1 + $0x4] sm:$0xf]  ;;  %v4453_v29 = vor.u32 %v6202_v21, %v4452_v20  ;;  %v4242_v30 = vld [vmem:[%s9689_s1 + $0xcc] sm:$0xf0] }
  0x16   :  { %2808 = vmatpush.bf16.msra.mxu0 %v4853_v2  ;;  %v4240_v31 = vld [vmem:[%s9689_s1] sm:$0xf]  ;;  %v6150_v32 = vld [vmem:[%s9689_s1 + $0xc8] sm:$0xf0]  ;;  %v4248_v33 = vld [vmem:[%s9689_s1 + $0x8] sm:$0xf]  ;;  %v4661_v41 = vor.u32 %v6228_v24, %v4658_v25  ;;  %v4245_v42 = vor.u32 %v6125_v26, %v4242_v30 }
  0x17   :  { %2884 = vmatpush.bf16.msra.mxu3 %v5273_v62  ;;  %v6151_v34 = vld [vmem:[%s9689_s1 + $0xd0] sm:$0xf0]  ;;  %v5684_v35 = vld [vmem:[%s9689_s1 + $0xb38] sm:$0xf]  ;;  %v6509_v36 = vld [vmem:[%s9689_s1 + $0xc00] sm:$0xf0]  ;;  %v4241_v43 = vor.u32 %v6150_v32, %v4240_v31 }
  0x18   :  { %2860 = vmatpush.bf16.msrb.mxu1 %v4861_v3  ;;  %v6534_v38 = vld [vmem:[%s9689_s1 + $0xccc] sm:$0xf]  ;;  %v5882_v40 = vld [vmem:[%s9689_s1 + $0xd94] sm:$0xf0]  ;;  %v4249_v44 = vor.u32 %v6151_v34, %v4248_v33  ;;  %v6177_v27 = vld [vmem:[%s9689_s1 + $0x1a4] sm:$0xf]  ;;  %v5685_v47 = vor.u32 %v6509_v36, %v5684_v35 }
  0x19   :  { %2835 = vmatpush.bf16.msra.mxu2 %v4653_v11  ;;  %v4454_v45 = vld [vmem:[%s9689_s1 + $0x26c] sm:$0xf0]  ;;  %v484_v46 = vld [vmem:[%s9691_s2] sm:$0xff]  ;;  %v5885_v48 = vor.u32 %v6534_v38, %v5882_v40  ;;  %v6484_v49 = vld [vmem:[%s9689_s1 + $0xb3c] sm:$0xf]  ;;  %v6586_v51 = vmov 0  }
  0x1a   :  { %2809 = vmatpush.bf16.msra.mxu0 %v4649_v14  ;;  %v5686_v50 = vld [vmem:[%s9689_s1 + $0xc04] sm:$0xf0]  ;;  %6585 = vset.pattern.permute.xlu0 %v6586_v51  ;;  %v5480_v53 = vld [vmem:[%s9689_s1 + $0x9a0] sm:$0xf]  ;;  %v6458_v54 = vld [vmem:[%s9689_s1 + $0xa68] sm:$0xf0]  ;;  %v4457_v56 = vor.u32 %v6177_v27, %v4454_v45 }
  0x1b   :  { %2885 = vmatpush.bf16.msra.mxu3 %v5069_v10  ;;  %v6126_v55 = vld [vmem:[%s9689_s1 + $0xc] sm:$0xf]  ;;  %487 = vperm.xlu0 %6585, %v484_v46   ;;  %v4250_v57 = vld [vmem:[%s9689_s1 + $0xd4] sm:$0xf0]  ;;  %v5888_v58 = vld [vmem:[%s9689_s1 + $0xcd0] sm:$0xf]  ;;  %v5689_v60 = vor.u32 %v6484_v49, %v5686_v50  ;;  %v5481_v1 = vor.u32 %v6458_v54, %v5480_v53 }
  0x1c   :  { %2861 = vmatpush.bf16.msrb.mxu1 %v4657_v15  ;;  %6076 = vmatmul.msk.bf16.vlgmr.msrb.gmra.mxu3 %vm2800_vm0, %v6691_v39  ;;  %v6560_v59 = vld [vmem:[%s9689_s1 + $0xd98] sm:$0xf0]  ;;  %v5692_v61 = vld [vmem:[%s9689_s1 + $0xb40] sm:$0xf]  ;;  %v6535_v63 = vld [vmem:[%s9689_s1 + $0xcd4] sm:$0xf]  ;;  %v4253_v8 = vor.u32 %v6126_v55, %v4250_v57 }
  0x1d   :  { %2836 = vmatpush.bf16.msra.mxu2 %v4449_v23  ;;  %v5889_v62 = vor.u32 %v6560_v59, %v5888_v58  ;;  %v5890_v0 = vld [vmem:[%s9689_s1 + $0xd9c] sm:$0xf0]  ;;  %v6510_v2 = vld [vmem:[%s9689_s1 + $0xc08] sm:$0xf0]  ;;  %v6433_v3 = vld [vmem:[%s9689_s1 + $0x9a4] sm:$0xf] }
  0x1e   :  { %2810 = vmatpush.bf16.msra.mxu0 %v4445_v28  ;;  %v5482_v4 = vld [vmem:[%s9689_s1 + $0xa6c] sm:$0xf0]  ;;  %v5893_v5 = vor.u32 %v6535_v63, %v5890_v0  ;;  %v5276_v6 = vld [vmem:[%s9689_s1 + $0x808] sm:$0xf]  ;;  %v6407_v7 = vld [vmem:[%s9689_s1 + $0x8d0] sm:$0xf0]  ;;  %v5693_v9 = vor.u32 %v6510_v2, %v5692_v61 }
  0x1f   :  { %2886 = vmatpush.bf16.msra.mxu3 %v4865_v22  ;;  %v5485_v10 = vor.u32 %v6433_v3, %v5482_v4  ;;  %v5488_v11 = vld [vmem:[%s9689_s1 + $0x9a8] sm:$0xf]  ;;  %v5277_v12 = vor.u32 %v6407_v7, %v5276_v6  ;;  %v6459_v13 = vld [vmem:[%s9689_s1 + $0xa70] sm:$0xf0]  ;;  %v6382_v14 = vld [vmem:[%s9689_s1 + $0x80c] sm:$0xf] }
  0x20   :  { %2862 = vmatpush.bf16.msrb.mxu1 %v4453_v29  ;;  %v5278_v15 = vld [vmem:[%s9689_s1 + $0x8d4] sm:$0xf0]  ;;  %v5072_v16 = vld [vmem:[%s9689_s1 + $0x670] sm:$0xf]  ;;  %v6356_v17 = vld [vmem:[%s9689_s1 + $0x738] sm:$0xf0]  ;;  %v5489_v18 = vor.u32 %v6459_v13, %v5488_v11 }
  0x21   :  { %2837 = vmatpush.bf16.msra.mxu2 %v4245_v42  ;;  %v5281_v19 = vor.u32 %v6382_v14, %v5278_v15  ;;  %v5284_v20 = vld [vmem:[%s9689_s1 + $0x810] sm:$0xf]  ;;  %v5073_v21 = vor.u32 %v6356_v17, %v5072_v16  ;;  %v6408_v22 = vld [vmem:[%s9689_s1 + $0x8d8] sm:$0xf0]  ;;  %v6331_v23 = vld [vmem:[%s9689_s1 + $0x674] sm:$0xf] }
  0x22   :  { %2811 = vmatpush.bf16.msra.mxu0 %v4241_v43  ;;  %v5074_v24 = vld [vmem:[%s9689_s1 + $0x73c] sm:$0xf0]  ;;  %v4868_v25 = vld [vmem:[%s9689_s1 + $0x4d8] sm:$0xf]  ;;  %v6305_v26 = vld [vmem:[%s9689_s1 + $0x5a0] sm:$0xf0]  ;;  %v5285_v28 = vor.u32 %v6408_v22, %v5284_v20 }
  0x23   :  { %2887 = vmatpush.bf16.msra.mxu3 %v4661_v41  ;;  %v5077_v29 = vor.u32 %v6331_v23, %v5074_v24  ;;  %v4869_v30 = vor.u32 %v6305_v26, %v4868_v25  ;;  %v5080_v31 = vld [vmem:[%s9689_s1 + $0x678] sm:$0xf]  ;;  %v6357_v32 = vld [vmem:[%s9689_s1 + $0x740] sm:$0xf0]  ;;  %v4664_v33 = vld [vmem:[%s9689_s1 + $0x340] sm:$0xf] }
  0x24   :  { %2863 = vmatpush.bf16.msrb.mxu1 %v4249_v44  ;;  %2838 = vmatmul.bf16.vlgmr.msra.gmra.mxu2 %v6847_v52  ;;  %v6254_v34 = vld [vmem:[%s9689_s1 + $0x408] sm:$0xf0]  ;;  %v6485_v35 = vld [vmem:[%s9689_s1 + $0xb44] sm:$0xf]  ;;  %v5694_v36 = vld [vmem:[%s9689_s1 + $0xc0c] sm:$0xf0]  ;;  %v5081_v40 = vor.u32 %v6357_v32, %v5080_v31 }
  0x25   :  { %2908 = vmatpush.bf16.msrb.mxu2 %v5685_v47  ;;  %2812 = vmatmul.bf16.vlgmr.msra.gmra.mxu0 %v6847_v52  ;;  %v6280_v37 = vld [vmem:[%s9689_s1 + $0x4dc] sm:$0xf]  ;;  %v4870_v38 = vld [vmem:[%s9689_s1 + $0x5a4] sm:$0xf0]  ;;  %v4665_v41 = vor.u32 %v6254_v34, %v4664_v33  ;;  %v5697_v42 = vor.u32 %v6485_v35, %v5694_v36  ;;  %v4876_v43 = vld [vmem:[%s9689_s1 + $0x4e0] sm:$0xf] }
  0x26   :  { %2902 = vmatpush.bf16.msrb.mxu0 %v5885_v48  ;;  %v6306_v44 = vld [vmem:[%s9689_s1 + $0x5a8] sm:$0xf0]  ;;  %v4460_v27 = vld [vmem:[%s9689_s1 + $0x1a8] sm:$0xf]  ;;  %v4873_v45 = vor.u32 %v6280_v37, %v4870_v38  ;;  %v6203_v46 = vld [vmem:[%s9689_s1 + $0x270] sm:$0xf0] }
  0x27   :  { %2888 = vmatpush.bf16.msra.mxu3 %v4457_v56  ;;  %2864 = vmatmul.bf16.vlgmr.msrb.gmra.mxu1 %v6847_v52  ;;  %v6434_v47 = vld [vmem:[%s9689_s1 + $0x9ac] sm:$0xf]  ;;  %v5490_v48 = vld [vmem:[%s9689_s1 + $0xa74] sm:$0xf0]  ;;  %v6229_v49 = vld [vmem:[%s9689_s1 + $0x344] sm:$0xf]  ;;  %v4877_v51 = vor.u32 %v6306_v44, %v4876_v43  ;;  %v4461_v54 = vor.u32 %v6203_v46, %v4460_v27 }
  0x28   :  { %2928 = vmatpush.bf16.msra.mxu1 %v5889_v62  ;;  %v4666_v50 = vld [vmem:[%s9689_s1 + $0x40c] sm:$0xf0]  ;;  %v4672_v53 = vld [vmem:[%s9689_s1 + $0x348] sm:$0xf]  ;;  %v5493_v55 = vor.u32 %v6434_v47, %v5490_v48  ;;  %v6255_v56 = vld [vmem:[%s9689_s1 + $0x410] sm:$0xf0] }
  0x29   :  { %2909 = vmatpush.bf16.msrb.mxu2 %v5481_v1  ;;  %v4256_v57 = vld [vmem:[%s9689_s1 + $0x10] sm:$0xf]  ;;  %v6152_v58 = vld [vmem:[%s9689_s1 + $0xd8] sm:$0xf0]  ;;  %v4669_v59 = vor.u32 %v6229_v49, %v4666_v50  ;;  %v5286_v61 = vld [vmem:[%s9689_s1 + $0x8dc] sm:$0xf0]  ;;  %v4673_v2 = vor.u32 %v6255_v56, %v4672_v53 }
  0x2a   :  { %2934 = vmatpush.bf16.msra.mxu0 %v5689_v60  ;;  %v6383_v60 = vld [vmem:[%s9689_s1 + $0x814] sm:$0xf]  ;;  %v6178_v62 = vld [vmem:[%s9689_s1 + $0x1ac] sm:$0xf]  ;;  %v4462_v63 = vld [vmem:[%s9689_s1 + $0x274] sm:$0xf0]  ;;  %v4257_v3 = vor.u32 %v6152_v58, %v4256_v57 }
  0x2b   :  { %2889 = vmatpush.bf16.msra.mxu3 %v4253_v8  ;;  %v5896_v0 = vld [vmem:[%s9689_s1 + $0xcd8] sm:$0xf]  ;;  %v6561_v1 = vld [vmem:[%s9689_s1 + $0xda0] sm:$0xf0]  ;;  %v5289_v4 = vor.u32 %v6383_v60, %v5286_v61  ;;  %v6204_v6 = vld [vmem:[%s9689_s1 + $0x278] sm:$0xf0]  ;;  %v4465_v8 = vor.u32 %v6178_v62, %v4462_v63 }
  0x2c   :  { %2954 = vmatpush.bf16.msrb.mxu1 %v5893_v5  ;;  %v4468_v5 = vld [vmem:[%s9689_s1 + $0x1b0] sm:$0xf]  ;;  %v6332_v7 = vld [vmem:[%s9689_s1 + $0x67c] sm:$0xf]  ;;  %v5700_v11 = vld [vmem:[%s9689_s1 + $0xb48] sm:$0xf] }
  0x2d   :  { %2910 = vmatpush.bf16.msrb.mxu2 %v5277_v12  ;;  %v6511_v12 = vld [vmem:[%s9689_s1 + $0xc10] sm:$0xf0]  ;;  %v4258_v14 = vld [vmem:[%s9689_s1 + $0xdc] sm:$0xf0]  ;;  %v4469_v15 = vor.u32 %v6204_v6, %v4468_v5  ;;  %v6536_v16 = vld [vmem:[%s9689_s1 + $0xcdc] sm:$0xf] }
  0x2e   :  { %2935 = vmatpush.bf16.msra.mxu0 %v5485_v10  ;;  %2890 = vmatmul.bf16.vlgmr.msra.gmra.mxu3 %v6847_v52  ;;  %v5082_v10 = vld [vmem:[%s9689_s1 + $0x744] sm:$0xf0]  ;;  %v6127_v13 = vld [vmem:[%s9689_s1 + $0x14] sm:$0xf]  ;;  %v4264_v20 = vld [vmem:[%s9689_s1 + $0x18] sm:$0xf] }
  0x2f   :  { %2960 = vmatpush.bf16.msrb.mxu3 %v5693_v9  ;;  %v5897_v9 = vor.u32 %v6561_v1, %v5896_v0  ;;  %v5898_v17 = vld [vmem:[%s9689_s1 + $0xda4] sm:$0xf0]  ;;  %v6281_v22 = vld [vmem:[%s9689_s1 + $0x4e4] sm:$0xf]  ;;  %v4261_v23 = vor.u32 %v6127_v13, %v4258_v14  ;;  %v4878_v24 = vld [vmem:[%s9689_s1 + $0x5ac] sm:$0xf0] }
  0x30   :  { %v5496_v25 = vld [vmem:[%s9689_s1 + $0x9b0] sm:$0xf]  ;;  %v6460_v26 = vld [vmem:[%s9689_s1 + $0xa78] sm:$0xf0]  ;;  %v6486_v32 = vld [vmem:[%s9689_s1 + $0xb4c] sm:$0xf]  ;;  %v4881_v34 = vor.u32 %v6281_v22, %v4878_v24 }
  0x31   :  { %2911 = vmatpush.bf16.msrb.mxu2 %v5073_v21  ;;  %v6153_v21 = vld [vmem:[%s9689_s1 + $0xe0] sm:$0xf0]  ;;  %v5702_v33 = vld [vmem:[%s9689_s1 + $0xc14] sm:$0xf0]  ;;  %v5497_v35 = vor.u32 %v6460_v26, %v5496_v25  ;;  %v5708_v36 = vld [vmem:[%s9689_s1 + $0xb50] sm:$0xf] }
  0x32   :  { %2936 = vmatpush.bf16.msra.mxu0 %v5281_v19  ;;  %v5701_v19 = vor.u32 %v6511_v12, %v5700_v11  ;;  %v4265_v31 = vor.u32 %v6153_v21, %v4264_v20  ;;  %v6512_v37 = vld [vmem:[%s9689_s1 + $0xc18] sm:$0xf0]  ;;  %v6230_v38 = vld [vmem:[%s9689_s1 + $0x34c] sm:$0xf]  ;;  %v6409_v43 = vld [vmem:[%s9689_s1 + $0x8e0] sm:$0xf0]  ;;  %v5705_v44 = vor.u32 %v6486_v32, %v5702_v33 }
  0x33   :  { %2961 = vmatpush.bf16.msrb.mxu3 %v5489_v18  ;;  %v5085_v18 = vor.u32 %v6332_v7, %v5082_v10  ;;  %v5709_v27 = vor.u32 %v6512_v37, %v5708_v36  ;;  %v5498_v46 = vld [vmem:[%s9689_s1 + $0xa7c] sm:$0xf0]  ;;  %v5504_v49 = vld [vmem:[%s9689_s1 + $0x9b8] sm:$0xf]  ;;  %v6461_v50 = vld [vmem:[%s9689_s1 + $0xa80] sm:$0xf0] }
  0x34   :  { %v4470_v53 = vld [vmem:[%s9689_s1 + $0x27c] sm:$0xf0]  ;;  %v5505_v57 = vor.u32 %v6461_v50, %v5504_v49  ;;  %v6384_v58 = vld [vmem:[%s9689_s1 + $0x81c] sm:$0xf]  ;;  %v6410_v63 = vld [vmem:[%s9689_s1 + $0x8e8] sm:$0xf0] }
  0x35   :  { %2912 = vmatpush.bf16.msrb.mxu2 %v4869_v30  ;;  %6077 = vmatmul.msk.bf16.vlgmr.msrb.gmra.mxu0 %vm2800_vm0, %v6691_v39  ;;  %v6562_v30 = vld [vmem:[%s9689_s1 + $0xda8] sm:$0xf0]  ;;  %v5300_v62 = vld [vmem:[%s9689_s1 + $0x820] sm:$0xf]  ;;  %v6128_v0 = vld [vmem:[%s9689_s1 + $0x1c] sm:$0xf] }
  0x36   :  { %2937 = vmatpush.bf16.msra.mxu0 %v5077_v29  ;;  %v5904_v29 = vld [vmem:[%s9689_s1 + $0xce0] sm:$0xf]  ;;  %v4266_v1 = vld [vmem:[%s9689_s1 + $0xe4] sm:$0xf0]  ;;  %v6537_v5 = vld [vmem:[%s9689_s1 + $0xce4] sm:$0xf]  ;;  %v5301_v7 = vor.u32 %v6410_v63, %v5300_v62 }
  0x37   :  { %2962 = vmatpush.bf16.msrb.mxu3 %v5285_v28  ;;  %6078 = vmatmul.msk.bf16.vlgmr.msra.gmra.mxu1 %vm2800_vm0, %v6691_v39  ;;  %v5901_v28 = vor.u32 %v6536_v16, %v5898_v17  ;;  %v5906_v6 = vld [vmem:[%s9689_s1 + $0xdac] sm:$0xf0]  ;;  %v4269_v10 = vor.u32 %v6128_v0, %v4266_v1  ;;  %v5096_v12 = vld [vmem:[%s9689_s1 + $0x688] sm:$0xf]  ;;  %v6359_v13 = vld [vmem:[%s9689_s1 + $0x750] sm:$0xf0] }
  0x38   :  { %2986 = vmatpush.bf16.msra.mxu1 %v5697_v42  ;;  %v5292_v42 = vld [vmem:[%s9689_s1 + $0x818] sm:$0xf]  ;;  %v4680_v14 = vld [vmem:[%s9689_s1 + $0x350] sm:$0xf]  ;;  %v6256_v16 = vld [vmem:[%s9689_s1 + $0x418] sm:$0xf0]  ;;  %v5097_v20 = vor.u32 %v6359_v13, %v5096_v12 }
  0x39   :  { %2913 = vmatpush.bf16.msrb.mxu2 %v4665_v41  ;;  %v4674_v41 = vld [vmem:[%s9689_s1 + $0x414] sm:$0xf0]  ;;  %v5293_v48 = vor.u32 %v6409_v43, %v5292_v42  ;;  %v6487_v17 = vld [vmem:[%s9689_s1 + $0xb54] sm:$0xf]  ;;  %v6282_v21 = vld [vmem:[%s9689_s1 + $0x4ec] sm:$0xf] }
  0x3a   :  { %2938 = vmatpush.bf16.msra.mxu0 %v4873_v45  ;;  %v6435_v45 = vld [vmem:[%s9689_s1 + $0x9b4] sm:$0xf]  ;;  %v4677_v47 = vor.u32 %v6230_v38, %v4674_v41  ;;  %v4886_v22 = vld [vmem:[%s9689_s1 + $0x5b4] sm:$0xf0]  ;;  %v4892_v25 = vld [vmem:[%s9689_s1 + $0x4f0] sm:$0xf] }
  0x3b   :  { %2963 = vmatpush.bf16.msrb.mxu3 %v5081_v40  ;;  %v5905_v40 = vor.u32 %v6562_v30, %v5904_v29  ;;  %v5501_v56 = vor.u32 %v6435_v45, %v5498_v46  ;;  %v6308_v26 = vld [vmem:[%s9689_s1 + $0x5b8] sm:$0xf0]  ;;  %v6205_v29 = vld [vmem:[%s9689_s1 + $0x280] sm:$0xf0]  ;;  %v4889_v32 = vor.u32 %v6282_v21, %v4886_v22  ;;  %v4688_v38 = vld [vmem:[%s9689_s1 + $0x358] sm:$0xf] }
  0x3c   :  { %2987 = vmatpush.bf16.msra.mxu1 %v5493_v55  ;;  %v6358_v55 = vld [vmem:[%s9689_s1 + $0x748] sm:$0xf0]  ;;  %v6436_v30 = vld [vmem:[%s9689_s1 + $0x9bc] sm:$0xf]  ;;  %v4893_v33 = vor.u32 %v6308_v26, %v4892_v25  ;;  %v4272_v41 = vld [vmem:[%s9689_s1 + $0x20] sm:$0xf] }
  0x3d   :  { %2914 = vmatpush.bf16.msrb.mxu2 %v4461_v54  ;;  %v5088_v54 = vld [vmem:[%s9689_s1 + $0x680] sm:$0xf]  ;;  %v6154_v42 = vld [vmem:[%s9689_s1 + $0xe8] sm:$0xf0]  ;;  %v6385_v43 = vld [vmem:[%s9689_s1 + $0x824] sm:$0xf] }
  0x3e   :  { %2939 = vmatpush.bf16.msra.mxu0 %v4669_v59  ;;  %v5294_v59 = vld [vmem:[%s9689_s1 + $0x8e4] sm:$0xf0]  ;;  %v5089_v61 = vor.u32 %v6358_v55, %v5088_v54  ;;  %v6563_v46 = vld [vmem:[%s9689_s1 + $0xdb0] sm:$0xf0]  ;;  %v4273_v50 = vor.u32 %v6154_v42, %v4272_v41  ;;  %v6206_v54 = vld [vmem:[%s9689_s1 + $0x288] sm:$0xf0] }
  0x3f   :  { %2964 = vmatpush.bf16.msrb.mxu3 %v4877_v51  ;;  %v6179_v51 = vld [vmem:[%s9689_s1 + $0x1b4] sm:$0xf]  ;;  %v5912_v45 = vld [vmem:[%s9689_s1 + $0xce8] sm:$0xf]  ;;  %v6334_v55 = vld [vmem:[%s9689_s1 + $0x68c] sm:$0xf] }
  0x40   :  { %2988 = vmatpush.bf16.msra.mxu1 %v5289_v4  ;;  %v4473_v60 = vor.u32 %v6179_v51, %v4470_v53  ;;  %v5297_v4 = vor.u32 %v6384_v58, %v5294_v59  ;;  %v4478_v49 = vld [vmem:[%s9689_s1 + $0x284] sm:$0xf0]  ;;  %v4484_v53 = vld [vmem:[%s9689_s1 + $0x1c0] sm:$0xf]  ;;  %v5716_v58 = vld [vmem:[%s9689_s1 + $0xb58] sm:$0xf] }
  0x41   :  { %2915 = vmatpush.bf16.msrb.mxu2 %v4257_v3  ;;  %v6307_v3 = vld [vmem:[%s9689_s1 + $0x5b0] sm:$0xf0]  ;;  %v6513_v59 = vld [vmem:[%s9689_s1 + $0xc20] sm:$0xf0]  ;;  %v4274_v63 = vld [vmem:[%s9689_s1 + $0xec] sm:$0xf0] }
  0x42   :  { %2940 = vmatpush.bf16.msra.mxu0 %v4465_v8  ;;  %v6333_v8 = vld [vmem:[%s9689_s1 + $0x684] sm:$0xf]  ;;  %v5717_v1 = vor.u32 %v6513_v59, %v5716_v58  ;;  %v5914_v13 = vld [vmem:[%s9689_s1 + $0xdb4] sm:$0xf0]  ;;  %v4690_v22 = vld [vmem:[%s9689_s1 + $0x424] sm:$0xf0] }
  0x43   :  { %2965 = vmatpush.bf16.msrb.mxu3 %v4673_v2  ;;  %v4884_v2 = vld [vmem:[%s9689_s1 + $0x4e8] sm:$0xf]  ;;  %v6129_v62 = vld [vmem:[%s9689_s1 + $0x24] sm:$0xf]  ;;  %v6386_v42 = vld [vmem:[%s9689_s1 + $0x82c] sm:$0xf] }
  0x44   :  { %2916 = vmatmul.bf16.vlgmr.msrb.gmra.mxu2 %v6847_v52  ;;  %2989 = vmatpush.bf16.msra.mxu1 %v5085_v18  ;;  %v4885_v11 = vor.u32 %v6307_v3, %v4884_v2  ;;  %v5710_v18 = vld [vmem:[%s9689_s1 + $0xc1c] sm:$0xf0]  ;;  %v4280_v2 = vld [vmem:[%s9689_s1 + $0x28] sm:$0xf]  ;;  %v6155_v3 = vld [vmem:[%s9689_s1 + $0xf0] sm:$0xf0] }
  0x45   :  { %2980 = vmatpush.bf16.msra.mxu2 %v5897_v9  ;;  %v5090_v9 = vld [vmem:[%s9689_s1 + $0x74c] sm:$0xf0]  ;;  %v5713_v24 = vor.u32 %v6487_v17, %v5710_v18  ;;  %v4281_v12 = vor.u32 %v6155_v3, %v4280_v2  ;;  %v5724_v18 = vld [vmem:[%s9689_s1 + $0xb60] sm:$0xf]  ;;  %v5112_v59 = vld [vmem:[%s9689_s1 + $0x698] sm:$0xf] }
  0x46   :  { %2941 = vmatpush.bf16.msra.mxu0 %v4261_v23  ;;  %v4681_v23 = vor.u32 %v6256_v16, %v4680_v14  ;;  %v6488_v14 = vld [vmem:[%s9689_s1 + $0xb5c] sm:$0xf]  ;;  %v5106_v58 = vld [vmem:[%s9689_s1 + $0x75c] sm:$0xf0]  ;;  %v6258_v2 = vld [vmem:[%s9689_s1 + $0x428] sm:$0xf0] }
  0x47   :  { %2966 = vmatpush.bf16.msrb.mxu3 %v4469_v15  ;;  %6079 = vmatmul.msk.bf16.vlgmr.msrb.gmra.mxu1 %vm2800_vm0, %v6691_v39  ;;  %v5909_v15 = vor.u32 %v6537_v5, %v5906_v6  ;;  %v4894_v5 = vld [vmem:[%s9689_s1 + $0x5bc] sm:$0xf0] }
  0x48   :  { %2990 = vmatpush.bf16.msra.mxu1 %v4881_v34  ;;  %v6231_v34 = vld [vmem:[%s9689_s1 + $0x354] sm:$0xf]  ;;  %v5512_v6 = vld [vmem:[%s9689_s1 + $0x9c0] sm:$0xf] }
  0x49   :  { %3012 = vmatpush.bf16.msrb.mxu2 %v5701_v19  ;;  %2942 = vmatmul.bf16.vlgmr.msra.gmra.mxu0 %v6847_v52  ;;  %v5093_v19 = vor.u32 %v6333_v8, %v5090_v9  ;;  %v4277_v8 = vor.u32 %v6129_v62, %v4274_v63  ;;  %v6538_v9 = vld [vmem:[%s9689_s1 + $0xcec] sm:$0xf]  ;;  %v6361_v62 = vld [vmem:[%s9689_s1 + $0x760] sm:$0xf0] }
  0x4a   :  { %3006 = vmatpush.bf16.msrb.mxu0 %v5901_v28  ;;  %v4476_v28 = vld [vmem:[%s9689_s1 + $0x1b8] sm:$0xf]  ;;  %v5917_v25 = vor.u32 %v6538_v9, %v5914_v13  ;;  %v6489_v63 = vld [vmem:[%s9689_s1 + $0xb64] sm:$0xf]  ;;  %v4492_v13 = vld [vmem:[%s9689_s1 + $0x1c8] sm:$0xf] }
  0x4b   :  { %2967 = vmatpush.bf16.msrb.mxu3 %v4265_v31  ;;  %v5506_v31 = vld [vmem:[%s9689_s1 + $0xa84] sm:$0xf0]  ;;  %v4477_v36 = vor.u32 %v6205_v29, %v4476_v28  ;;  %v6437_v29 = vld [vmem:[%s9689_s1 + $0x9c4] sm:$0xf] }
  0x4c   :  { %2991 = vmatpush.bf16.msra.mxu1 %v4677_v47  ;;  %v5509_v37 = vor.u32 %v6436_v30, %v5506_v31  ;;  %v5514_v30 = vld [vmem:[%s9689_s1 + $0xa8c] sm:$0xf0] }
  0x4d   :  { %3013 = vmatpush.bf16.msrb.mxu2 %v5497_v35  ;;  %v4682_v35 = vld [vmem:[%s9689_s1 + $0x41c] sm:$0xf0] }
  0x4e   :  { %2968 = vmatmul.bf16.vlgmr.msrb.gmra.mxu3 %v6847_v52  ;;  %3038 = vmatpush.bf16.msra.mxu0 %v5705_v44  ;;  %v5302_v44 = vld [vmem:[%s9689_s1 + $0x8ec] sm:$0xf0] }
  0x4f   :  { %3032 = vmatpush.bf16.msra.mxu3 %v5905_v40  ;;  %v6257_v40 = vld [vmem:[%s9689_s1 + $0x420] sm:$0xf0]  ;;  %v5305_v51 = vor.u32 %v6385_v43, %v5302_v44 }
  0x50   :  { %2992 = vmatpush.bf16.msra.mxu1 %v4473_v60  ;;  %v4689_v47 = vor.u32 %v6257_v40, %v4688_v38  ;;  %v6360_v38 = vld [vmem:[%s9689_s1 + $0x758] sm:$0xf0]  ;;  %v5517_v40 = vor.u32 %v6437_v29, %v5514_v30  ;;  %v5928_v29 = vld [vmem:[%s9689_s1 + $0xcf8] sm:$0xf]  ;;  %v6565_v30 = vld [vmem:[%s9689_s1 + $0xdc0] sm:$0xf0] }
  0x51   :  { %3014 = vmatpush.bf16.msrb.mxu2 %v5293_v48  ;;  %v6180_v48 = vld [vmem:[%s9689_s1 + $0x1bc] sm:$0xf] }
  0x52   :  { %3039 = vmatpush.bf16.msra.mxu0 %v5501_v56  ;;  %v5913_v56 = vor.u32 %v6563_v46, %v5912_v45  ;;  %v4481_v60 = vor.u32 %v6180_v48, %v4478_v49  ;;  %v5316_v45 = vld [vmem:[%s9689_s1 + $0x830] sm:$0xf]  ;;  %v6412_v46 = vld [vmem:[%s9689_s1 + $0x8f8] sm:$0xf0]  ;;  %v4282_v48 = vld [vmem:[%s9689_s1 + $0xf4] sm:$0xf0] }
  0x53   :  { %3064 = vmatpush.bf16.msrb.mxu3 %v5709_v27  ;;  %v4685_v27 = vor.u32 %v6231_v34, %v4682_v35  ;;  %v6463_v34 = vld [vmem:[%s9689_s1 + $0xa90] sm:$0xf0]  ;;  %v6181_v35 = vld [vmem:[%s9689_s1 + $0x1c4] sm:$0xf]  ;;  %v4900_v49 = vld [vmem:[%s9689_s1 + $0x4f8] sm:$0xf] }
  0x54   :  { %6080 = vmatmul.msk.bf16.vlgmr.msra.gmra.mxu2 %vm2800_vm0, %v6691_v39  ;;  %2993 = vmatpush.bf16.msra.mxu1 %v4269_v10  ;;  %v5920_v10 = vld [vmem:[%s9689_s1 + $0xcf0] sm:$0xf] }
  0x55   :  { %3015 = vmatpush.bf16.msrb.mxu2 %v5089_v61  ;;  %v4485_v61 = vor.u32 %v6206_v54, %v4484_v53  ;;  %v5922_v53 = vld [vmem:[%s9689_s1 + $0xdbc] sm:$0xf0] }
  0x56   :  { %3040 = vmatpush.bf16.msra.mxu0 %v5297_v4  ;;  %v6283_v4 = vld [vmem:[%s9689_s1 + $0x4f4] sm:$0xf] }
  0x57   :  { %3065 = vmatpush.bf16.msrb.mxu3 %v5505_v57  ;;  %2994 = vmatmul.bf16.vlgmr.msra.gmra.mxu1 %v6847_v52  ;;  %v5098_v57 = vld [vmem:[%s9689_s1 + $0x754] sm:$0xf0]  ;;  %v4897_v16 = vor.u32 %v6283_v4, %v4894_v5  ;;  %v5113_v4 = vor.u32 %v6361_v62, %v5112_v59  ;;  %v5936_v59 = vld [vmem:[%s9689_s1 + $0xd00] sm:$0xf] }
  0x58   :  { %3058 = vmatpush.bf16.msrb.mxu1 %v5909_v15  ;;  %v5101_v0 = vor.u32 %v6334_v55, %v5098_v57  ;;  %v5718_v15 = vld [vmem:[%s9689_s1 + $0xc24] sm:$0xf0]  ;;  %v5317_v55 = vor.u32 %v6412_v46, %v5316_v45  ;;  %v6335_v57 = vld [vmem:[%s9689_s1 + $0x694] sm:$0xf]  ;;  %v4290_v46 = vld [vmem:[%s9689_s1 + $0xfc] sm:$0xf0] }
  0x59   :  { %3016 = vmatpush.bf16.msrb.mxu2 %v4885_v11  ;;  %6081 = vmatmul.msk.bf16.vlgmr.msrb.gmra.mxu0 %vm2800_vm0, %v6691_v39  ;;  %v6564_v11 = vld [vmem:[%s9689_s1 + $0xdb8] sm:$0xf0]  ;;  %v5721_v26 = vor.u32 %v6488_v14, %v5718_v15  ;;  %v5109_v3 = vor.u32 %v6335_v57, %v5106_v58  ;;  %v6207_v14 = vld [vmem:[%s9689_s1 + $0x290] sm:$0xf0] }
  0x5a   :  { %3041 = vmatpush.bf16.msra.mxu0 %v5093_v19  ;;  %v6514_v19 = vld [vmem:[%s9689_s1 + $0xc28] sm:$0xf0]  ;;  %v5921_v21 = vor.u32 %v6564_v11, %v5920_v10  ;;  %v6464_v57 = vld [vmem:[%s9689_s1 + $0xa98] sm:$0xf0] }
  0x5b   :  { %3066 = vmatpush.bf16.msrb.mxu3 %v5301_v7  ;;  %v6462_v7 = vld [vmem:[%s9689_s1 + $0xa88] sm:$0xf0]  ;;  %v5725_v28 = vor.u32 %v6514_v19, %v5724_v18  ;;  %v6233_v18 = vld [vmem:[%s9689_s1 + $0x364] sm:$0xf]  ;;  %v4698_v19 = vld [vmem:[%s9689_s1 + $0x42c] sm:$0xf0] }
  0x5c   :  { %3090 = vmatpush.bf16.msra.mxu1 %v5713_v24  ;;  %v5513_v17 = vor.u32 %v6462_v7, %v5512_v6  ;;  %v6411_v24 = vld [vmem:[%s9689_s1 + $0x8f0] sm:$0xf0]  ;;  %v6284_v6 = vld [vmem:[%s9689_s1 + $0x4fc] sm:$0xf]  ;;  %v4902_v7 = vld [vmem:[%s9689_s1 + $0x5c4] sm:$0xf0] }
  0x5d   :  { %3017 = vmatpush.bf16.msrb.mxu2 %v4681_v23  ;;  %v5308_v23 = vld [vmem:[%s9689_s1 + $0x828] sm:$0xf]  ;;  %v6310_v10 = vld [vmem:[%s9689_s1 + $0x5c8] sm:$0xf0]  ;;  %v4905_v15 = vor.u32 %v6284_v6, %v4902_v7  ;;  %v4706_v7 = vld [vmem:[%s9689_s1 + $0x434] sm:$0xf0] }
  0x5e   :  { %6082 = vmatmul.msk.bf16.vlgmr.msra.gmra.mxu3 %vm2800_vm0, %v6691_v39  ;;  %3042 = vmatpush.bf16.msra.mxu0 %v4889_v32  ;;  %v5309_v32 = vor.u32 %v6411_v24, %v5308_v23  ;;  %v6438_v11 = vld [vmem:[%s9689_s1 + $0x9cc] sm:$0xf]  ;;  %v6387_v23 = vld [vmem:[%s9689_s1 + $0x834] sm:$0xf]  ;;  %v5318_v24 = vld [vmem:[%s9689_s1 + $0x8fc] sm:$0xf0] }
  0x5f   :  { %3067 = vmatpush.bf16.msrb.mxu3 %v5097_v20  ;;  %v6232_v20 = vld [vmem:[%s9689_s1 + $0x35c] sm:$0xf] }
  0x60   :  { %3091 = vmatpush.bf16.msra.mxu1 %v5509_v37  ;;  %v4693_v31 = vor.u32 %v6232_v20, %v4690_v22  ;;  %v5104_v37 = vld [vmem:[%s9689_s1 + $0x690] sm:$0xf]  ;;  %v4704_v20 = vld [vmem:[%s9689_s1 + $0x368] sm:$0xf]  ;;  %v6259_v22 = vld [vmem:[%s9689_s1 + $0x430] sm:$0xf0] }
  0x61   :  { %3018 = vmatpush.bf16.msrb.mxu2 %v4477_v36  ;;  %v4486_v36 = vld [vmem:[%s9689_s1 + $0x28c] sm:$0xf0]  ;;  %v5105_v44 = vor.u32 %v6360_v38, %v5104_v37  ;;  %v6208_v37 = vld [vmem:[%s9689_s1 + $0x298] sm:$0xf0] }
  0x62   :  { %3043 = vmatpush.bf16.msra.mxu0 %v4685_v27  ;;  %v4489_v43 = vor.u32 %v6181_v35, %v4486_v36  ;;  %v5310_v27 = vld [vmem:[%s9689_s1 + $0x8f4] sm:$0xf0]  ;;  %v4500_v36 = vld [vmem:[%s9689_s1 + $0x1d0] sm:$0xf]  ;;  %v6336_v38 = vld [vmem:[%s9689_s1 + $0x69c] sm:$0xf] }
  0x63   :  { %3068 = vmatpush.bf16.msrb.mxu3 %v4893_v33  ;;  %v5520_v33 = vld [vmem:[%s9689_s1 + $0x9c8] sm:$0xf]  ;;  %v5313_v54 = vor.u32 %v6386_v42, %v5310_v27  ;;  %v6131_v27 = vld [vmem:[%s9689_s1 + $0x34] sm:$0xf]  ;;  %v4501_v45 = vor.u32 %v6208_v37, %v4500_v36  ;;  %v6541_v37 = vld [vmem:[%s9689_s1 + $0xd04] sm:$0xf] }
  0x64   :  { %3092 = vmatpush.bf16.msra.mxu1 %v5305_v51  ;;  %v5521_v41 = vor.u32 %v6463_v34, %v5520_v33  ;;  %v6539_v51 = vld [vmem:[%s9689_s1 + $0xcf4] sm:$0xf]  ;;  %v6182_v33 = vld [vmem:[%s9689_s1 + $0x1cc] sm:$0xf]  ;;  %v4494_v34 = vld [vmem:[%s9689_s1 + $0x294] sm:$0xf0]  ;;  %v4293_v58 = vor.u32 %v6131_v27, %v4290_v46 }
  0x65   :  { %3019 = vmatpush.bf16.msrb.mxu2 %v4273_v50  ;;  %v6309_v50 = vld [vmem:[%s9689_s1 + $0x5c0] sm:$0xf0]  ;;  %v5732_v42 = vld [vmem:[%s9689_s1 + $0xb68] sm:$0xf]  ;;  %v6363_v46 = vld [vmem:[%s9689_s1 + $0x770] sm:$0xf0] }
  0x66   :  { %3044 = vmatpush.bf16.msra.mxu0 %v4481_v60  ;;  %v4901_v60 = vor.u32 %v6309_v50, %v4900_v49 }
  0x67   :  { %3069 = vmatpush.bf16.msrb.mxu3 %v4689_v47  ;;  %6083 = vmatmul.msk.bf16.vlgmr.msrb.gmra.mxu1 %vm2800_vm0, %v6691_v39  ;;  %v6130_v47 = vld [vmem:[%s9689_s1 + $0x2c] sm:$0xf] }
  0x68   :  { %3020 = vmatmul.bf16.vlgmr.msrb.gmra.mxu2 %v6847_v52  ;;  %3093 = vmatpush.bf16.msra.mxu1 %v5101_v0  ;;  %v5726_v0 = vld [vmem:[%s9689_s1 + $0xc2c] sm:$0xf0] }
  0x69   :  { %3084 = vmatpush.bf16.msra.mxu2 %v5913_v56  ;;  %v4285_v56 = vor.u32 %v6130_v47, %v4282_v48  ;;  %v5729_v5 = vor.u32 %v6489_v63, %v5726_v0  ;;  %v4296_v47 = vld [vmem:[%s9689_s1 + $0x38] sm:$0xf]  ;;  %v6157_v48 = vld [vmem:[%s9689_s1 + $0x100] sm:$0xf0]  ;;  %v6490_v63 = vld [vmem:[%s9689_s1 + $0xb6c] sm:$0xf] }
  0x6a   :  { %3045 = vmatpush.bf16.msra.mxu0 %v4277_v8  ;;  %v4908_v8 = vld [vmem:[%s9689_s1 + $0x500] sm:$0xf]  ;;  %v5734_v0 = vld [vmem:[%s9689_s1 + $0xc34] sm:$0xf0] }
  0x6b   :  { %3070 = vmatpush.bf16.msrb.mxu3 %v4485_v61  ;;  %v5925_v61 = vor.u32 %v6539_v51, %v5922_v53  ;;  %v6285_v51 = vld [vmem:[%s9689_s1 + $0x504] sm:$0xf]  ;;  %v6540_v53 = vld [vmem:[%s9689_s1 + $0xcfc] sm:$0xf] }
  0x6c   :  { %3094 = vmatpush.bf16.msra.mxu1 %v4897_v16  ;;  %v4909_v16 = vor.u32 %v6310_v10, %v4908_v8  ;;  %v5324_v8 = vld [vmem:[%s9689_s1 + $0x838] sm:$0xf]  ;;  %v5737_v10 = vor.u32 %v6490_v63, %v5734_v0  ;;  %v6209_v63 = vld [vmem:[%s9689_s1 + $0x2a0] sm:$0xf0]  ;;  %v6440_v0 = vld [vmem:[%s9689_s1 + $0x9dc] sm:$0xf] }
  0x6d   :  { %3116 = vmatpush.bf16.msrb.mxu2 %v5717_v1  ;;  %3046 = vmatmul.bf16.vlgmr.msra.gmra.mxu0 %v6847_v52  ;;  %v4696_v1 = vld [vmem:[%s9689_s1 + $0x360] sm:$0xf] }
  0x6e   :  { %3110 = vmatpush.bf16.msrb.mxu0 %v5917_v25  ;;  %v4697_v9 = vor.u32 %v6258_v2, %v4696_v1  ;;  %v4288_v25 = vld [vmem:[%s9689_s1 + $0x30] sm:$0xf] }
  0x6f   :  { %3071 = vmatpush.bf16.msrb.mxu3 %v4281_v12  ;;  %v5522_v12 = vld [vmem:[%s9689_s1 + $0xa94] sm:$0xf0] }
  0x70   :  { %3095 = vmatpush.bf16.msra.mxu1 %v4693_v31  ;;  %v4705_v31 = vor.u32 %v6259_v22, %v4704_v20  ;;  %v5120_v20 = vld [vmem:[%s9689_s1 + $0x6a0] sm:$0xf] }
  0x71   :  { %3117 = vmatpush.bf16.msrb.mxu2 %v5513_v17  ;;  %v5525_v17 = vor.u32 %v6438_v11, %v5522_v12  ;;  %v6439_v12 = vld [vmem:[%s9689_s1 + $0x9d4] sm:$0xf] }
  0x72   :  { %3072 = vmatmul.bf16.vlgmr.msrb.gmra.mxu3 %v6847_v52  ;;  %3142 = vmatpush.bf16.msra.mxu0 %v5721_v26  ;;  %v6156_v26 = vld [vmem:[%s9689_s1 + $0xf8] sm:$0xf0] }
  0x73   :  { %3136 = vmatpush.bf16.msra.mxu3 %v5921_v21  ;;  %v4493_v21 = vor.u32 %v6207_v14, %v4492_v13  ;;  %v4289_v35 = vor.u32 %v6156_v26, %v4288_v25  ;;  %v5530_v13 = vld [vmem:[%s9689_s1 + $0xa9c] sm:$0xf0]  ;;  %v6388_v25 = vld [vmem:[%s9689_s1 + $0x83c] sm:$0xf]  ;;  %v5326_v26 = vld [vmem:[%s9689_s1 + $0x904] sm:$0xf0] }
  0x74   :  { %3096 = vmatpush.bf16.msra.mxu1 %v4489_v43  ;;  %v6515_v43 = vld [vmem:[%s9689_s1 + $0xc30] sm:$0xf0]  ;;  %v5329_v36 = vor.u32 %v6388_v25, %v5326_v26  ;;  %v6210_v25 = vld [vmem:[%s9689_s1 + $0x2a8] sm:$0xf0] }
  0x75   :  { %3118 = vmatpush.bf16.msrb.mxu2 %v5309_v32  ;;  %v5321_v32 = vor.u32 %v6387_v23, %v5318_v24  ;;  %v5733_v50 = vor.u32 %v6515_v43, %v5732_v42  ;;  %v5533_v23 = vor.u32 %v6439_v12, %v5530_v13  ;;  %v6337_v42 = vld [vmem:[%s9689_s1 + $0x6a4] sm:$0xf]  ;;  %v5122_v43 = vld [vmem:[%s9689_s1 + $0x76c] sm:$0xf0]  ;;  %v6158_v12 = vld [vmem:[%s9689_s1 + $0x108] sm:$0xf0] }
  0x76   :  { %3143 = vmatpush.bf16.msra.mxu0 %v5517_v40  ;;  %v5929_v40 = vor.u32 %v6565_v30, %v5928_v29  ;;  %v5332_v30 = vld [vmem:[%s9689_s1 + $0x840] sm:$0xf]  ;;  %v6389_v13 = vld [vmem:[%s9689_s1 + $0x844] sm:$0xf]  ;;  %v6338_v26 = vld [vmem:[%s9689_s1 + $0x6ac] sm:$0xf] }
  0x77   :  { %3168 = vmatpush.bf16.msrb.mxu3 %v5725_v28  ;;  %v4701_v28 = vor.u32 %v6233_v18, %v4698_v19  ;;  %v6183_v18 = vld [vmem:[%s9689_s1 + $0x1d4] sm:$0xf]  ;;  %v4502_v19 = vld [vmem:[%s9689_s1 + $0x29c] sm:$0xf0] }
  0x78   :  { %6084 = vmatmul.msk.bf16.vlgmr.msra.gmra.mxu2 %vm2800_vm0, %v6691_v39  ;;  %3097 = vmatpush.bf16.msra.mxu1 %v4285_v56  ;;  %v5528_v56 = vld [vmem:[%s9689_s1 + $0x9d0] sm:$0xf] }
  0x79   :  { %3119 = vmatpush.bf16.msrb.mxu2 %v5105_v44  ;;  %v4497_v44 = vor.u32 %v6182_v33, %v4494_v34  ;;  %v5529_v2 = vor.u32 %v6464_v57, %v5528_v56  ;;  %v4298_v33 = vld [vmem:[%s9689_s1 + $0x104] sm:$0xf0]  ;;  %v6286_v56 = vld [vmem:[%s9689_s1 + $0x50c] sm:$0xf]  ;;  %v4918_v57 = vld [vmem:[%s9689_s1 + $0x5d4] sm:$0xf0] }
  0x7a   :  { %3144 = vmatpush.bf16.msra.mxu0 %v5313_v54  ;;  %v5930_v54 = vld [vmem:[%s9689_s1 + $0xdc4] sm:$0xf0] }
  0x7b   :  { %3169 = vmatpush.bf16.msrb.mxu3 %v5521_v41  ;;  %3098 = vmatmul.bf16.vlgmr.msra.gmra.mxu1 %v6847_v52  ;;  %v5114_v41 = vld [vmem:[%s9689_s1 + $0x764] sm:$0xf0]  ;;  %v5933_v62 = vor.u32 %v6540_v53, %v5930_v54  ;;  %v5125_v54 = vor.u32 %v6337_v42, %v5122_v43  ;;  %v6159_v42 = vld [vmem:[%s9689_s1 + $0x110] sm:$0xf0] }
  0x7c   :  { %3162 = vmatpush.bf16.msrb.mxu1 %v5925_v61  ;;  %v5117_v49 = vor.u32 %v6336_v38, %v5114_v41  ;;  %v4297_v61 = vor.u32 %v6157_v48, %v4296_v47  ;;  %v4916_v34 = vld [vmem:[%s9689_s1 + $0x508] sm:$0xf]  ;;  %v5938_v38 = vld [vmem:[%s9689_s1 + $0xdcc] sm:$0xf0]  ;;  %v6287_v43 = vld [vmem:[%s9689_s1 + $0x514] sm:$0xf] }
  0x7d   :  { %3120 = vmatpush.bf16.msrb.mxu2 %v4901_v60  ;;  %6085 = vmatmul.msk.bf16.vlgmr.msrb.gmra.mxu0 %vm2800_vm0, %v6691_v39  ;;  %v6566_v60 = vld [vmem:[%s9689_s1 + $0xdc8] sm:$0xf0]  ;;  %v4712_v47 = vld [vmem:[%s9689_s1 + $0x370] sm:$0xf]  ;;  %v5941_v48 = vor.u32 %v6541_v37, %v5938_v38  ;;  %v4312_v37 = vld [vmem:[%s9689_s1 + $0x48] sm:$0xf] }
  0x7e   :  { %3145 = vmatpush.bf16.msra.mxu0 %v5109_v3  ;;  %v5740_v3 = vld [vmem:[%s9689_s1 + $0xb70] sm:$0xf]  ;;  %v5937_v6 = vor.u32 %v6566_v60, %v5936_v59 }
  0x7f   :  { %3170 = vmatpush.bf16.msrb.mxu3 %v5317_v55  ;;  %v4910_v55 = vld [vmem:[%s9689_s1 + $0x5cc] sm:$0xf0] }
  0x80   :  { %3194 = vmatpush.bf16.msra.mxu1 %v5729_v5  ;;  %v4913_v1 = vor.u32 %v6285_v51, %v4910_v55  ;;  %v6234_v5 = vld [vmem:[%s9689_s1 + $0x36c] sm:$0xf]  ;;  %v5742_v51 = vld [vmem:[%s9689_s1 + $0xc3c] sm:$0xf0]  ;;  %v4924_v60 = vld [vmem:[%s9689_s1 + $0x510] sm:$0xf] }
  0x81   :  { %3121 = vmatpush.bf16.msrb.mxu2 %v4697_v9  ;;  %v6413_v9 = vld [vmem:[%s9689_s1 + $0x900] sm:$0xf0]  ;;  %v4709_v14 = vor.u32 %v6234_v5, %v4706_v7  ;;  %v6235_v5 = vld [vmem:[%s9689_s1 + $0x374] sm:$0xf] }
  0x82   :  { %6086 = vmatmul.msk.bf16.vlgmr.msra.gmra.mxu3 %vm2800_vm0, %v6691_v39  ;;  %3146 = vmatpush.bf16.msra.mxu0 %v4905_v15  ;;  %v5325_v15 = vor.u32 %v6413_v9, %v5324_v8  ;;  %v4720_v9 = vld [vmem:[%s9689_s1 + $0x378] sm:$0xf] }
  0x83   :  { %3171 = vmatpush.bf16.msrb.mxu3 %v5113_v4  ;;  %v6516_v4 = vld [vmem:[%s9689_s1 + $0xc38] sm:$0xf0] }
  0x84   :  { %3195 = vmatpush.bf16.msra.mxu1 %v5525_v17  ;;  %v5741_v11 = vor.u32 %v6516_v4, %v5740_v3  ;;  %v6465_v17 = vld [vmem:[%s9689_s1 + $0xaa0] sm:$0xf0] }
  0x85   :  { %3122 = vmatpush.bf16.msrb.mxu2 %v4493_v21  ;;  %v6362_v21 = vld [vmem:[%s9689_s1 + $0x768] sm:$0xf0] }
  0x86   :  { %3147 = vmatpush.bf16.msra.mxu0 %v4701_v28  ;;  %v4505_v28 = vor.u32 %v6183_v18, %v4502_v19  ;;  %v5121_v29 = vor.u32 %v6362_v21, %v5120_v20  ;;  %v6184_v19 = vld [vmem:[%s9689_s1 + $0x1dc] sm:$0xf]  ;;  %v4510_v20 = vld [vmem:[%s9689_s1 + $0x2a4] sm:$0xf0] }
  0x87   :  { %3172 = vmatpush.bf16.msrb.mxu3 %v4909_v16  ;;  %v5536_v16 = vld [vmem:[%s9689_s1 + $0x9d8] sm:$0xf] }
  0x88   :  { %3196 = vmatpush.bf16.msra.mxu1 %v5321_v32  ;;  %v5537_v24 = vor.u32 %v6465_v17, %v5536_v16  ;;  %v6132_v32 = vld [vmem:[%s9689_s1 + $0x3c] sm:$0xf]  ;;  %v5944_v16 = vld [vmem:[%s9689_s1 + $0xd08] sm:$0xf]  ;;  %v6567_v17 = vld [vmem:[%s9689_s1 + $0xdd0] sm:$0xf0] }
  0x89   :  { %3123 = vmatpush.bf16.msrb.mxu2 %v4289_v35  ;;  %v6311_v35 = vld [vmem:[%s9689_s1 + $0x5d0] sm:$0xf0] }
  0x8a   :  { %3148 = vmatpush.bf16.msra.mxu0 %v4497_v44  ;;  %v7575_v22 = vpop.f32.mrf.mxu1  ;;  %v4301_v44 = vor.u32 %v6132_v32, %v4298_v33  ;;  %v4917_v27 = vor.u32 %v6311_v35, %v4916_v34  ;;  %v4513_v32 = vor.u32 %v6184_v19, %v4510_v20  ;;  %v6133_v35 = vld [vmem:[%s9689_s1 + $0x44] sm:$0xf]  ;;  %v6364_v19 = vld [vmem:[%s9689_s1 + $0x778] sm:$0xf0] }
  0x8b   :  { %3173 = vmatpush.bf16.msrb.mxu3 %v4705_v31  ;;  %6087 = vmatmul.msk.bf16.vlgmr.msrb.gmra.mxu1 %vm2800_vm0, %v6691_v39  ;;  %v6414_v31 = vld [vmem:[%s9689_s1 + $0x908] sm:$0xf0] }
  0x8c   :  { %3124 = vmatmul.bf16.vlgmr.msrb.gmra.mxu2 %v6847_v52  ;;  %3197 = vmatpush.bf16.msra.mxu1 %v5117_v49  ;;  %v5333_v41 = vor.u32 %v6414_v31, %v5332_v30  ;;  %v6260_v49 = vld [vmem:[%s9689_s1 + $0x438] sm:$0xf0]  ;;  %v5748_v30 = vld [vmem:[%s9689_s1 + $0xb78] sm:$0xf]  ;;  %v6517_v31 = vld [vmem:[%s9689_s1 + $0xc40] sm:$0xf0] }
  0x8d   :  { %3188 = vmatpush.bf16.msra.mxu2 %v5929_v40 }
  0x8e   :  { %3149 = vmatpush.bf16.msra.mxu0 %v4293_v58  ;;  %v4713_v58 = vor.u32 %v6260_v49, %v4712_v47  ;;  %v6542_v47 = vld [vmem:[%s9689_s1 + $0xd0c] sm:$0xf] }
  0x8f   :  { %3174 = vmatpush.bf16.msrb.mxu3 %v4501_v45  ;;  %v7608_v40 = vpop.f32.mrf.mxu3  ;;  %v5128_v45 = vld [vmem:[%s9689_s1 + $0x6a8] sm:$0xf] }
  0x90   :  { %3198 = vmatpush.bf16.msra.mxu1 %v4913_v1  ;;  %v5129_v55 = vor.u32 %v6363_v46, %v5128_v45  ;;  %v5538_v1 = vld [vmem:[%s9689_s1 + $0xaa4] sm:$0xf0]  ;;  %v5544_v45 = vld [vmem:[%s9689_s1 + $0x9e0] sm:$0xf]  ;;  %v6466_v46 = vld [vmem:[%s9689_s1 + $0xaa8] sm:$0xf0] }
  0x91   :  { %3220 = vmatpush.bf16.msrb.mxu2 %v5733_v50  ;;  %3150 = vmatmul.bf16.vlgmr.msra.gmra.mxu0 %v6847_v52  ;;  %v6491_v50 = vld [vmem:[%s9689_s1 + $0xb74] sm:$0xf]  ;;  %v5541_v8 = vor.u32 %v6440_v0, %v5538_v1  ;;  %v4722_v0 = vld [vmem:[%s9689_s1 + $0x444] sm:$0xf0] }
  0x92   :  { %3214 = vmatpush.bf16.msrb.mxu0 %v5933_v62  ;;  %v2828_v53 = vpop.f32.mrf.mxu1  ;;  %v5745_v59 = vor.u32 %v6491_v50, %v5742_v51  ;;  %v4508_v62 = vld [vmem:[%s9689_s1 + $0x1d8] sm:$0xf]  ;;  %v5952_v51 = vld [vmem:[%s9689_s1 + $0xd10] sm:$0xf] }
  0x93   :  { %3175 = vmatpush.bf16.msrb.mxu3 %v4297_v61  ;;  %v6312_v61 = vld [vmem:[%s9689_s1 + $0x5d8] sm:$0xf0]  ;;  %v4509_v7 = vor.u32 %v6209_v63, %v4508_v62  ;;  %v5946_v50 = vld [vmem:[%s9689_s1 + $0xdd4] sm:$0xf0]  ;;  %v6518_v62 = vld [vmem:[%s9689_s1 + $0xc48] sm:$0xf0] }
  0x94   :  { %3199 = vmatpush.bf16.msra.mxu1 %v4709_v14  ;;  %v4925_v4 = vor.u32 %v6312_v61, %v4924_v60  ;;  %v5334_v14 = vld [vmem:[%s9689_s1 + $0x90c] sm:$0xf0]  ;;  %v6568_v53 = vld [vmem:[%s9689_s1 + $0xdd8] sm:$0xf0]  ;;  %v5545_v61 = vor.u32 %v6466_v46, %v5544_v45 }
  0x95   :  { %3221 = vmatpush.bf16.msrb.mxu2 %v5529_v2  ;;  %v4921_v2 = vor.u32 %v6286_v56, %v4918_v57  ;;  %v6492_v56 = vld [vmem:[%s9689_s1 + $0xb7c] sm:$0xf]  ;;  %v5750_v57 = vld [vmem:[%s9689_s1 + $0xc44] sm:$0xf0]  ;;  %v5953_v1 = vor.u32 %v6568_v53, %v5952_v51  ;;  %v6339_v53 = vld [vmem:[%s9689_s1 + $0x6b4] sm:$0xf] }
  0x96   :  { %3176 = vmatmul.bf16.vlgmr.msrb.gmra.mxu3 %v6847_v52  ;;  %3246 = vmatpush.bf16.msra.mxu0 %v5737_v10  ;;  %v6261_v10 = vld [vmem:[%s9689_s1 + $0x440] sm:$0xf0]  ;;  %v6236_v63 = vld [vmem:[%s9689_s1 + $0x37c] sm:$0xf] }
  0x97   :  { %3240 = vmatpush.bf16.msra.mxu3 %v5937_v6  ;;  %v2854_v3 = vpop.f32.mrf.mxu3  ;;  %v4714_v6 = vld [vmem:[%s9689_s1 + $0x43c] sm:$0xf0]  ;;  %v4721_v18 = vor.u32 %v6261_v10, %v4720_v9  ;;  %v4725_v9 = vor.u32 %v6236_v63, %v4722_v0  ;;  %v6441_v10 = vld [vmem:[%s9689_s1 + $0x9e4] sm:$0xf] }
  0x98   :  { %3200 = vmatpush.bf16.msra.mxu1 %v4505_v28  ;;  %v5945_v28 = vor.u32 %v6567_v17, %v5944_v16  ;;  %v6415_v3 = vld [vmem:[%s9689_s1 + $0x910] sm:$0xf0]  ;;  %v6185_v17 = vld [vmem:[%s9689_s1 + $0x1e4] sm:$0xf] }
  0x99   :  { %3222 = vmatpush.bf16.msrb.mxu2 %v5325_v15  ;;  %v4717_v15 = vor.u32 %v6235_v5, %v4714_v6  ;;  %v5753_v6 = vor.u32 %v6492_v56, %v5750_v57  ;;  %v6467_v16 = vld [vmem:[%s9689_s1 + $0xab0] sm:$0xf0]  ;;  %v6365_v57 = vld [vmem:[%s9689_s1 + $0x780] sm:$0xf0] }
  0x9a   :  { %3247 = vmatpush.bf16.msra.mxu0 %v5533_v23  ;;  %v5337_v23 = vor.u32 %v6389_v13, %v5334_v14 }
  0x9b   :  { %3272 = vmatpush.bf16.msrb.mxu3 %v5741_v11  ;;  %v4304_v11 = vld [vmem:[%s9689_s1 + $0x40] sm:$0xf] }
  0x9c   :  { %6088 = vmatmul.msk.bf16.vlgmr.msra.gmra.mxu2 %vm2800_vm0, %v6691_v39  ;;  %3201 = vmatpush.bf16.msra.mxu1 %v4301_v44  ;;  %v4305_v21 = vor.u32 %v6158_v12, %v4304_v11  ;;  %v4926_v44 = vld [vmem:[%s9689_s1 + $0x5dc] sm:$0xf0]  ;;  %v5546_v11 = vld [vmem:[%s9689_s1 + $0xaac] sm:$0xf0] }
  0x9d   :  { %3223 = vmatpush.bf16.msrb.mxu2 %v5121_v29  ;;  %v5130_v29 = vld [vmem:[%s9689_s1 + $0x774] sm:$0xf0]  ;;  %v4929_v60 = vor.u32 %v6287_v43, %v4926_v44  ;;  %v6543_v43 = vld [vmem:[%s9689_s1 + $0xd14] sm:$0xf]  ;;  %v5954_v44 = vld [vmem:[%s9689_s1 + $0xddc] sm:$0xf0] }
  0x9e   :  { %3248 = vmatpush.bf16.msra.mxu0 %v5329_v36  ;;  %v4306_v36 = vld [vmem:[%s9689_s1 + $0x10c] sm:$0xf0]  ;;  %v5133_v38 = vor.u32 %v6338_v26, %v5130_v29  ;;  %v5342_v29 = vld [vmem:[%s9689_s1 + $0x914] sm:$0xf0]  ;;  %v5957_v56 = vor.u32 %v6543_v43, %v5954_v44  ;;  %v6212_v43 = vld [vmem:[%s9689_s1 + $0x2b8] sm:$0xf0] }
  0x9f   :  { %3273 = vmatpush.bf16.msrb.mxu3 %v5537_v24  ;;  %3202 = vmatmul.bf16.vlgmr.msra.gmra.mxu1 %v6847_v52  ;;  %v4516_v24 = vld [vmem:[%s9689_s1 + $0x1e0] sm:$0xf]  ;;  %v7719_v33 = vpop.f32.mrf.mxu3  ;;  %v4309_v49 = vor.u32 %v6133_v35, %v4306_v36  ;;  %v6416_v35 = vld [vmem:[%s9689_s1 + $0x918] sm:$0xf0]  ;;  %v6134_v36 = vld [vmem:[%s9689_s1 + $0x4c] sm:$0xf] }
  0xa0   :  { %3266 = vmatpush.bf16.msrb.mxu1 %v5941_v48  ;;  %v4517_v34 = vor.u32 %v6210_v25, %v4516_v24  ;;  %v5549_v25 = vor.u32 %v6441_v10, %v5546_v11  ;;  %v6442_v11 = vld [vmem:[%s9689_s1 + $0x9ec] sm:$0xf]  ;;  %v6340_v44 = vld [vmem:[%s9689_s1 + $0x6bc] sm:$0xf] }
  0xa1   :  { %3224 = vmatpush.bf16.msrb.mxu2 %v4917_v27  ;;  %6089 = vmatmul.msk.bf16.vlgmr.msrb.gmra.mxu0 %vm2800_vm0, %v6691_v39  ;;  %v7739_v27 = vpop.permute.xlu0 %487 }
  0xa2   :  { %3249 = vmatpush.bf16.msra.mxu0 %v5125_v54  ;;  %v2813_v48 = vpop.f32.mrf.mxu0 }
  0xa3   :  { %3274 = vmatpush.bf16.msrb.mxu3 %v5333_v41  ;;  %v5749_v41 = vor.u32 %v6517_v31, %v5748_v30 }
  0xa4   :  { %3298 = vmatpush.bf16.msra.mxu1 %v5745_v59  ;;  %v2865_v54 = vpop.f32.mrf.mxu1  ;;  %v2814_v59 = vadd.f32 %v2813_v48, %v7739_v27 }
  0xa5   :  { %3225 = vmatpush.bf16.msrb.mxu2 %v4713_v58  ;;  %v5756_v58 = vld [vmem:[%s9689_s1 + $0xb80] sm:$0xf] }
  0xa6   :  { %6090 = vmatmul.msk.bf16.vlgmr.msra.gmra.mxu3 %vm2800_vm0, %v6691_v39  ;;  %3250 = vmatpush.bf16.msra.mxu0 %v4921_v2  ;;  %v5340_v2 = vld [vmem:[%s9689_s1 + $0x848] sm:$0xf]  ;;  %v2827_v12 = vadd.f32 %v7575_v22, %v2814_v59  ;;  %v4518_v22 = vld [vmem:[%s9689_s1 + $0x2ac] sm:$0xf0] }
  0xa7   :  { %3275 = vmatpush.bf16.msrb.mxu3 %v5129_v55  ;;  %v4313_v55 = vor.u32 %v6159_v42, %v4312_v37  ;;  %v2839_v5 = vpop.f32.mrf.mxu2  ;;  %v5341_v14 = vor.u32 %v6415_v3, %v5340_v2  ;;  %v4521_v31 = vor.u32 %v6185_v17, %v4518_v22  ;;  %v4314_v37 = vld [vmem:[%s9689_s1 + $0x114] sm:$0xf0]  ;;  %v6313_v42 = vld [vmem:[%s9689_s1 + $0x5e0] sm:$0xf0]  ;;  %v5758_v59 = vld [vmem:[%s9689_s1 + $0xc4c] sm:$0xf0] }
  0xa8   :  { %3299 = vmatpush.bf16.msra.mxu1 %v5541_v8  ;;  %v5757_v8 = vor.u32 %v6518_v62, %v5756_v58  ;;  %v2840_v13 = vadd.f32 %v2839_v5, %v7739_v27  ;;  %v4317_v51 = vor.u32 %v6134_v36, %v4314_v37  ;;  %v6493_v58 = vld [vmem:[%s9689_s1 + $0xb84] sm:$0xf]  ;;  %v6262_v62 = vld [vmem:[%s9689_s1 + $0x448] sm:$0xf0]  ;;  %v6288_v3 = vld [vmem:[%s9689_s1 + $0x51c] sm:$0xf] }
  0xa9   :  { %3226 = vmatpush.bf16.msrb.mxu2 %v4509_v7  ;;  %v2880_v7 = vpop.f32.mrf.mxu3  ;;  %v5761_v5 = vor.u32 %v6493_v58, %v5758_v59  ;;  %v6237_v17 = vld [vmem:[%s9689_s1 + $0x384] sm:$0xf]  ;;  %v6186_v37 = vld [vmem:[%s9689_s1 + $0x1ec] sm:$0xf]  ;;  %v6544_v58 = vld [vmem:[%s9689_s1 + $0xd1c] sm:$0xf] }
  0xaa   :  { %3251 = vmatpush.bf16.msra.mxu0 %v4717_v15  ;;  %v5552_v15 = vld [vmem:[%s9689_s1 + $0x9e8] sm:$0xf]  ;;  %v2853_v20 = vadd.f32 %v7608_v40, %v2840_v13  ;;  %v4130_v40 = vmax.f32 %v2827_v12, 0.0  ;;  %v4940_v7 = vld [vmem:[%s9689_s1 + $0x520] sm:$0xf] }
  0xab   :  { %3276 = vmatpush.bf16.msrb.mxu3 %v4925_v4  ;;  %v5949_v4 = vor.u32 %v6542_v47, %v5946_v50  ;;  %v5553_v26 = vor.u32 %v6467_v16, %v5552_v15  ;;  %v5554_v12 = vld [vmem:[%s9689_s1 + $0xab4] sm:$0xf0]  ;;  %v4524_v13 = vld [vmem:[%s9689_s1 + $0x1e8] sm:$0xf] }
  0xac   :  { %3300 = vmatpush.bf16.msra.mxu1 %v5337_v23  ;;  %v2866_v23 = vadd.f32 %v2865_v54, %v7739_v27  ;;  %v2867_v24 = vpop.f32.mrf.mxu1  ;;  %v4131_v30 = vmax.f32 %v2853_v20, 0.0  ;;  %v5144_v54 = vld [vmem:[%s9689_s1 + $0x6b8] sm:$0xf]  ;;  %v4730_v20 = vld [vmem:[%s9689_s1 + $0x44c] sm:$0xf0] }
  0xad   :  { %3227 = vmatpush.bf16.msrb.mxu2 %v4305_v21  ;;  %v2815_v21 = vpop.f32.mrf.mxu0  ;;  %v5962_v59 = vld [vmem:[%s9689_s1 + $0xde4] sm:$0xf0] }
  0xae   :  { %3252 = vmatpush.bf16.msra.mxu0 %v4513_v32  ;;  %v2879_v45 = vadd.f32 %v7719_v33, %v2866_v23  ;;  %v5138_v33 = vld [vmem:[%s9689_s1 + $0x77c] sm:$0xf0]  ;;  %v4736_v21 = vld [vmem:[%s9689_s1 + $0x388] sm:$0xf]  ;;  %v6263_v23 = vld [vmem:[%s9689_s1 + $0x450] sm:$0xf0] }
  0xaf   :  { %3277 = vmatpush.bf16.msrb.mxu3 %v4721_v18  ;;  %6091 = vmatmul.msk.bf16.vlgmr.msrb.gmra.mxu1 %vm2800_vm0, %v6691_v39  ;;  %v5136_v18 = vld [vmem:[%s9689_s1 + $0x6b0] sm:$0xf]  ;;  %v2841_v48 = vpop.f32.mrf.mxu2  ;;  %v5141_v2 = vor.u32 %v6339_v53, %v5138_v33  ;;  %v4322_v53 = vld [vmem:[%s9689_s1 + $0x11c] sm:$0xf0]  ;;  %v4328_v33 = vld [vmem:[%s9689_s1 + $0x58] sm:$0xf] }
  0xb0   :  { %3228 = vmatmul.bf16.vlgmr.msrb.gmra.mxu2 %v6847_v52  ;;  %3301 = vmatpush.bf16.msra.mxu1 %v5133_v38  ;;  %v5137_v32 = vor.u32 %v6364_v19, %v5136_v18  ;;  %v4932_v38 = vld [vmem:[%s9689_s1 + $0x518] sm:$0xf]  ;;  %v4132_v63 = vmax.f32 %v2879_v45, 0.0  ;;  %v5557_v19 = vor.u32 %v6442_v11, %v5554_v12  ;;  %v6519_v48 = vld [vmem:[%s9689_s1 + $0xc50] sm:$0xf0] }
  0xb1   :  { %3292 = vmatpush.bf16.msra.mxu2 %v5945_v28  ;;  %v6390_v28 = vld [vmem:[%s9689_s1 + $0x84c] sm:$0xf]  ;;  %v2891_v47 = vpop.f32.mrf.mxu3  ;;  %v5772_v12 = vld [vmem:[%s9689_s1 + $0xb90] sm:$0xf] }
  0xb2   :  { %3253 = vmatpush.bf16.msra.mxu0 %v4309_v49  ;;  %v5345_v46 = vor.u32 %v6390_v28, %v5342_v29  ;;  %v2892_v49 = vadd.f32 %v2891_v47, %v7739_v27  ;;  %v4320_v29 = vld [vmem:[%s9689_s1 + $0x50] sm:$0xf]  ;;  %v5764_v47 = vld [vmem:[%s9689_s1 + $0xb88] sm:$0xf] }
  0xb3   :  { %3278 = vmatpush.bf16.msrb.mxu3 %v4517_v34  ;;  %v5348_v34 = vld [vmem:[%s9689_s1 + $0x850] sm:$0xf] }
  0xb4   :  { %3302 = vmatpush.bf16.msra.mxu1 %v4929_v60  ;;  %v5349_v50 = vor.u32 %v6416_v35, %v5348_v34  ;;  %v7878_v0 = vpop.f32.mrf.mxu1  ;;  %v6569_v34 = vld [vmem:[%s9689_s1 + $0xde0] sm:$0xf0]  ;;  %v4737_v35 = vor.u32 %v6263_v23, %v4736_v21 }
  0xb5   :  { %3324 = vmatpush.bf16.msrb.mxu2 %v5749_v41  ;;  %3254 = vmatmul.bf16.vlgmr.msra.gmra.mxu0 %v6847_v52  ;;  %v4181_v41 = vpack.c.bf16 %v4131_v30, %v4130_v40  ;;  %v2904_v60 = vpop.f32.mrf.mxu0  ;;  %v6160_v40 = vld [vmem:[%s9689_s1 + $0x118] sm:$0xf0] }
  0xb6   :  { %3318 = vmatpush.bf16.msrb.mxu0 %v5949_v4  ;;  %v5145_v4 = vor.u32 %v6365_v57, %v5144_v54  ;;  %v6161_v54 = vld [vmem:[%s9689_s1 + $0x120] sm:$0xf0] }
  0xb7   :  { %3279 = vmatpush.bf16.msrb.mxu3 %v4313_v55  ;;  %4207 = vst [vmem:[%s9692_s3] sm:$0xff] %v4181_v41  ;;  %v4933_v55 = vor.u32 %v6313_v42, %v4932_v38  ;;  %v4526_v38 = vld [vmem:[%s9689_s1 + $0x2b4] sm:$0xf0]  ;;  %v4321_v41 = vor.u32 %v6160_v40, %v4320_v29  ;;  %v4532_v42 = vld [vmem:[%s9689_s1 + $0x1f0] sm:$0xf]  ;;  %v6289_v57 = vld [vmem:[%s9689_s1 + $0x524] sm:$0xf] }
  0xb8   :  { %3303 = vmatpush.bf16.msra.mxu1 %v4725_v9  ;;  %v6469_v40 = vld [vmem:[%s9689_s1 + $0xac0] sm:$0xf0] }
  0xb9   :  { %3325 = vmatpush.bf16.msrb.mxu2 %v5545_v61  ;;  %v4728_v61 = vld [vmem:[%s9689_s1 + $0x380] sm:$0xf]  ;;  %v2893_v22 = vpop.f32.mrf.mxu3 }
  0xba   :  { %3280 = vmatmul.bf16.vlgmr.msrb.gmra.mxu3 %v6847_v52  ;;  %3350 = vmatpush.bf16.msra.mxu0 %v5753_v6  ;;  %v4934_v6 = vld [vmem:[%s9689_s1 + $0x5e4] sm:$0xf0]  ;;  %v4729_v10 = vor.u32 %v6262_v62, %v4728_v61  ;;  %v5560_v61 = vld [vmem:[%s9689_s1 + $0x9f0] sm:$0xf]  ;;  %v6468_v62 = vld [vmem:[%s9689_s1 + $0xab8] sm:$0xf0] }
  0xbb   :  { %3344 = vmatpush.bf16.msra.mxu3 %v5953_v1  ;;  %v2905_v1 = vadd.f32 %v2904_v60, %v2892_v49  ;;  %v4937_v16 = vor.u32 %v6288_v3, %v4934_v6  ;;  %v4529_v49 = vor.u32 %v6186_v37, %v4526_v38  ;;  %v4942_v60 = vld [vmem:[%s9689_s1 + $0x5ec] sm:$0xf0]  ;;  %v6570_v3 = vld [vmem:[%s9689_s1 + $0xde8] sm:$0xf0]  ;;  %v5561_v11 = vor.u32 %v6468_v62, %v5560_v61  ;;  %v4738_v22 = vld [vmem:[%s9689_s1 + $0x454] sm:$0xf0] }
  0xbc   :  { %3304 = vmatpush.bf16.msra.mxu1 %v4521_v31  ;;  %v2932_v30 = vpop.f32.mrf.mxu1  ;;  %v4733_v31 = vor.u32 %v6237_v17, %v4730_v20  ;;  %v6494_v6 = vld [vmem:[%s9689_s1 + $0xb8c] sm:$0xf]  ;;  %v5154_v61 = vld [vmem:[%s9689_s1 + $0x78c] sm:$0xf0] }
  0xbd   :  { %3326 = vmatpush.bf16.msrb.mxu2 %v5341_v14  ;;  %v4133_v9 = vmax.f32 %v2905_v1, 0.0  ;;  %v6211_v14 = vld [vmem:[%s9689_s1 + $0x2b0] sm:$0xf0]  ;;  %v2906_v28 = vpop.f32.mrf.mxu0 }
  0xbe   :  { %3351 = vmatpush.bf16.msra.mxu0 %v5549_v25  ;;  %v4525_v24 = vor.u32 %v6211_v14, %v4524_v13  ;;  %v6391_v25 = vld [vmem:[%s9689_s1 + $0x854] sm:$0xf]  ;;  %v6520_v13 = vld [vmem:[%s9689_s1 + $0xc58] sm:$0xf0]  ;;  %v6238_v14 = vld [vmem:[%s9689_s1 + $0x38c] sm:$0xf] }
  0xbf   :  { %3376 = vmatpush.bf16.msrb.mxu3 %v5757_v8  ;;  %v6314_v8 = vld [vmem:[%s9689_s1 + $0x5e8] sm:$0xf0]  ;;  %v4182_v15 = vpack.c.bf16 %v4133_v9, %v4132_v63  ;;  %v5568_v28 = vld [vmem:[%s9689_s1 + $0x9f8] sm:$0xf]  ;;  %v4741_v29 = vor.u32 %v6238_v14, %v4738_v22  ;;  %v6187_v30 = vld [vmem:[%s9689_s1 + $0x1f4] sm:$0xf] }
  0xc0   :  { %6092 = vmatmul.msk.bf16.vlgmr.msra.gmra.mxu2 %vm2800_vm0, %v6691_v39  ;;  %3305 = vmatpush.bf16.msra.mxu1 %v4317_v51  ;;  %v4941_v18 = vor.u32 %v6314_v8, %v4940_v7  ;;  %v4533_v51 = vor.u32 %v6212_v43, %v4532_v42  ;;  %v5766_v7 = vld [vmem:[%s9689_s1 + $0xc54] sm:$0xf0]  ;;  %v5569_v43 = vor.u32 %v6469_v40, %v5568_v28  ;;  %v6290_v14 = vld [vmem:[%s9689_s1 + $0x52c] sm:$0xf]  ;;  %v5570_v28 = vld [vmem:[%s9689_s1 + $0xac4] sm:$0xf0] }
  0xc1   :  { %3327 = vmatpush.bf16.msrb.mxu2 %v5137_v32  ;;  %4208 = vst [vmem:[%s9692_s3 + $0x8] sm:$0xff] %v4182_v15  ;;  %v5960_v32 = vld [vmem:[%s9689_s1 + $0xd18] sm:$0xf]  ;;  %v5769_v20 = vor.u32 %v6494_v6, %v5766_v7  ;;  %v6264_v6 = vld [vmem:[%s9689_s1 + $0x458] sm:$0xf0] }
  0xc2   :  { %3352 = vmatpush.bf16.msra.mxu0 %v5345_v46  ;;  %v5961_v45 = vor.u32 %v6569_v34, %v5960_v32  ;;  %v5146_v46 = vld [vmem:[%s9689_s1 + $0x784] sm:$0xf0]  ;;  %v6495_v7 = vld [vmem:[%s9689_s1 + $0xb94] sm:$0xf] }
  0xc3   :  { %3377 = vmatpush.bf16.msrb.mxu3 %v5553_v26  ;;  %3306 = vmatmul.bf16.vlgmr.msra.gmra.mxu1 %v6847_v52  ;;  %v5350_v26 = vld [vmem:[%s9689_s1 + $0x91c] sm:$0xf0] }
  0xc4   :  { %3370 = vmatpush.bf16.msrb.mxu1 %v5957_v56  ;;  %v5353_v36 = vor.u32 %v6391_v25, %v5350_v26  ;;  %v5765_v56 = vor.u32 %v6519_v48, %v5764_v47  ;;  %v2956_v63 = vpop.f32.mrf.mxu1  ;;  %v6443_v25 = vld [vmem:[%s9689_s1 + $0x9f4] sm:$0xf]  ;;  %v5562_v26 = vld [vmem:[%s9689_s1 + $0xabc] sm:$0xf0] }
  0xc5   :  { %3328 = vmatpush.bf16.msrb.mxu2 %v4933_v55  ;;  %6093 = vmatmul.msk.bf16.vlgmr.msrb.gmra.mxu0 %vm2800_vm0, %v6691_v39  ;;  %v5149_v55 = vor.u32 %v6340_v44, %v5146_v46  ;;  %v5565_v38 = vor.u32 %v6443_v25, %v5562_v26  ;;  %v6392_v44 = vld [vmem:[%s9689_s1 + $0x85c] sm:$0xf]  ;;  %v5364_v46 = vld [vmem:[%s9689_s1 + $0x860] sm:$0xf]  ;;  %v6213_v25 = vld [vmem:[%s9689_s1 + $0x2c0] sm:$0xf0] }
  0xc6   :  { %3353 = vmatpush.bf16.msra.mxu0 %v5141_v2  ;;  %v5968_v2 = vld [vmem:[%s9689_s1 + $0xd20] sm:$0xf]  ;;  %v2943_v9 = vpop.f32.mrf.mxu0  ;;  %v6444_v26 = vld [vmem:[%s9689_s1 + $0x9fc] sm:$0xf] }
  0xc7   :  { %3378 = vmatpush.bf16.msrb.mxu3 %v5349_v50  ;;  %v6135_v50 = vld [vmem:[%s9689_s1 + $0x54] sm:$0xf]  ;;  %v2917_v8 = vpop.f32.mrf.mxu2  ;;  %v5969_v17 = vor.u32 %v6570_v3, %v5968_v2  ;;  %v4744_v3 = vld [vmem:[%s9689_s1 + $0x390] sm:$0xf] }
  0xc8   :  { %3402 = vmatpush.bf16.msra.mxu1 %v5761_v5  ;;  %v4325_v1 = vor.u32 %v6135_v50, %v4322_v53  ;;  %v5965_v5 = vor.u32 %v6544_v58, %v5962_v59  ;;  %v2918_v15 = vadd.f32 %v2917_v8, %v7739_v27  ;;  %v6136_v53 = vld [vmem:[%s9689_s1 + $0x5c] sm:$0xf]  ;;  %v5970_v58 = vld [vmem:[%s9689_s1 + $0xdec] sm:$0xf0]  ;;  %v6367_v2 = vld [vmem:[%s9689_s1 + $0x790] sm:$0xf0]  ;;  %v4745_v22 = vor.u32 %v6264_v6, %v4744_v3 }
  0xc9   :  { %3329 = vmatpush.bf16.msrb.mxu2 %v4729_v10  ;;  %v4945_v10 = vor.u32 %v6289_v57, %v4942_v60  ;;  %v6545_v57 = vld [vmem:[%s9689_s1 + $0xd24] sm:$0xf]  ;;  %v5774_v8 = vld [vmem:[%s9689_s1 + $0xc5c] sm:$0xf0] }
  0xca   :  { %6094 = vmatmul.msk.bf16.vlgmr.msra.gmra.mxu3 %vm2800_vm0, %v6691_v39  ;;  %3354 = vmatpush.bf16.msra.mxu0 %v4937_v16  ;;  %v2944_v16 = vadd.f32 %v2943_v9, %v7739_v27  ;;  %v2931_v21 = vadd.f32 %v7878_v0, %v2918_v15  ;;  %v6341_v60 = vld [vmem:[%s9689_s1 + $0x6c4] sm:$0xf]  ;;  %v4950_v15 = vld [vmem:[%s9689_s1 + $0x5f4] sm:$0xf0] }
  0xcb   :  { %3379 = vmatpush.bf16.msrb.mxu3 %v5145_v4  ;;  %v4329_v4 = vor.u32 %v6161_v54, %v4328_v33  ;;  %v4330_v33 = vld [vmem:[%s9689_s1 + $0x124] sm:$0xf0]  ;;  %v6137_v3 = vld [vmem:[%s9689_s1 + $0x64] sm:$0xf] }
  0xcc   :  { %3403 = vmatpush.bf16.msra.mxu1 %v5557_v19  ;;  %v6417_v19 = vld [vmem:[%s9689_s1 + $0x920] sm:$0xf0]  ;;  %v2957_v23 = vadd.f32 %v2956_v63, %v2944_v16  ;;  %v4134_v32 = vmax.f32 %v2931_v21, 0.0  ;;  %v2958_v37 = vpop.f32.mrf.mxu1  ;;  %v4948_v54 = vld [vmem:[%s9689_s1 + $0x528] sm:$0xf]  ;;  %v4333_v62 = vor.u32 %v6136_v53, %v4330_v33 }
  0xcd   :  { %3330 = vmatpush.bf16.msrb.mxu2 %v4525_v24  ;;  %v5773_v24 = vor.u32 %v6520_v13, %v5772_v12  ;;  %v4540_v21 = vld [vmem:[%s9689_s1 + $0x1f8] sm:$0xf]  ;;  %v6265_v37 = vld [vmem:[%s9689_s1 + $0x460] sm:$0xf0]  ;;  %v4542_v53 = vld [vmem:[%s9689_s1 + $0x2c4] sm:$0xf0] }
  0xce   :  { %3355 = vmatpush.bf16.msra.mxu0 %v4733_v31  ;;  %v4534_v31 = vld [vmem:[%s9689_s1 + $0x2bc] sm:$0xf0]  ;;  %v4135_v34 = vmax.f32 %v2957_v23, 0.0  ;;  %v2945_v48 = vpop.f32.mrf.mxu0 }
  0xcf   :  { %3380 = vmatpush.bf16.msrb.mxu3 %v4941_v18  ;;  %v5356_v18 = vld [vmem:[%s9689_s1 + $0x858] sm:$0xf]  ;;  %v2919_v47 = vpop.f32.mrf.mxu2  ;;  %v6571_v48 = vld [vmem:[%s9689_s1 + $0xdf0] sm:$0xf0] }
  0xd0   :  { %3404 = vmatpush.bf16.msra.mxu1 %v5353_v36  ;;  %v5357_v0 = vor.u32 %v6417_v19, %v5356_v18  ;;  %v6366_v36 = vld [vmem:[%s9689_s1 + $0x788] sm:$0xf0]  ;;  %v5777_v18 = vor.u32 %v6495_v7, %v5774_v8  ;;  %v4956_v19 = vld [vmem:[%s9689_s1 + $0x530] sm:$0xf]  ;;  %v5976_v47 = vld [vmem:[%s9689_s1 + $0xd28] sm:$0xf] }
  0xd1   :  { %3331 = vmatpush.bf16.msrb.mxu2 %v4321_v41  ;;  %v4183_v41 = vpack.c.bf16 %v4135_v34, %v4134_v32  ;;  %v2969_v42 = vpop.f32.mrf.mxu3  ;;  %v4746_v32 = vld [vmem:[%s9689_s1 + $0x45c] sm:$0xf0]  ;;  %v4541_v34 = vor.u32 %v6213_v25, %v4540_v21  ;;  %v4344_v7 = vld [vmem:[%s9689_s1 + $0x68] sm:$0xf]  ;;  %v6163_v8 = vld [vmem:[%s9689_s1 + $0x130] sm:$0xf0] }
  0xd2   :  { %3356 = vmatpush.bf16.msra.mxu0 %v4529_v49  ;;  %v4537_v49 = vor.u32 %v6187_v30, %v4534_v31  ;;  %v6239_v31 = vld [vmem:[%s9689_s1 + $0x394] sm:$0xf]  ;;  %v5782_v21 = vld [vmem:[%s9689_s1 + $0xc64] sm:$0xf0] }
  0xd3   :  { %3381 = vmatpush.bf16.msrb.mxu3 %v4737_v35  ;;  %6095 = vmatmul.msk.bf16.vlgmr.msrb.gmra.mxu1 %vm2800_vm0, %v6691_v39  ;;  %v5152_v35 = vld [vmem:[%s9689_s1 + $0x6c0] sm:$0xf]  ;;  %4209 = vst [vmem:[%s9692_s3 + $0x10] sm:$0xff] %v4183_v41 }
  0xd4   :  { %3332 = vmatmul.bf16.vlgmr.msrb.gmra.mxu2 %v6847_v52  ;;  %3405 = vmatpush.bf16.msra.mxu1 %v5149_v55  ;;  %v5153_v50 = vor.u32 %v6366_v36, %v5152_v35  ;;  %v6315_v55 = vld [vmem:[%s9689_s1 + $0x5f0] sm:$0xf0]  ;;  %v2995_v9 = vpop.f32.mrf.mxu1  ;;  %v5573_v35 = vor.u32 %v6444_v26, %v5570_v28  ;;  %v4752_v36 = vld [vmem:[%s9689_s1 + $0x398] sm:$0xf]  ;;  %v5788_v28 = vld [vmem:[%s9689_s1 + $0xba0] sm:$0xf] }
  0xd5   :  { %3396 = vmatpush.bf16.msra.mxu2 %v5961_v45  ;;  %v5358_v45 = vld [vmem:[%s9689_s1 + $0x924] sm:$0xf0]  ;;  %v4949_v63 = vor.u32 %v6315_v55, %v4948_v54 }
  0xd6   :  { %3357 = vmatpush.bf16.msra.mxu0 %v4325_v1  ;;  %v5160_v1 = vld [vmem:[%s9689_s1 + $0x6c8] sm:$0xf] }
  0xd7   :  { %3382 = vmatpush.bf16.msrb.mxu3 %v4533_v51  ;;  %v6418_v51 = vld [vmem:[%s9689_s1 + $0x928] sm:$0xf0]  ;;  %v5161_v13 = vor.u32 %v6367_v2, %v5160_v1  ;;  %v2982_v16 = vpop.f32.mrf.mxu2 }
  0xd8   :  { %3406 = vmatpush.bf16.msra.mxu1 %v4945_v10  ;;  %v5365_v59 = vor.u32 %v6418_v51, %v5364_v46  ;;  %v5157_v10 = vor.u32 %v6341_v60, %v5154_v61  ;;  %v4749_v46 = vor.u32 %v6239_v31, %v4746_v32  ;;  %v6188_v51 = vld [vmem:[%s9689_s1 + $0x1fc] sm:$0xf]  ;;  %v5977_v60 = vor.u32 %v6571_v48, %v5976_v47  ;;  %v5162_v61 = vld [vmem:[%s9689_s1 + $0x794] sm:$0xf0]  ;;  %v4754_v32 = vld [vmem:[%s9689_s1 + $0x464] sm:$0xf0] }
  0xd9   :  { %3428 = vmatpush.bf16.msrb.mxu2 %v5765_v56  ;;  %3358 = vmatmul.bf16.vlgmr.msra.gmra.mxu0 %v6847_v52  ;;  %v5361_v56 = vor.u32 %v6392_v44, %v5358_v45  ;;  %v2971_v12 = vpop.f32.mrf.mxu3  ;;  %v5366_v44 = vld [vmem:[%s9689_s1 + $0x92c] sm:$0xf0]  ;;  %v4545_v1 = vor.u32 %v6188_v51, %v4542_v53  ;;  %v6471_v48 = vld [vmem:[%s9689_s1 + $0xad0] sm:$0xf0] }
  0xda   :  { %3422 = vmatpush.bf16.msrb.mxu0 %v5965_v5  ;;  %v5973_v5 = vor.u32 %v6545_v57, %v5970_v58  ;;  %v4548_v57 = vld [vmem:[%s9689_s1 + $0x200] sm:$0xf]  ;;  %v6214_v58 = vld [vmem:[%s9689_s1 + $0x2c8] sm:$0xf0] }
  0xdb   :  { %3383 = vmatpush.bf16.msrb.mxu3 %v4329_v4  ;;  %v2970_v4 = vadd.f32 %v2969_v42, %v7739_v27  ;;  %v6162_v42 = vld [vmem:[%s9689_s1 + $0x128] sm:$0xf0]  ;;  %v4549_v2 = vor.u32 %v6214_v58, %v4548_v57 }
  0xdc   :  { %3407 = vmatpush.bf16.msra.mxu1 %v4741_v29  ;;  %v4953_v29 = vor.u32 %v6290_v14, %v4950_v15  ;;  %v2997_v45 = vpop.f32.mrf.mxu1  ;;  %v6470_v12 = vld [vmem:[%s9689_s1 + $0xac8] sm:$0xf0] }
  0xdd   :  { %3429 = vmatpush.bf16.msrb.mxu2 %v5561_v11  ;;  %v2996_v11 = vadd.f32 %v2995_v9, %v7739_v27  ;;  %v2983_v23 = vadd.f32 %v2982_v16, %v2970_v4  ;;  %v4338_v4 = vld [vmem:[%s9689_s1 + $0x12c] sm:$0xf0]  ;;  %v6291_v9 = vld [vmem:[%s9689_s1 + $0x534] sm:$0xf]  ;;  %v6546_v15 = vld [vmem:[%s9689_s1 + $0xd2c] sm:$0xf] }
  0xde   :  { %3384 = vmatmul.bf16.vlgmr.msrb.gmra.mxu3 %v6847_v52  ;;  %3454 = vmatpush.bf16.msra.mxu0 %v5769_v20  ;;  %v6316_v20 = vld [vmem:[%s9689_s1 + $0x5f8] sm:$0xf0]  ;;  %v4341_v14 = vor.u32 %v6137_v3, %v4338_v4  ;;  %v5984_v16 = vld [vmem:[%s9689_s1 + $0xd30] sm:$0xf]  ;;  %v5584_v45 = vld [vmem:[%s9689_s1 + $0xa08] sm:$0xf] }
  0xdf   :  { %3448 = vmatpush.bf16.msra.mxu3 %v5969_v17  ;;  %v3008_v17 = vpop.f32.mrf.mxu0  ;;  %v4957_v30 = vor.u32 %v6316_v20, %v4956_v19  ;;  %v2984_v33 = vpop.f32.mrf.mxu2  ;;  %v5978_v19 = vld [vmem:[%s9689_s1 + $0xdf4] sm:$0xf0]  ;;  %v6496_v20 = vld [vmem:[%s9689_s1 + $0xb9c] sm:$0xf]  ;;  %v5380_v3 = vld [vmem:[%s9689_s1 + $0x870] sm:$0xf] }
  0xe0   :  { %3408 = vmatpush.bf16.msra.mxu1 %v4537_v49  ;;  %v5168_v33 = vld [vmem:[%s9689_s1 + $0x6d0] sm:$0xf]  ;;  %v6420_v4 = vld [vmem:[%s9689_s1 + $0x938] sm:$0xf0] }
  0xe1   :  { %3430 = vmatpush.bf16.msrb.mxu2 %v5357_v0  ;;  %v4136_v0 = vmax.f32 %v2983_v23, 0.0  ;;  %v8181_v49 = vpop.f32.mrf.mxu3 }
  0xe2   :  { %3455 = vmatpush.bf16.msra.mxu0 %v5565_v38  ;;  %v4336_v38 = vld [vmem:[%s9689_s1 + $0x60] sm:$0xf] }
  0xe3   :  { %3480 = vmatpush.bf16.msrb.mxu3 %v5773_v24  ;;  %v3009_v24 = vadd.f32 %v3008_v17, %v2996_v11  ;;  %v4337_v55 = vor.u32 %v6162_v42, %v4336_v38  ;;  %v5576_v11 = vld [vmem:[%s9689_s1 + $0xa00] sm:$0xf]  ;;  %v6572_v17 = vld [vmem:[%s9689_s1 + $0xdf8] sm:$0xf0] }
  0xe4   :  { %6096 = vmatmul.msk.bf16.vlgmr.msra.gmra.mxu2 %vm2800_vm0, %v6691_v39  ;;  %3409 = vmatpush.bf16.msra.mxu1 %v4333_v62  ;;  %v5780_v62 = vld [vmem:[%s9689_s1 + $0xb98] sm:$0xf]  ;;  %v5577_v26 = vor.u32 %v6470_v12, %v5576_v11  ;;  %v5985_v31 = vor.u32 %v6572_v17, %v5984_v16  ;;  %v5381_v12 = vor.u32 %v6420_v4, %v5380_v3 }
  0xe5   :  { %3431 = vmatpush.bf16.msrb.mxu2 %v5153_v50  ;;  %v4137_v40 = vmax.f32 %v3009_v24, 0.0  ;;  %v4753_v50 = vor.u32 %v6265_v37, %v4752_v36  ;;  %v5981_v36 = vor.u32 %v6546_v15, %v5978_v19  ;;  %v5785_v37 = vor.u32 %v6496_v20, %v5782_v21  ;;  %v5170_v15 = vld [vmem:[%s9689_s1 + $0x79c] sm:$0xf0]  ;;  %v5176_v16 = vld [vmem:[%s9689_s1 + $0x6d8] sm:$0xf] }
  0xe6   :  { %3456 = vmatpush.bf16.msra.mxu0 %v5361_v56  ;;  %v6369_v19 = vld [vmem:[%s9689_s1 + $0x7a0] sm:$0xf0]  ;;  %v5790_v21 = vld [vmem:[%s9689_s1 + $0xc6c] sm:$0xf0] }
  0xe7   :  { %3481 = vmatpush.bf16.msrb.mxu3 %v5569_v43  ;;  %3410 = vmatmul.bf16.vlgmr.msra.gmra.mxu1 %v6847_v52  ;;  %v4184_v41 = vpack.c.bf16 %v4137_v40, %v4136_v0  ;;  %v6393_v43 = vld [vmem:[%s9689_s1 + $0x864] sm:$0xf]  ;;  %v3010_v54 = vpop.f32.mrf.mxu0  ;;  %v6240_v0 = vld [vmem:[%s9689_s1 + $0x39c] sm:$0xf] }
  0xe8   :  { %3474 = vmatpush.bf16.msrb.mxu1 %v5973_v5  ;;  %v5369_v56 = vor.u32 %v6393_v43, %v5366_v44  ;;  %v6445_v43 = vld [vmem:[%s9689_s1 + $0xa04] sm:$0xf]  ;;  %v5578_v44 = vld [vmem:[%s9689_s1 + $0xacc] sm:$0xf0]  ;;  %v6368_v54 = vld [vmem:[%s9689_s1 + $0x798] sm:$0xf0] }
  0xe9   :  { %3432 = vmatpush.bf16.msrb.mxu2 %v4949_v63  ;;  %6097 = vmatmul.msk.bf16.vlgmr.msrb.gmra.mxu0 %vm2800_vm0, %v6691_v39  ;;  %4210 = vst [vmem:[%s9692_s3 + $0x18] sm:$0xff] %v4184_v41  ;;  %v6521_v63 = vld [vmem:[%s9689_s1 + $0xc60] sm:$0xf0]  ;;  %v5581_v58 = vor.u32 %v6445_v43, %v5578_v44  ;;  %v5586_v43 = vld [vmem:[%s9689_s1 + $0xad4] sm:$0xf0] }
  0xea   :  { %3457 = vmatpush.bf16.msra.mxu0 %v5157_v10  ;;  %v5781_v6 = vor.u32 %v6521_v63, %v5780_v62  ;;  %v4958_v10 = vld [vmem:[%s9689_s1 + $0x5fc] sm:$0xf0]  ;;  %v6497_v20 = vld [vmem:[%s9689_s1 + $0xba4] sm:$0xf]  ;;  %v4556_v44 = vld [vmem:[%s9689_s1 + $0x208] sm:$0xf] }
  0xeb   :  { %3482 = vmatpush.bf16.msrb.mxu3 %v5365_v59  ;;  %v6342_v59 = vld [vmem:[%s9689_s1 + $0x6cc] sm:$0xf]  ;;  %v3021_v23 = vpop.f32.mrf.mxu2  ;;  %v4961_v25 = vor.u32 %v6291_v9, %v4958_v10  ;;  %v6547_v9 = vld [vmem:[%s9689_s1 + $0xd34] sm:$0xf]  ;;  %v5986_v10 = vld [vmem:[%s9689_s1 + $0xdfc] sm:$0xf0] }
  0xec   :  { %3506 = vmatpush.bf16.msra.mxu1 %v5777_v18  ;;  %v5165_v5 = vor.u32 %v6342_v59, %v5162_v61  ;;  %v4345_v18 = vor.u32 %v6163_v8, %v4344_v7  ;;  %v3022_v40 = vadd.f32 %v3021_v23, %v7739_v27  ;;  %v5585_v59 = vor.u32 %v6471_v48, %v5584_v45  ;;  %v5374_v61 = vld [vmem:[%s9689_s1 + $0x934] sm:$0xf0]  ;;  %v6317_v8 = vld [vmem:[%s9689_s1 + $0x600] sm:$0xf0]  ;;  %v6215_v45 = vld [vmem:[%s9689_s1 + $0x2d0] sm:$0xf0] }
  0xed   :  { %3433 = vmatpush.bf16.msrb.mxu2 %v4745_v22  ;;  %v3036_v22 = vpop.f32.mrf.mxu3  ;;  %v4964_v7 = vld [vmem:[%s9689_s1 + $0x538] sm:$0xf] }
  0xee   :  { %6098 = vmatmul.msk.bf16.vlgmr.msra.gmra.mxu3 %vm2800_vm0, %v6691_v39  ;;  %3458 = vmatpush.bf16.msra.mxu0 %v4953_v29  ;;  %v6522_v29 = vld [vmem:[%s9689_s1 + $0xc68] sm:$0xf0]  ;;  %v3035_v38 = vadd.f32 %v8181_v49, %v3022_v40  ;;  %v6189_v49 = vld [vmem:[%s9689_s1 + $0x204] sm:$0xf]  ;;  %v4965_v22 = vor.u32 %v6317_v8, %v4964_v7  ;;  %v4558_v8 = vld [vmem:[%s9689_s1 + $0x2d4] sm:$0xf0] }
  0xef   :  { %3483 = vmatpush.bf16.msrb.mxu3 %v5161_v13  ;;  %v3060_v13 = vpop.f32.mrf.mxu1  ;;  %v3047_v24 = vpop.f32.mrf.mxu0  ;;  %v5789_v42 = vor.u32 %v6522_v29, %v5788_v28  ;;  %v6190_v7 = vld [vmem:[%s9689_s1 + $0x20c] sm:$0xf] }
  0xf0   :  { %3507 = vmatpush.bf16.msra.mxu1 %v5573_v35  ;;  %v6419_v35 = vld [vmem:[%s9689_s1 + $0x930] sm:$0xf0]  ;;  %v4138_v51 = vmax.f32 %v3035_v38, 0.0 }
  0xf1   :  { %3434 = vmatpush.bf16.msrb.mxu2 %v4541_v34  ;;  %v5372_v34 = vld [vmem:[%s9689_s1 + $0x868] sm:$0xf] }
  0xf2   :  { %3459 = vmatpush.bf16.msra.mxu0 %v4749_v46  ;;  %v4757_v46 = vor.u32 %v6240_v0, %v4754_v32  ;;  %v5373_v47 = vor.u32 %v6419_v35, %v5372_v34  ;;  %v6292_v32 = vld [vmem:[%s9689_s1 + $0x53c] sm:$0xf]  ;;  %v4966_v34 = vld [vmem:[%s9689_s1 + $0x604] sm:$0xf0]  ;;  %v4972_v35 = vld [vmem:[%s9689_s1 + $0x540] sm:$0xf] }
  0xf3   :  { %3484 = vmatpush.bf16.msrb.mxu3 %v4957_v30  ;;  %v3048_v30 = vadd.f32 %v3047_v24, %v7739_v27  ;;  %v3023_v62 = vpop.f32.mrf.mxu2  ;;  %v4760_v24 = vld [vmem:[%s9689_s1 + $0x3a0] sm:$0xf]  ;;  %v4969_v48 = vor.u32 %v6292_v32, %v4966_v34 }
  0xf4   :  { %3508 = vmatpush.bf16.msra.mxu1 %v5369_v56  ;;  %v6000_v34 = vld [vmem:[%s9689_s1 + $0xd40] sm:$0xf] }
  0xf5   :  { %3435 = vmatpush.bf16.msrb.mxu2 %v4337_v55  ;;  %v3061_v41 = vadd.f32 %v3060_v13, %v3048_v30  ;;  %v3073_v57 = vpop.f32.mrf.mxu3  ;;  %v5177_v30 = vor.u32 %v6369_v19, %v5176_v16  ;;  %v6523_v16 = vld [vmem:[%s9689_s1 + $0xc70] sm:$0xf0]  ;;  %v4354_v19 = vld [vmem:[%s9689_s1 + $0x13c] sm:$0xf0] }
  0xf6   :  { %3460 = vmatpush.bf16.msra.mxu0 %v4545_v1  ;;  %v3074_v17 = vadd.f32 %v3073_v57, %v7739_v27  ;;  %v6395_v57 = vld [vmem:[%s9689_s1 + $0x874] sm:$0xf] }
  0xf7   :  { %3485 = vmatpush.bf16.msrb.mxu3 %v4753_v50  ;;  %6099 = vmatmul.msk.bf16.vlgmr.msrb.gmra.mxu1 %vm2800_vm0, %v6691_v39  ;;  %v4550_v50 = vld [vmem:[%s9689_s1 + $0x2cc] sm:$0xf0]  ;;  %v4139_v53 = vmax.f32 %v3061_v41, 0.0  ;;  %v3062_v55 = vpop.f32.mrf.mxu1  ;;  %v3049_v63 = vpop.f32.mrf.mxu0  ;;  %v6318_v41 = vld [vmem:[%s9689_s1 + $0x608] sm:$0xf0] }
  0xf8   :  { %3436 = vmatmul.bf16.vlgmr.msrb.gmra.mxu2 %v6847_v52  ;;  %3509 = vmatpush.bf16.msra.mxu1 %v5165_v5  ;;  %v4553_v1 = vor.u32 %v6189_v49, %v4550_v50  ;;  %v6138_v5 = vld [vmem:[%s9689_s1 + $0x6c] sm:$0xf]  ;;  %v4973_v49 = vor.u32 %v6318_v41, %v4972_v35  ;;  %v4557_v55 = vor.u32 %v6215_v45, %v4556_v44  ;;  %v5798_v41 = vld [vmem:[%s9689_s1 + $0xc74] sm:$0xf0] }
  0xf9   :  { %3500 = vmatpush.bf16.msra.mxu2 %v5977_v60  ;;  %v4185_v56 = vpack.c.bf16 %v4139_v53, %v4138_v51  ;;  %v6394_v60 = vld [vmem:[%s9689_s1 + $0x86c] sm:$0xf]  ;;  %v6241_v51 = vld [vmem:[%s9689_s1 + $0x3a4] sm:$0xf]  ;;  %v4762_v53 = vld [vmem:[%s9689_s1 + $0x46c] sm:$0xf0] }
  0xfa   :  { %3461 = vmatpush.bf16.msra.mxu0 %v4341_v14  ;;  %v5377_v11 = vor.u32 %v6394_v60, %v5374_v61  ;;  %v6343_v14 = vld [vmem:[%s9689_s1 + $0x6d4] sm:$0xf]  ;;  %v4352_v60 = vld [vmem:[%s9689_s1 + $0x70] sm:$0xf]  ;;  %v6164_v61 = vld [vmem:[%s9689_s1 + $0x138] sm:$0xf0]  ;;  %v4765_v63 = vor.u32 %v6241_v51, %v4762_v53 }
  0xfb   :  { %3486 = vmatpush.bf16.msrb.mxu3 %v4549_v2  ;;  %v5169_v2 = vor.u32 %v6368_v54, %v5168_v33  ;;  %4211 = vst [vmem:[%s9692_s3 + $0x20] sm:$0xff] %v4185_v56  ;;  %v5173_v29 = vor.u32 %v6343_v14, %v5170_v15  ;;  %v3086_v0 = vpop.f32.mrf.mxu2  ;;  %v4768_v33 = vld [vmem:[%s9689_s1 + $0x3a8] sm:$0xf]  ;;  %v6267_v56 = vld [vmem:[%s9689_s1 + $0x470] sm:$0xf0] }
  0xfc   :  { %3510 = vmatpush.bf16.msra.mxu1 %v4961_v25  ;;  %v6266_v25 = vld [vmem:[%s9689_s1 + $0x468] sm:$0xf0]  ;;  %v5178_v14 = vld [vmem:[%s9689_s1 + $0x7a4] sm:$0xf0]  ;;  %v4770_v53 = vld [vmem:[%s9689_s1 + $0x474] sm:$0xf0] }
  0xfd   :  { %3532 = vmatpush.bf16.msrb.mxu2 %v5781_v6  ;;  %3462 = vmatmul.bf16.vlgmr.msra.gmra.mxu0 %v6847_v52  ;;  %v4346_v6 = vld [vmem:[%s9689_s1 + $0x134] sm:$0xf0]  ;;  %v3075_v28 = vpop.f32.mrf.mxu3  ;;  %v4761_v38 = vor.u32 %v6266_v25, %v4760_v24  ;;  %v5796_v15 = vld [vmem:[%s9689_s1 + $0xba8] sm:$0xf]  ;;  %v6293_v25 = vld [vmem:[%s9689_s1 + $0x544] sm:$0xf] }
  0xfe   :  { %3526 = vmatpush.bf16.msrb.mxu0 %v5981_v36  ;;  %v4349_v13 = vor.u32 %v6138_v5, %v4346_v6  ;;  %v3087_v36 = vadd.f32 %v3086_v0, %v3074_v17  ;;  %v4769_v5 = vor.u32 %v6267_v56, %v4768_v33  ;;  %v4561_v17 = vor.u32 %v6190_v7, %v4558_v8  ;;  %v5994_v28 = vld [vmem:[%s9689_s1 + $0xe04] sm:$0xf0]  ;;  %v4974_v0 = vld [vmem:[%s9689_s1 + $0x60c] sm:$0xf0]  ;;  %v6574_v35 = vld [vmem:[%s9689_s1 + $0xe08] sm:$0xf0] }
  0xff   :  { %3487 = vmatpush.bf16.msrb.mxu3 %v4345_v18  ;;  %v5989_v18 = vor.u32 %v6547_v9, %v5986_v10  ;;  %v3099_v23 = vpop.f32.mrf.mxu1  ;;  %v3112_v40 = vpop.f32.mrf.mxu0  ;;  %v4353_v9 = vor.u32 %v6164_v61, %v4352_v60  ;;  %v4564_v10 = vld [vmem:[%s9689_s1 + $0x210] sm:$0xf]  ;;  %v5797_v24 = vor.u32 %v6523_v16, %v5796_v15  ;;  %v4977_v44 = vor.u32 %v6293_v25, %v4974_v0  ;;  %v5388_v33 = vld [vmem:[%s9689_s1 + $0x878] sm:$0xf]  ;;  %v5594_v60 = vld [vmem:[%s9689_s1 + $0xadc] sm:$0xf0] }
 0x100   :  { %3511 = vmatpush.bf16.msra.mxu1 %v4757_v46  ;;  %v4140_v46 = vmax.f32 %v3087_v36, 0.0  ;;  %v6001_v51 = vor.u32 %v6574_v35, %v6000_v34  ;;  %v5600_v61 = vld [vmem:[%s9689_s1 + $0xa18] sm:$0xf]  ;;  %v5184_v7 = vld [vmem:[%s9689_s1 + $0x6e0] sm:$0xf] }
 0x101   :  { %3533 = vmatpush.bf16.msrb.mxu2 %v5577_v26  ;;  %v3100_v26 = vadd.f32 %v3099_v23, %v7739_v27  ;;  %v6370_v8 = vld [vmem:[%s9689_s1 + $0x7a8] sm:$0xf0]  ;;  %v5396_v15 = vld [vmem:[%s9689_s1 + $0x880] sm:$0xf]  ;;  %v6345_v0 = vld [vmem:[%s9689_s1 + $0x6e4] sm:$0xf] }
 0x102   :  { %3488 = vmatmul.bf16.vlgmr.msrb.gmra.mxu3 %v6847_v52  ;;  %3558 = vmatpush.bf16.msra.mxu0 %v5785_v37  ;;  %v6371_v34 = vld [vmem:[%s9689_s1 + $0x7b0] sm:$0xf0]  ;;  %v4776_v35 = vld [vmem:[%s9689_s1 + $0x3b0] sm:$0xf] }
 0x103   :  { %3552 = vmatpush.bf16.msra.mxu3 %v5985_v31  ;;  %v5793_v31 = vor.u32 %v6497_v20, %v5790_v21  ;;  %v3113_v37 = vadd.f32 %v3112_v40, %v3100_v26  ;;  %v3088_v3 = vpop.f32.mrf.mxu2  ;;  %v4360_v20 = vld [vmem:[%s9689_s1 + $0x78] sm:$0xf]  ;;  %v6165_v21 = vld [vmem:[%s9689_s1 + $0x140] sm:$0xf0]  ;;  %v6548_v26 = vld [vmem:[%s9689_s1 + $0xd3c] sm:$0xf] }
 0x104   :  { %3512 = vmatpush.bf16.msra.mxu1 %v4553_v1  ;;  %v5992_v1 = vld [vmem:[%s9689_s1 + $0xd38] sm:$0xf]  ;;  %v5592_v40 = vld [vmem:[%s9689_s1 + $0xa10] sm:$0xf]  ;;  %v4361_v36 = vor.u32 %v6165_v21, %v4360_v20  ;;  %v4566_v3 = vld [vmem:[%s9689_s1 + $0x2dc] sm:$0xf0] }
 0x105   :  { %3534 = vmatpush.bf16.msrb.mxu2 %v5373_v47  ;;  %v4141_v47 = vmax.f32 %v3113_v37, 0.0  ;;  %v8416_v62 = vpop.f32.mrf.mxu3  ;;  %v5997_v37 = vor.u32 %v6548_v26, %v5994_v28  ;;  %v6140_v20 = vld [vmem:[%s9689_s1 + $0x7c] sm:$0xf]  ;;  %v4362_v21 = vld [vmem:[%s9689_s1 + $0x144] sm:$0xf0] }
 0x106   :  { %3559 = vmatpush.bf16.msra.mxu0 %v5581_v58  ;;  %v5382_v58 = vld [vmem:[%s9689_s1 + $0x93c] sm:$0xf0]  ;;  %v6549_v26 = vld [vmem:[%s9689_s1 + $0xd44] sm:$0xf]  ;;  %v6002_v28 = vld [vmem:[%s9689_s1 + $0xe0c] sm:$0xf0] }
 0x107   :  { %3584 = vmatpush.bf16.msrb.mxu3 %v5789_v42  ;;  %v6446_v42 = vld [vmem:[%s9689_s1 + $0xa0c] sm:$0xf]  ;;  %v4186_v54 = vpack.c.bf16 %v4141_v47, %v4140_v46  ;;  %v3114_v4 = vpop.f32.mrf.mxu0  ;;  %v5385_v6 = vor.u32 %v6395_v57, %v5382_v58  ;;  %v5804_v46 = vld [vmem:[%s9689_s1 + $0xbb0] sm:$0xf]  ;;  %v6524_v47 = vld [vmem:[%s9689_s1 + $0xc78] sm:$0xf0] }
 0x108   :  { %6100 = vmatmul.msk.bf16.vlgmr.msra.gmra.mxu2 %vm2800_vm0, %v6691_v39  ;;  %3513 = vmatpush.bf16.msra.mxu1 %v4349_v13  ;;  %v5589_v50 = vor.u32 %v6446_v42, %v5586_v43  ;;  %v5805_v58 = vor.u32 %v6524_v47, %v5804_v46 }
 0x109   :  { %3535 = vmatpush.bf16.msrb.mxu2 %v5169_v2  ;;  %4212 = vst [vmem:[%s9692_s3 + $0x28] sm:$0xff] %v4186_v54  ;;  %v6573_v2 = vld [vmem:[%s9689_s1 + $0xe00] sm:$0xf0] }
 0x10a   :  { %3560 = vmatpush.bf16.msra.mxu0 %v5377_v11  ;;  %v6216_v11 = vld [vmem:[%s9689_s1 + $0x2d8] sm:$0xf0]  ;;  %v5993_v13 = vor.u32 %v6573_v2, %v5992_v1  ;;  %v6421_v54 = vld [vmem:[%s9689_s1 + $0x940] sm:$0xf0]  ;;  %v6191_v2 = vld [vmem:[%s9689_s1 + $0x214] sm:$0xf] }
 0x10b   :  { %3585 = vmatpush.bf16.msrb.mxu3 %v5585_v59  ;;  %3514 = vmatmul.bf16.vlgmr.msra.gmra.mxu1 %v6847_v52  ;;  %v3101_v59 = vpop.f32.mrf.mxu1  ;;  %v6473_v1 = vld [vmem:[%s9689_s1 + $0xae0] sm:$0xf0] }
 0x10c   :  { %3578 = vmatpush.bf16.msrb.mxu1 %v5989_v18  ;;  %v4565_v18 = vor.u32 %v6216_v11, %v4564_v10  ;;  %v6447_v59 = vld [vmem:[%s9689_s1 + $0xa14] sm:$0xf] }
 0x10d   :  { %3536 = vmatpush.bf16.msrb.mxu2 %v4965_v22  ;;  %6101 = vmatmul.msk.bf16.vlgmr.msrb.gmra.mxu0 %vm2800_vm0, %v6691_v39  ;;  %v6139_v22 = vld [vmem:[%s9689_s1 + $0x74] sm:$0xf] }
 0x10e   :  { %3561 = vmatpush.bf16.msra.mxu0 %v5173_v29  ;;  %v4357_v32 = vor.u32 %v6139_v22, %v4354_v19  ;;  %v4569_v22 = vor.u32 %v6191_v2, %v4566_v3  ;;  %v6422_v19 = vld [vmem:[%s9689_s1 + $0x948] sm:$0xf0]  ;;  %v6243_v3 = vld [vmem:[%s9689_s1 + $0x3b4] sm:$0xf] }
 0x10f   :  { %3586 = vmatpush.bf16.msrb.mxu3 %v5381_v12  ;;  %v6344_v12 = vld [vmem:[%s9689_s1 + $0x6dc] sm:$0xf]  ;;  %v3125_v42 = vpop.f32.mrf.mxu2  ;;  %v3151_v43 = vpop.f32.mrf.mxu0 }
 0x110   :  { %3610 = vmatpush.bf16.msra.mxu1 %v5793_v31  ;;  %v5181_v23 = vor.u32 %v6344_v12, %v5178_v14  ;;  %v3140_v31 = vpop.f32.mrf.mxu3  ;;  %v5601_v12 = vor.u32 %v6473_v1, %v5600_v61  ;;  %v5390_v14 = vld [vmem:[%s9689_s1 + $0x944] sm:$0xf0] }
 0x111   :  { %3537 = vmatpush.bf16.msrb.mxu2 %v4761_v38  ;;  %v6498_v38 = vld [vmem:[%s9689_s1 + $0xbac] sm:$0xf]  ;;  %v5602_v61 = vld [vmem:[%s9689_s1 + $0xae4] sm:$0xf0] }
 0x112   :  { %6102 = vmatmul.msk.bf16.vlgmr.msra.gmra.mxu3 %vm2800_vm0, %v6691_v39  ;;  %3562 = vmatpush.bf16.msra.mxu0 %v4969_v48  ;;  %v6242_v48 = vld [vmem:[%s9689_s1 + $0x3ac] sm:$0xf] }
 0x113   :  { %3587 = vmatpush.bf16.msrb.mxu3 %v5177_v30  ;;  %v3164_v29 = vpop.f32.mrf.mxu1  ;;  %v6472_v30 = vld [vmem:[%s9689_s1 + $0xad8] sm:$0xf0] }
 0x114   :  { %3611 = vmatpush.bf16.msra.mxu1 %v5589_v50  ;;  %v5593_v45 = vor.u32 %v6472_v30, %v5592_v40  ;;  %v3152_v50 = vadd.f32 %v3151_v43, %v7739_v27  ;;  %v5186_v40 = vld [vmem:[%s9689_s1 + $0x7ac] sm:$0xf0]  ;;  %v4365_v30 = vor.u32 %v6140_v20, %v4362_v21  ;;  %v4574_v20 = vld [vmem:[%s9689_s1 + $0x2e4] sm:$0xf0] }
 0x115   :  { %3538 = vmatpush.bf16.msrb.mxu2 %v4557_v55  ;;  %v5801_v55 = vor.u32 %v6498_v38, %v5798_v41  ;;  %v6268_v38 = vld [vmem:[%s9689_s1 + $0x478] sm:$0xf0]  ;;  %v6499_v41 = vld [vmem:[%s9689_s1 + $0xbb4] sm:$0xf] }
 0x116   :  { %3563 = vmatpush.bf16.msra.mxu0 %v4765_v63  ;;  %v3165_v57 = vadd.f32 %v3164_v29, %v3152_v50  ;;  %v4773_v63 = vor.u32 %v6242_v48, %v4770_v53  ;;  %v5397_v29 = vor.u32 %v6422_v19, %v5396_v15  ;;  %v6294_v48 = vld [vmem:[%s9689_s1 + $0x54c] sm:$0xf]  ;;  %v4777_v53 = vor.u32 %v6268_v38, %v4776_v35  ;;  %v6192_v19 = vld [vmem:[%s9689_s1 + $0x21c] sm:$0xf]  ;;  %v6141_v35 = vld [vmem:[%s9689_s1 + $0x84] sm:$0xf] }
 0x117   :  { %3588 = vmatpush.bf16.msrb.mxu3 %v4973_v49  ;;  %v3126_v49 = vadd.f32 %v3125_v42, %v7739_v27  ;;  %v3127_v16 = vpop.f32.mrf.mxu2  ;;  %v5806_v42 = vld [vmem:[%s9689_s1 + $0xc7c] sm:$0xf0] }
 0x118   :  { %3612 = vmatpush.bf16.msra.mxu1 %v5385_v6  ;;  %v6008_v16 = vld [vmem:[%s9689_s1 + $0xd48] sm:$0xf] }
 0x119   :  { %3539 = vmatpush.bf16.msrb.mxu2 %v4353_v9  ;;  %v3139_v56 = vadd.f32 %v8416_v62, %v3126_v49  ;;  %v5389_v62 = vor.u32 %v6421_v54, %v5388_v33  ;;  %v5597_v9 = vor.u32 %v6447_v59, %v5594_v60  ;;  %v3177_v11 = vpop.f32.mrf.mxu3  ;;  %v4982_v49 = vld [vmem:[%s9689_s1 + $0x614] sm:$0xf0]  ;;  %v5809_v33 = vor.u32 %v6499_v41, %v5806_v42  ;;  %v4988_v54 = vld [vmem:[%s9689_s1 + $0x550] sm:$0xf]  ;;  %v6217_v59 = vld [vmem:[%s9689_s1 + $0x2e0] sm:$0xf0] }
 0x11a   :  { %3564 = vmatpush.bf16.msra.mxu0 %v4561_v17  ;;  %v3153_v17 = vpop.f32.mrf.mxu0  ;;  %v6448_v60 = vld [vmem:[%s9689_s1 + $0xa1c] sm:$0xf]  ;;  %v4376_v41 = vld [vmem:[%s9689_s1 + $0x88] sm:$0xf]  ;;  %v6167_v42 = vld [vmem:[%s9689_s1 + $0x150] sm:$0xf0] }
 0x11b   :  { %3589 = vmatpush.bf16.msrb.mxu3 %v4769_v5  ;;  %6103 = vmatmul.msk.bf16.vlgmr.msrb.gmra.mxu1 %vm2800_vm0, %v6691_v39  ;;  %v4142_v4 = vmax.f32 %v3139_v56, 0.0  ;;  %v4143_v5 = vmax.f32 %v3165_v57, 0.0  ;;  %v3166_v6 = vpop.f32.mrf.mxu1  ;;  %v4572_v56 = vld [vmem:[%s9689_s1 + $0x218] sm:$0xf]  ;;  %v6575_v17 = vld [vmem:[%s9689_s1 + $0xe10] sm:$0xf0] }
 0x11c   :  { %3540 = vmatmul.bf16.vlgmr.msrb.gmra.mxu2 %v6847_v52  ;;  %3613 = vmatpush.bf16.msra.mxu1 %v5181_v23  ;;  %v4980_v23 = vld [vmem:[%s9689_s1 + $0x548] sm:$0xf]  ;;  %v5605_v6 = vor.u32 %v6448_v60, %v5602_v61  ;;  %v5820_v61 = vld [vmem:[%s9689_s1 + $0xbc0] sm:$0xf] }
 0x11d   :  { %3604 = vmatpush.bf16.msra.mxu2 %v5993_v13  ;;  %v4187_v10 = vpack.c.bf16 %v4143_v5, %v4142_v4  ;;  %v6396_v13 = vld [vmem:[%s9689_s1 + $0x87c] sm:$0xf]  ;;  %v4778_v4 = vld [vmem:[%s9689_s1 + $0x47c] sm:$0xf0]  ;;  %v4573_v5 = vor.u32 %v6217_v59, %v4572_v56  ;;  %v5814_v56 = vld [vmem:[%s9689_s1 + $0xc84] sm:$0xf0] }
 0x11e   :  { %3565 = vmatpush.bf16.msra.mxu0 %v4357_v32  ;;  %v5393_v25 = vor.u32 %v6396_v13, %v5390_v14  ;;  %v5192_v32 = vld [vmem:[%s9689_s1 + $0x6e8] sm:$0xf]  ;;  %v5398_v13 = vld [vmem:[%s9689_s1 + $0x94c] sm:$0xf0]  ;;  %v4781_v15 = vor.u32 %v6243_v3, %v4778_v4 }
 0x11f   :  { %3590 = vmatpush.bf16.msrb.mxu3 %v4565_v18  ;;  %v5185_v18 = vor.u32 %v6370_v8, %v5184_v7  ;;  %4213 = vst [vmem:[%s9692_s3 + $0x30] sm:$0xff] %v4187_v10  ;;  %v5193_v47 = vor.u32 %v6371_v34, %v5192_v32  ;;  %v3190_v50 = vpop.f32.mrf.mxu2  ;;  %v4784_v7 = vld [vmem:[%s9689_s1 + $0x3b8] sm:$0xf]  ;;  %v6269_v8 = vld [vmem:[%s9689_s1 + $0x480] sm:$0xf0]  ;;  %v4577_v32 = vor.u32 %v6192_v19, %v4574_v20 }
 0x120   :  { %3614 = vmatpush.bf16.msra.mxu1 %v4977_v44  ;;  %v5189_v44 = vor.u32 %v6345_v0, %v5186_v40  ;;  %v6009_v0 = vor.u32 %v6575_v17, %v6008_v16  ;;  %v5194_v40 = vld [vmem:[%s9689_s1 + $0x7b4] sm:$0xf0]  ;;  %v4786_v4 = vld [vmem:[%s9689_s1 + $0x484] sm:$0xf0]  ;;  %v6475_v17 = vld [vmem:[%s9689_s1 + $0xaf0] sm:$0xf0] }
 0x121   :  { %3636 = vmatpush.bf16.msrb.mxu2 %v5797_v24  ;;  %3566 = vmatmul.bf16.vlgmr.msra.gmra.mxu0 %v6847_v52  ;;  %v6319_v24 = vld [vmem:[%s9689_s1 + $0x610] sm:$0xf0]  ;;  %v3179_v46 = vpop.f32.mrf.mxu3 }
 0x122   :  { %3630 = vmatpush.bf16.msrb.mxu0 %v5997_v37  ;;  %v4981_v31 = vor.u32 %v6319_v24, %v4980_v23  ;;  %v6005_v37 = vor.u32 %v6549_v26, %v6002_v28  ;;  %v4580_v26 = vld [vmem:[%s9689_s1 + $0x220] sm:$0xf]  ;;  %v6218_v28 = vld [vmem:[%s9689_s1 + $0x2e8] sm:$0xf0] }
 0x123   :  { %3591 = vmatpush.bf16.msrb.mxu3 %v4361_v36  ;;  %v3178_v36 = vadd.f32 %v3177_v11, %v7739_v27  ;;  %v3203_v43 = vpop.f32.mrf.mxu1  ;;  %v6166_v11 = vld [vmem:[%s9689_s1 + $0x148] sm:$0xf0]  ;;  %v4581_v34 = vor.u32 %v6218_v28, %v4580_v26 }
 0x124   :  { %3615 = vmatpush.bf16.msra.mxu1 %v4773_v63  ;;  %v4985_v63 = vor.u32 %v6294_v48, %v4982_v49  ;;  %v6474_v46 = vld [vmem:[%s9689_s1 + $0xae8] sm:$0xf0] }
 0x125   :  { %3637 = vmatpush.bf16.msrb.mxu2 %v5593_v45  ;;  %v3204_v45 = vadd.f32 %v3203_v43, %v7739_v27  ;;  %v3191_v57 = vadd.f32 %v3190_v50, %v3178_v36  ;;  %v4370_v36 = vld [vmem:[%s9689_s1 + $0x14c] sm:$0xf0]  ;;  %v6295_v43 = vld [vmem:[%s9689_s1 + $0x554] sm:$0xf]  ;;  %v6550_v49 = vld [vmem:[%s9689_s1 + $0xd4c] sm:$0xf] }
 0x126   :  { %3592 = vmatmul.bf16.vlgmr.msrb.gmra.mxu3 %v6847_v52  ;;  %3662 = vmatpush.bf16.msra.mxu0 %v5801_v55  ;;  %v6320_v55 = vld [vmem:[%s9689_s1 + $0x618] sm:$0xf0]  ;;  %v4373_v48 = vor.u32 %v6141_v35, %v4370_v36  ;;  %v6016_v50 = vld [vmem:[%s9689_s1 + $0xd50] sm:$0xf] }
 0x127   :  { %3656 = vmatpush.bf16.msra.mxu3 %v6001_v51  ;;  %v3216_v51 = vpop.f32.mrf.mxu0  ;;  %v4989_v2 = vor.u32 %v6320_v55, %v4988_v54  ;;  %v3192_v21 = vpop.f32.mrf.mxu2  ;;  %v6010_v54 = vld [vmem:[%s9689_s1 + $0xe14] sm:$0xf0]  ;;  %v6500_v55 = vld [vmem:[%s9689_s1 + $0xbbc] sm:$0xf]  ;;  %v5412_v35 = vld [vmem:[%s9689_s1 + $0x890] sm:$0xf] }
 0x128   :  { %3616 = vmatpush.bf16.msra.mxu1 %v4569_v22  ;;  %v5200_v21 = vld [vmem:[%s9689_s1 + $0x6f0] sm:$0xf]  ;;  %v6424_v36 = vld [vmem:[%s9689_s1 + $0x958] sm:$0xf0] }
 0x129   :  { %3638 = vmatpush.bf16.msrb.mxu2 %v5389_v62  ;;  %v4144_v62 = vmax.f32 %v3191_v57, 0.0  ;;  %v8663_v22 = vpop.f32.mrf.mxu3 }
 0x12a   :  { %3663 = vmatpush.bf16.msra.mxu0 %v5597_v9  ;;  %v4368_v9 = vld [vmem:[%s9689_s1 + $0x80] sm:$0xf] }
 0x12b   :  { %3688 = vmatpush.bf16.msrb.mxu3 %v5805_v58  ;;  %v3217_v58 = vadd.f32 %v3216_v51, %v3204_v45  ;;  %v3205_v14 = vpop.f32.mrf.mxu1  ;;  %v4369_v24 = vor.u32 %v6166_v11, %v4368_v9  ;;  %v5608_v45 = vld [vmem:[%s9689_s1 + $0xa20] sm:$0xf]  ;;  %v6576_v51 = vld [vmem:[%s9689_s1 + $0xe18] sm:$0xf0] }
 0x12c   :  { %6104 = vmatmul.msk.bf16.vlgmr.msra.gmra.mxu2 %vm2800_vm0, %v6691_v39  ;;  %3617 = vmatpush.bf16.msra.mxu1 %v4365_v30  ;;  %v5812_v30 = vld [vmem:[%s9689_s1 + $0xbb8] sm:$0xf]  ;;  %v5609_v60 = vor.u32 %v6474_v46, %v5608_v45  ;;  %v6017_v3 = vor.u32 %v6576_v51, %v6016_v50  ;;  %v5616_v14 = vld [vmem:[%s9689_s1 + $0xa28] sm:$0xf]  ;;  %v5413_v46 = vor.u32 %v6424_v36, %v5412_v35 }
 0x12d   :  { %3639 = vmatpush.bf16.msrb.mxu2 %v5185_v18  ;;  %v4145_v1 = vmax.f32 %v3217_v58, 0.0  ;;  %v4785_v18 = vor.u32 %v6269_v8, %v4784_v7  ;;  %v6013_v7 = vor.u32 %v6550_v49, %v6010_v54  ;;  %v5817_v8 = vor.u32 %v6500_v55, %v5814_v56  ;;  %v5202_v49 = vld [vmem:[%s9689_s1 + $0x7bc] sm:$0xf0]  ;;  %v5208_v50 = vld [vmem:[%s9689_s1 + $0x6f8] sm:$0xf] }
 0x12e   :  { %3664 = vmatpush.bf16.msra.mxu0 %v5393_v25  ;;  %v6373_v54 = vld [vmem:[%s9689_s1 + $0x7c0] sm:$0xf0]  ;;  %v5822_v56 = vld [vmem:[%s9689_s1 + $0xc8c] sm:$0xf0] }
 0x12f   :  { %3689 = vmatpush.bf16.msrb.mxu3 %v5601_v12  ;;  %3618 = vmatmul.bf16.vlgmr.msra.gmra.mxu1 %v6847_v52  ;;  %v4188_v10 = vpack.c.bf16 %v4145_v1, %v4144_v62  ;;  %v6397_v12 = vld [vmem:[%s9689_s1 + $0x884] sm:$0xf]  ;;  %v3218_v23 = vpop.f32.mrf.mxu0  ;;  %v6244_v62 = vld [vmem:[%s9689_s1 + $0x3bc] sm:$0xf] }
 0x130   :  { %3682 = vmatpush.bf16.msrb.mxu1 %v6005_v37  ;;  %v5401_v25 = vor.u32 %v6397_v12, %v5398_v13  ;;  %v6449_v12 = vld [vmem:[%s9689_s1 + $0xa24] sm:$0xf]  ;;  %v5610_v13 = vld [vmem:[%s9689_s1 + $0xaec] sm:$0xf0]  ;;  %v6372_v23 = vld [vmem:[%s9689_s1 + $0x7b8] sm:$0xf0] }
 0x131   :  { %3640 = vmatpush.bf16.msrb.mxu2 %v4981_v31  ;;  %6105 = vmatmul.msk.bf16.vlgmr.msrb.gmra.mxu0 %vm2800_vm0, %v6691_v39  ;;  %4214 = vst [vmem:[%s9692_s3 + $0x38] sm:$0xff] %v4188_v10  ;;  %v6525_v31 = vld [vmem:[%s9689_s1 + $0xc80] sm:$0xf0]  ;;  %v5613_v28 = vor.u32 %v6449_v12, %v5610_v13  ;;  %v5618_v12 = vld [vmem:[%s9689_s1 + $0xaf4] sm:$0xf0] }
 0x132   :  { %3665 = vmatpush.bf16.msra.mxu0 %v5189_v44  ;;  %v5813_v38 = vor.u32 %v6525_v31, %v5812_v30  ;;  %v4990_v44 = vld [vmem:[%s9689_s1 + $0x61c] sm:$0xf0]  ;;  %v6501_v55 = vld [vmem:[%s9689_s1 + $0xbc4] sm:$0xf]  ;;  %v4588_v13 = vld [vmem:[%s9689_s1 + $0x228] sm:$0xf] }
 0x133   :  { %3690 = vmatpush.bf16.msrb.mxu3 %v5397_v29  ;;  %v6346_v29 = vld [vmem:[%s9689_s1 + $0x6ec] sm:$0xf]  ;;  %v3229_v57 = vpop.f32.mrf.mxu2  ;;  %v4993_v59 = vor.u32 %v6295_v43, %v4990_v44  ;;  %v6551_v43 = vld [vmem:[%s9689_s1 + $0xd54] sm:$0xf]  ;;  %v6018_v44 = vld [vmem:[%s9689_s1 + $0xe1c] sm:$0xf0] }
 0x134   :  { %3714 = vmatpush.bf16.msra.mxu1 %v5809_v33  ;;  %v5197_v37 = vor.u32 %v6346_v29, %v5194_v40  ;;  %v4377_v33 = vor.u32 %v6167_v42, %v4376_v41  ;;  %v3230_v1 = vadd.f32 %v3229_v57, %v7739_v27  ;;  %v5617_v29 = vor.u32 %v6475_v17, %v5616_v14  ;;  %v5406_v40 = vld [vmem:[%s9689_s1 + $0x954] sm:$0xf0]  ;;  %v6321_v42 = vld [vmem:[%s9689_s1 + $0x620] sm:$0xf0]  ;;  %v6219_v14 = vld [vmem:[%s9689_s1 + $0x2f0] sm:$0xf0] }
 0x135   :  { %3641 = vmatpush.bf16.msrb.mxu2 %v4777_v53  ;;  %v3244_v53 = vpop.f32.mrf.mxu3  ;;  %v4996_v41 = vld [vmem:[%s9689_s1 + $0x558] sm:$0xf] }
 0x136   :  { %6106 = vmatmul.msk.bf16.vlgmr.msra.gmra.mxu3 %vm2800_vm0, %v6691_v39  ;;  %3666 = vmatpush.bf16.msra.mxu0 %v4985_v63  ;;  %v6526_v63 = vld [vmem:[%s9689_s1 + $0xc88] sm:$0xf0]  ;;  %v3243_v9 = vadd.f32 %v8663_v22, %v3230_v1  ;;  %v6193_v22 = vld [vmem:[%s9689_s1 + $0x224] sm:$0xf]  ;;  %v4997_v53 = vor.u32 %v6321_v42, %v4996_v41  ;;  %v4590_v42 = vld [vmem:[%s9689_s1 + $0x2f4] sm:$0xf0] }
 0x137   :  { %3691 = vmatpush.bf16.msrb.mxu3 %v5193_v47  ;;  %v3268_v47 = vpop.f32.mrf.mxu1  ;;  %v3255_v58 = vpop.f32.mrf.mxu0  ;;  %v5821_v11 = vor.u32 %v6526_v63, %v5820_v61  ;;  %v6194_v41 = vld [vmem:[%s9689_s1 + $0x22c] sm:$0xf] }
 0x138   :  { %3715 = vmatpush.bf16.msra.mxu1 %v5605_v6  ;;  %v6423_v6 = vld [vmem:[%s9689_s1 + $0x950] sm:$0xf0]  ;;  %v4146_v19 = vmax.f32 %v3243_v9, 0.0 }
 0x139   :  { %3642 = vmatpush.bf16.msrb.mxu2 %v4573_v5  ;;  %v5404_v5 = vld [vmem:[%s9689_s1 + $0x888] sm:$0xf] }
 0x13a   :  { %3667 = vmatpush.bf16.msra.mxu0 %v4781_v15  ;;  %v4789_v15 = vor.u32 %v6244_v62, %v4786_v4  ;;  %v5405_v16 = vor.u32 %v6423_v6, %v5404_v5  ;;  %v6296_v4 = vld [vmem:[%s9689_s1 + $0x55c] sm:$0xf]  ;;  %v4998_v5 = vld [vmem:[%s9689_s1 + $0x624] sm:$0xf0]  ;;  %v5004_v6 = vld [vmem:[%s9689_s1 + $0x560] sm:$0xf] }
 0x13b   :  { %3692 = vmatpush.bf16.msrb.mxu3 %v4989_v2  ;;  %v3256_v2 = vadd.f32 %v3255_v58, %v7739_v27  ;;  %v3231_v30 = vpop.f32.mrf.mxu2  ;;  %v4792_v58 = vld [vmem:[%s9689_s1 + $0x3c0] sm:$0xf]  ;;  %v5001_v17 = vor.u32 %v6296_v4, %v4998_v5 }
 0x13c   :  { %3716 = vmatpush.bf16.msra.mxu1 %v5401_v25  ;;  %v6032_v5 = vld [vmem:[%s9689_s1 + $0xd60] sm:$0xf] }
 0x13d   :  { %3643 = vmatpush.bf16.msrb.mxu2 %v4369_v24  ;;  %v3269_v10 = vadd.f32 %v3268_v47, %v3256_v2  ;;  %v3281_v26 = vpop.f32.mrf.mxu3  ;;  %v5209_v2 = vor.u32 %v6373_v54, %v5208_v50  ;;  %v6527_v50 = vld [vmem:[%s9689_s1 + $0xc90] sm:$0xf0]  ;;  %v4386_v54 = vld [vmem:[%s9689_s1 + $0x15c] sm:$0xf0] }
 0x13e   :  { %3668 = vmatpush.bf16.msra.mxu0 %v4577_v32  ;;  %v3282_v51 = vadd.f32 %v3281_v26, %v7739_v27  ;;  %v6399_v26 = vld [vmem:[%s9689_s1 + $0x894] sm:$0xf] }
 0x13f   :  { %3693 = vmatpush.bf16.msrb.mxu3 %v4785_v18  ;;  %6107 = vmatmul.msk.bf16.vlgmr.msrb.gmra.mxu1 %vm2800_vm0, %v6691_v39  ;;  %v4582_v18 = vld [vmem:[%s9689_s1 + $0x2ec] sm:$0xf0]  ;;  %v4147_v20 = vmax.f32 %v3269_v10, 0.0  ;;  %v3270_v24 = vpop.f32.mrf.mxu1  ;;  %v3257_v31 = vpop.f32.mrf.mxu0  ;;  %v6322_v10 = vld [vmem:[%s9689_s1 + $0x628] sm:$0xf0] }
 0x140   :  { %3644 = vmatmul.bf16.vlgmr.msrb.gmra.mxu2 %v6847_v52  ;;  %3717 = vmatpush.bf16.msra.mxu1 %v5197_v37  ;;  %v4585_v32 = vor.u32 %v6193_v22, %v4582_v18  ;;  %v6142_v37 = vld [vmem:[%s9689_s1 + $0x8c] sm:$0xf]  ;;  %v5005_v22 = vor.u32 %v6322_v10, %v5004_v6  ;;  %v4589_v24 = vor.u32 %v6219_v14, %v4588_v13  ;;  %v5830_v10 = vld [vmem:[%s9689_s1 + $0xc94] sm:$0xf0] }
 0x141   :  { %3708 = vmatpush.bf16.msra.mxu2 %v6009_v0  ;;  %v4189_v25 = vpack.c.bf16 %v4147_v20, %v4146_v19  ;;  %v6398_v0 = vld [vmem:[%s9689_s1 + $0x88c] sm:$0xf]  ;;  %v6245_v19 = vld [vmem:[%s9689_s1 + $0x3c4] sm:$0xf]  ;;  %v4794_v20 = vld [vmem:[%s9689_s1 + $0x48c] sm:$0xf0] }
 0x142   :  { %3669 = vmatpush.bf16.msra.mxu0 %v4373_v48  ;;  %v5409_v45 = vor.u32 %v6398_v0, %v5406_v40  ;;  %v6347_v48 = vld [vmem:[%s9689_s1 + $0x6f4] sm:$0xf]  ;;  %v4384_v0 = vld [vmem:[%s9689_s1 + $0x90] sm:$0xf]  ;;  %v6168_v40 = vld [vmem:[%s9689_s1 + $0x158] sm:$0xf0]  ;;  %v4797_v31 = vor.u32 %v6245_v19, %v4794_v20 }
 0x143   :  { %3694 = vmatpush.bf16.msrb.mxu3 %v4581_v34  ;;  %v5201_v34 = vor.u32 %v6372_v23, %v5200_v21  ;;  %4215 = vst [vmem:[%s9692_s3 + $0x40] sm:$0xff] %v4189_v25  ;;  %v5205_v63 = vor.u32 %v6347_v48, %v5202_v49  ;;  %v3294_v62 = vpop.f32.mrf.mxu2  ;;  %v4800_v21 = vld [vmem:[%s9689_s1 + $0x3c8] sm:$0xf]  ;;  %v6271_v25 = vld [vmem:[%s9689_s1 + $0x490] sm:$0xf0] }
 0x144   :  { %3718 = vmatpush.bf16.msra.mxu1 %v4993_v59  ;;  %v6270_v59 = vld [vmem:[%s9689_s1 + $0x488] sm:$0xf0]  ;;  %v5210_v48 = vld [vmem:[%s9689_s1 + $0x7c4] sm:$0xf0]  ;;  %v4802_v20 = vld [vmem:[%s9689_s1 + $0x494] sm:$0xf0] }
 0x145   :  { %3740 = vmatpush.bf16.msrb.mxu2 %v5813_v38  ;;  %3670 = vmatmul.bf16.vlgmr.msra.gmra.mxu0 %v6847_v52  ;;  %v4378_v38 = vld [vmem:[%s9689_s1 + $0x154] sm:$0xf0]  ;;  %v3283_v61 = vpop.f32.mrf.mxu3  ;;  %v4793_v9 = vor.u32 %v6270_v59, %v4792_v58  ;;  %v5828_v49 = vld [vmem:[%s9689_s1 + $0xbc8] sm:$0xf]  ;;  %v6297_v59 = vld [vmem:[%s9689_s1 + $0x564] sm:$0xf] }
 0x146   :  { %3734 = vmatpush.bf16.msrb.mxu0 %v6013_v7  ;;  %v4381_v47 = vor.u32 %v6142_v37, %v4378_v38  ;;  %v3295_v7 = vadd.f32 %v3294_v62, %v3282_v51  ;;  %v4801_v37 = vor.u32 %v6271_v25, %v4800_v21  ;;  %v4593_v51 = vor.u32 %v6194_v41, %v4590_v42  ;;  %v6026_v61 = vld [vmem:[%s9689_s1 + $0xe24] sm:$0xf0]  ;;  %v5006_v62 = vld [vmem:[%s9689_s1 + $0x62c] sm:$0xf0]  ;;  %v6578_v6 = vld [vmem:[%s9689_s1 + $0xe28] sm:$0xf0] }
 0x147   :  { %3695 = vmatpush.bf16.msrb.mxu3 %v4377_v33  ;;  %v6021_v33 = vor.u32 %v6551_v43, %v6018_v44  ;;  %v3307_v57 = vpop.f32.mrf.mxu1  ;;  %v3320_v1 = vpop.f32.mrf.mxu0  ;;  %v4385_v43 = vor.u32 %v6168_v40, %v4384_v0  ;;  %v4596_v44 = vld [vmem:[%s9689_s1 + $0x230] sm:$0xf]  ;;  %v5829_v58 = vor.u32 %v6527_v50, %v5828_v49  ;;  %v5009_v13 = vor.u32 %v6297_v59, %v5006_v62  ;;  %v5420_v21 = vld [vmem:[%s9689_s1 + $0x898] sm:$0xf]  ;;  %v5626_v0 = vld [vmem:[%s9689_s1 + $0xafc] sm:$0xf0] }
 0x148   :  { %3719 = vmatpush.bf16.msra.mxu1 %v4789_v15  ;;  %v4148_v15 = vmax.f32 %v3295_v7, 0.0  ;;  %v6033_v19 = vor.u32 %v6578_v6, %v6032_v5  ;;  %v5632_v40 = vld [vmem:[%s9689_s1 + $0xa38] sm:$0xf]  ;;  %v5216_v41 = vld [vmem:[%s9689_s1 + $0x700] sm:$0xf] }
 0x149   :  { %3741 = vmatpush.bf16.msrb.mxu2 %v5609_v60  ;;  %v3308_v60 = vadd.f32 %v3307_v57, %v7739_v27  ;;  %v6374_v42 = vld [vmem:[%s9689_s1 + $0x7c8] sm:$0xf0]  ;;  %v5428_v49 = vld [vmem:[%s9689_s1 + $0x8a0] sm:$0xf]  ;;  %v6349_v62 = vld [vmem:[%s9689_s1 + $0x704] sm:$0xf] }
 0x14a   :  { %3696 = vmatmul.bf16.vlgmr.msrb.gmra.mxu3 %v6847_v52  ;;  %3766 = vmatpush.bf16.msra.mxu0 %v5817_v8  ;;  %v6375_v5 = vld [vmem:[%s9689_s1 + $0x7d0] sm:$0xf0]  ;;  %v4808_v6 = vld [vmem:[%s9689_s1 + $0x3d0] sm:$0xf] }
 0x14b   :  { %3760 = vmatpush.bf16.msra.mxu3 %v6017_v3  ;;  %v5825_v3 = vor.u32 %v6501_v55, %v5822_v56  ;;  %v3321_v8 = vadd.f32 %v3320_v1, %v3308_v60  ;;  %v3296_v35 = vpop.f32.mrf.mxu2  ;;  %v4392_v55 = vld [vmem:[%s9689_s1 + $0x98] sm:$0xf]  ;;  %v6169_v56 = vld [vmem:[%s9689_s1 + $0x160] sm:$0xf0]  ;;  %v6552_v60 = vld [vmem:[%s9689_s1 + $0xd5c] sm:$0xf] }
 0x14c   :  { %3720 = vmatpush.bf16.msra.mxu1 %v4585_v32  ;;  %v6024_v32 = vld [vmem:[%s9689_s1 + $0xd58] sm:$0xf]  ;;  %v5624_v1 = vld [vmem:[%s9689_s1 + $0xa30] sm:$0xf]  ;;  %v4393_v7 = vor.u32 %v6169_v56, %v4392_v55  ;;  %v4598_v35 = vld [vmem:[%s9689_s1 + $0x2fc] sm:$0xf0] }
 0x14d   :  { %3742 = vmatpush.bf16.msrb.mxu2 %v5405_v16  ;;  %v4149_v16 = vmax.f32 %v3321_v8, 0.0  ;;  %v8898_v30 = vpop.f32.mrf.mxu3  ;;  %v6029_v8 = vor.u32 %v6552_v60, %v6026_v61  ;;  %v6144_v55 = vld [vmem:[%s9689_s1 + $0x9c] sm:$0xf]  ;;  %v4394_v56 = vld [vmem:[%s9689_s1 + $0x164] sm:$0xf0] }
 0x14e   :  { %3767 = vmatpush.bf16.msra.mxu0 %v5613_v28  ;;  %v5414_v28 = vld [vmem:[%s9689_s1 + $0x95c] sm:$0xf0]  ;;  %v6553_v60 = vld [vmem:[%s9689_s1 + $0xd64] sm:$0xf]  ;;  %v6034_v61 = vld [vmem:[%s9689_s1 + $0xe2c] sm:$0xf0] }
 0x14f   :  { %3792 = vmatpush.bf16.msrb.mxu3 %v5821_v11  ;;  %v6450_v11 = vld [vmem:[%s9689_s1 + $0xa2c] sm:$0xf]  ;;  %v4190_v23 = vpack.c.bf16 %v4149_v16, %v4148_v15  ;;  %v3322_v36 = vpop.f32.mrf.mxu0  ;;  %v5417_v38 = vor.u32 %v6399_v26, %v5414_v28  ;;  %v5836_v15 = vld [vmem:[%s9689_s1 + $0xbd0] sm:$0xf]  ;;  %v6528_v16 = vld [vmem:[%s9689_s1 + $0xc98] sm:$0xf0] }
 0x150   :  { %6108 = vmatmul.msk.bf16.vlgmr.msra.gmra.mxu2 %vm2800_vm0, %v6691_v39  ;;  %3721 = vmatpush.bf16.msra.mxu1 %v4381_v47  ;;  %v5621_v18 = vor.u32 %v6450_v11, %v5618_v12  ;;  %v5837_v28 = vor.u32 %v6528_v16, %v5836_v15 }
 0x151   :  { %3743 = vmatpush.bf16.msrb.mxu2 %v5201_v34  ;;  %4216 = vst [vmem:[%s9692_s3 + $0x48] sm:$0xff] %v4190_v23  ;;  %v6577_v34 = vld [vmem:[%s9689_s1 + $0xe20] sm:$0xf0] }
 0x152   :  { %3768 = vmatpush.bf16.msra.mxu0 %v5409_v45  ;;  %v6220_v45 = vld [vmem:[%s9689_s1 + $0x2f8] sm:$0xf0]  ;;  %v6025_v47 = vor.u32 %v6577_v34, %v6024_v32  ;;  %v6425_v23 = vld [vmem:[%s9689_s1 + $0x960] sm:$0xf0]  ;;  %v6195_v34 = vld [vmem:[%s9689_s1 + $0x234] sm:$0xf] }
 0x153   :  { %3793 = vmatpush.bf16.msrb.mxu3 %v5617_v29  ;;  %3722 = vmatmul.bf16.vlgmr.msra.gmra.mxu1 %v6847_v52  ;;  %v3309_v29 = vpop.f32.mrf.mxu1  ;;  %v6477_v32 = vld [vmem:[%s9689_s1 + $0xb00] sm:$0xf0] }
 0x154   :  { %3786 = vmatpush.bf16.msrb.mxu1 %v6021_v33  ;;  %v4597_v33 = vor.u32 %v6220_v45, %v4596_v44  ;;  %v6451_v29 = vld [vmem:[%s9689_s1 + $0xa34] sm:$0xf] }
 0x155   :  { %3744 = vmatpush.bf16.msrb.mxu2 %v4997_v53  ;;  %6109 = vmatmul.msk.bf16.vlgmr.msrb.gmra.mxu0 %vm2800_vm0, %v6691_v39  ;;  %v6143_v53 = vld [vmem:[%s9689_s1 + $0x94] sm:$0xf] }
 0x156   :  { %3769 = vmatpush.bf16.msra.mxu0 %v5205_v63  ;;  %v4389_v4 = vor.u32 %v6143_v53, %v4386_v54  ;;  %v4601_v53 = vor.u32 %v6195_v34, %v4598_v35  ;;  %v6426_v54 = vld [vmem:[%s9689_s1 + $0x968] sm:$0xf0]  ;;  %v6247_v35 = vld [vmem:[%s9689_s1 + $0x3d4] sm:$0xf] }
 0x157   :  { %3794 = vmatpush.bf16.msrb.mxu3 %v5413_v46  ;;  %v6348_v46 = vld [vmem:[%s9689_s1 + $0x6fc] sm:$0xf]  ;;  %v3333_v11 = vpop.f32.mrf.mxu2  ;;  %v3359_v12 = vpop.f32.mrf.mxu0 }
 0x158   :  { %3818 = vmatpush.bf16.msra.mxu1 %v5825_v3  ;;  %v5213_v57 = vor.u32 %v6348_v46, %v5210_v48  ;;  %v3348_v3 = vpop.f32.mrf.mxu3  ;;  %v5633_v46 = vor.u32 %v6477_v32, %v5632_v40  ;;  %v5422_v48 = vld [vmem:[%s9689_s1 + $0x964] sm:$0xf0] }
 0x159   :  { %3745 = vmatpush.bf16.msrb.mxu2 %v4793_v9  ;;  %v6502_v9 = vld [vmem:[%s9689_s1 + $0xbcc] sm:$0xf]  ;;  %v5634_v40 = vld [vmem:[%s9689_s1 + $0xb04] sm:$0xf0] }
 0x15a   :  { %6110 = vmatmul.msk.bf16.vlgmr.msra.gmra.mxu3 %vm2800_vm0, %v6691_v39  ;;  %3770 = vmatpush.bf16.msra.mxu0 %v5001_v17  ;;  %v6246_v17 = vld [vmem:[%s9689_s1 + $0x3cc] sm:$0xf] }
 0x15b   :  { %3795 = vmatpush.bf16.msrb.mxu3 %v5209_v2  ;;  %v3372_v63 = vpop.f32.mrf.mxu1  ;;  %v6476_v2 = vld [vmem:[%s9689_s1 + $0xaf8] sm:$0xf0] }
 0x15c   :  { %3819 = vmatpush.bf16.msra.mxu1 %v5621_v18  ;;  %v5625_v14 = vor.u32 %v6476_v2, %v5624_v1  ;;  %v3360_v18 = vadd.f32 %v3359_v12, %v7739_v27  ;;  %v5218_v1 = vld [vmem:[%s9689_s1 + $0x7cc] sm:$0xf0]  ;;  %v4397_v2 = vor.u32 %v6144_v55, %v4394_v56  ;;  %v4606_v55 = vld [vmem:[%s9689_s1 + $0x304] sm:$0xf0] }
 0x15d   :  { %3746 = vmatpush.bf16.msrb.mxu2 %v4589_v24  ;;  %v5833_v24 = vor.u32 %v6502_v9, %v5830_v10  ;;  %v6272_v9 = vld [vmem:[%s9689_s1 + $0x498] sm:$0xf0]  ;;  %v6503_v10 = vld [vmem:[%s9689_s1 + $0xbd4] sm:$0xf] }
 0x15e   :  { %3771 = vmatpush.bf16.msra.mxu0 %v4797_v31  ;;  %v3373_v26 = vadd.f32 %v3372_v63, %v3360_v18  ;;  %v4805_v31 = vor.u32 %v6246_v17, %v4802_v20  ;;  %v5429_v63 = vor.u32 %v6426_v54, %v5428_v49  ;;  %v6298_v17 = vld [vmem:[%s9689_s1 + $0x56c] sm:$0xf]  ;;  %v4809_v20 = vor.u32 %v6272_v9, %v4808_v6  ;;  %v6196_v54 = vld [vmem:[%s9689_s1 + $0x23c] sm:$0xf]  ;;  %v6145_v6 = vld [vmem:[%s9689_s1 + $0xa4] sm:$0xf] }
 0x15f   :  { %3796 = vmatpush.bf16.msrb.mxu3 %v5005_v22  ;;  %v3334_v22 = vadd.f32 %v3333_v11, %v7739_v27  ;;  %v3335_v50 = vpop.f32.mrf.mxu2  ;;  %v5838_v11 = vld [vmem:[%s9689_s1 + $0xc9c] sm:$0xf0] }
 0x160   :  { %3820 = vmatpush.bf16.msra.mxu1 %v5417_v38  ;;  %v6040_v50 = vld [vmem:[%s9689_s1 + $0xd68] sm:$0xf] }
 0x161   :  { %3747 = vmatpush.bf16.msrb.mxu2 %v4385_v43  ;;  %v3347_v25 = vadd.f32 %v8898_v30, %v3334_v22  ;;  %v5421_v30 = vor.u32 %v6425_v23, %v5420_v21  ;;  %v5629_v43 = vor.u32 %v6451_v29, %v5626_v0  ;;  %v3385_v45 = vpop.f32.mrf.mxu3  ;;  %v5014_v22 = vld [vmem:[%s9689_s1 + $0x634] sm:$0xf0]  ;;  %v5841_v21 = vor.u32 %v6503_v10, %v5838_v11  ;;  %v5020_v23 = vld [vmem:[%s9689_s1 + $0x570] sm:$0xf]  ;;  %v6221_v29 = vld [vmem:[%s9689_s1 + $0x300] sm:$0xf0] }
 0x162   :  { %3772 = vmatpush.bf16.msra.mxu0 %v4593_v51  ;;  %v3361_v51 = vpop.f32.mrf.mxu0  ;;  %v6452_v0 = vld [vmem:[%s9689_s1 + $0xa3c] sm:$0xf]  ;;  %v4408_v10 = vld [vmem:[%s9689_s1 + $0xa8] sm:$0xf]  ;;  %v6171_v11 = vld [vmem:[%s9689_s1 + $0x170] sm:$0xf0] }
 0x163   :  { %3797 = vmatpush.bf16.msrb.mxu3 %v4801_v37  ;;  %6111 = vmatmul.msk.bf16.vlgmr.msrb.gmra.mxu1 %vm2800_vm0, %v6691_v39  ;;  %v4150_v36 = vmax.f32 %v3347_v25, 0.0  ;;  %v4151_v37 = vmax.f32 %v3373_v26, 0.0  ;;  %v3374_v38 = vpop.f32.mrf.mxu1  ;;  %v4604_v25 = vld [vmem:[%s9689_s1 + $0x238] sm:$0xf]  ;;  %v6579_v51 = vld [vmem:[%s9689_s1 + $0xe30] sm:$0xf0] }
 0x164   :  { %3748 = vmatmul.bf16.vlgmr.msrb.gmra.mxu2 %v6847_v52  ;;  %3821 = vmatpush.bf16.msra.mxu1 %v5213_v57  ;;  %v5012_v57 = vld [vmem:[%s9689_s1 + $0x568] sm:$0xf]  ;;  %v5637_v38 = vor.u32 %v6452_v0, %v5634_v40  ;;  %v5852_v40 = vld [vmem:[%s9689_s1 + $0xbe0] sm:$0xf] }
 0x165   :  { %3812 = vmatpush.bf16.msra.mxu2 %v6025_v47  ;;  %v4191_v44 = vpack.c.bf16 %v4151_v37, %v4150_v36  ;;  %v6400_v47 = vld [vmem:[%s9689_s1 + $0x89c] sm:$0xf]  ;;  %v4810_v36 = vld [vmem:[%s9689_s1 + $0x49c] sm:$0xf0]  ;;  %v4605_v37 = vor.u32 %v6221_v29, %v4604_v25  ;;  %v5846_v25 = vld [vmem:[%s9689_s1 + $0xca4] sm:$0xf0] }
 0x166   :  { %3773 = vmatpush.bf16.msra.mxu0 %v4389_v4  ;;  %v5425_v59 = vor.u32 %v6400_v47, %v5422_v48  ;;  %v5224_v4 = vld [vmem:[%s9689_s1 + $0x708] sm:$0xf]  ;;  %v5430_v47 = vld [vmem:[%s9689_s1 + $0x96c] sm:$0xf0]  ;;  %v4813_v49 = vor.u32 %v6247_v35, %v4810_v36 }
 0x167   :  { %3798 = vmatpush.bf16.msrb.mxu3 %v4597_v33  ;;  %v5217_v33 = vor.u32 %v6374_v42, %v5216_v41  ;;  %4217 = vst [vmem:[%s9692_s3 + $0x50] sm:$0xff] %v4191_v44  ;;  %v5225_v16 = vor.u32 %v6375_v5, %v5224_v4  ;;  %v3398_v18 = vpop.f32.mrf.mxu2  ;;  %v4816_v41 = vld [vmem:[%s9689_s1 + $0x3d8] sm:$0xf]  ;;  %v6273_v42 = vld [vmem:[%s9689_s1 + $0x4a0] sm:$0xf0]  ;;  %v4609_v4 = vor.u32 %v6196_v54, %v4606_v55 }
 0x168   :  { %3822 = vmatpush.bf16.msra.mxu1 %v5009_v13  ;;  %v5221_v13 = vor.u32 %v6349_v62, %v5218_v1  ;;  %v6041_v62 = vor.u32 %v6579_v51, %v6040_v50  ;;  %v5226_v1 = vld [vmem:[%s9689_s1 + $0x7d4] sm:$0xf0]  ;;  %v4818_v36 = vld [vmem:[%s9689_s1 + $0x4a4] sm:$0xf0]  ;;  %v6479_v51 = vld [vmem:[%s9689_s1 + $0xb10] sm:$0xf0] }
 0x169   :  { %3844 = vmatpush.bf16.msrb.mxu2 %v5829_v58  ;;  %3774 = vmatmul.bf16.vlgmr.msra.gmra.mxu0 %v6847_v52  ;;  %v6323_v58 = vld [vmem:[%s9689_s1 + $0x630] sm:$0xf0]  ;;  %v3387_v15 = vpop.f32.mrf.mxu3 }
 0x16a   :  { %3838 = vmatpush.bf16.msrb.mxu0 %v6029_v8  ;;  %v5013_v3 = vor.u32 %v6323_v58, %v5012_v57  ;;  %v6037_v8 = vor.u32 %v6553_v60, %v6034_v61  ;;  %v4612_v60 = vld [vmem:[%s9689_s1 + $0x240] sm:$0xf]  ;;  %v6222_v61 = vld [vmem:[%s9689_s1 + $0x308] sm:$0xf0] }
 0x16b   :  { %3799 = vmatpush.bf16.msrb.mxu3 %v4393_v7  ;;  %v3386_v7 = vadd.f32 %v3385_v45, %v7739_v27  ;;  %v3411_v12 = vpop.f32.mrf.mxu1  ;;  %v6170_v45 = vld [vmem:[%s9689_s1 + $0x168] sm:$0xf0]  ;;  %v4613_v5 = vor.u32 %v6222_v61, %v4612_v60 }
 0x16c   :  { %3823 = vmatpush.bf16.msra.mxu1 %v4805_v31  ;;  %v5017_v31 = vor.u32 %v6298_v17, %v5014_v22  ;;  %v6478_v15 = vld [vmem:[%s9689_s1 + $0xb08] sm:$0xf0] }
 0x16d   :  { %3845 = vmatpush.bf16.msrb.mxu2 %v5625_v14  ;;  %v3412_v14 = vadd.f32 %v3411_v12, %v7739_v27  ;;  %v3399_v26 = vadd.f32 %v3398_v18, %v3386_v7  ;;  %v4402_v7 = vld [vmem:[%s9689_s1 + $0x16c] sm:$0xf0]  ;;  %v6299_v12 = vld [vmem:[%s9689_s1 + $0x574] sm:$0xf]  ;;  %v6554_v22 = vld [vmem:[%s9689_s1 + $0xd6c] sm:$0xf] }
 0x16e   :  { %3800 = vmatmul.bf16.vlgmr.msrb.gmra.mxu3 %v6847_v52  ;;  %3870 = vmatpush.bf16.msra.mxu0 %v5833_v24  ;;  %v6324_v24 = vld [vmem:[%s9689_s1 + $0x638] sm:$0xf0]  ;;  %v4405_v17 = vor.u32 %v6145_v6, %v4402_v7  ;;  %v6048_v18 = vld [vmem:[%s9689_s1 + $0xd70] sm:$0xf] }
 0x16f   :  { %3864 = vmatpush.bf16.msra.mxu3 %v6033_v19  ;;  %v3424_v19 = vpop.f32.mrf.mxu0  ;;  %v5021_v34 = vor.u32 %v6324_v24, %v5020_v23  ;;  %v3400_v56 = vpop.f32.mrf.mxu2  ;;  %v6042_v23 = vld [vmem:[%s9689_s1 + $0xe34] sm:$0xf0]  ;;  %v6504_v24 = vld [vmem:[%s9689_s1 + $0xbdc] sm:$0xf]  ;;  %v5444_v6 = vld [vmem:[%s9689_s1 + $0x8b0] sm:$0xf] }
 0x170   :  { %3824 = vmatpush.bf16.msra.mxu1 %v4601_v53  ;;  %v5232_v56 = vld [vmem:[%s9689_s1 + $0x710] sm:$0xf]  ;;  %v6428_v7 = vld [vmem:[%s9689_s1 + $0x978] sm:$0xf0] }
 0x171   :  { %3846 = vmatpush.bf16.msrb.mxu2 %v5421_v30  ;;  %v4152_v30 = vmax.f32 %v3399_v26, 0.0  ;;  %v9145_v53 = vpop.f32.mrf.mxu3 }
 0x172   :  { %3871 = vmatpush.bf16.msra.mxu0 %v5629_v43  ;;  %v4400_v43 = vld [vmem:[%s9689_s1 + $0xa0] sm:$0xf] }
 0x173   :  { %3896 = vmatpush.bf16.msrb.mxu3 %v5837_v28  ;;  %v3425_v28 = vadd.f32 %v3424_v19, %v3412_v14  ;;  %v3413_v48 = vpop.f32.mrf.mxu1  ;;  %v4401_v58 = vor.u32 %v6170_v45, %v4400_v43  ;;  %v5640_v14 = vld [vmem:[%s9689_s1 + $0xa40] sm:$0xf]  ;;  %v6580_v19 = vld [vmem:[%s9689_s1 + $0xe38] sm:$0xf0] }
 0x174   :  { %6112 = vmatmul.msk.bf16.vlgmr.msra.gmra.mxu2 %vm2800_vm0, %v6691_v39  ;;  %3825 = vmatpush.bf16.msra.mxu1 %v4397_v2  ;;  %v5844_v2 = vld [vmem:[%s9689_s1 + $0xbd8] sm:$0xf]  ;;  %v5641_v0 = vor.u32 %v6478_v15, %v5640_v14  ;;  %v6049_v35 = vor.u32 %v6580_v19, %v6048_v18  ;;  %v5648_v48 = vld [vmem:[%s9689_s1 + $0xa48] sm:$0xf]  ;;  %v5445_v15 = vor.u32 %v6428_v7, %v5444_v6 }
 0x175   :  { %3847 = vmatpush.bf16.msrb.mxu2 %v5217_v33  ;;  %v4153_v32 = vmax.f32 %v3425_v28, 0.0  ;;  %v4817_v33 = vor.u32 %v6273_v42, %v4816_v41  ;;  %v6045_v41 = vor.u32 %v6554_v22, %v6042_v23  ;;  %v5849_v42 = vor.u32 %v6504_v24, %v5846_v25  ;;  %v5234_v22 = vld [vmem:[%s9689_s1 + $0x7dc] sm:$0xf0]  ;;  %v5240_v18 = vld [vmem:[%s9689_s1 + $0x718] sm:$0xf] }
 0x176   :  { %3872 = vmatpush.bf16.msra.mxu0 %v5425_v59  ;;  %v6377_v23 = vld [vmem:[%s9689_s1 + $0x7e0] sm:$0xf0]  ;;  %v5854_v25 = vld [vmem:[%s9689_s1 + $0xcac] sm:$0xf0] }
 0x177   :  { %3897 = vmatpush.bf16.msrb.mxu3 %v5633_v46  ;;  %3826 = vmatmul.bf16.vlgmr.msra.gmra.mxu1 %v6847_v52  ;;  %v4192_v44 = vpack.c.bf16 %v4153_v32, %v4152_v30  ;;  %v6401_v46 = vld [vmem:[%s9689_s1 + $0x8a4] sm:$0xf]  ;;  %v3426_v57 = vpop.f32.mrf.mxu0  ;;  %v6248_v30 = vld [vmem:[%s9689_s1 + $0x3dc] sm:$0xf] }
 0x178   :  { %3890 = vmatpush.bf16.msrb.mxu1 %v6037_v8  ;;  %v5433_v59 = vor.u32 %v6401_v46, %v5430_v47  ;;  %v6453_v46 = vld [vmem:[%s9689_s1 + $0xa44] sm:$0xf]  ;;  %v5642_v47 = vld [vmem:[%s9689_s1 + $0xb0c] sm:$0xf0]  ;;  %v6376_v57 = vld [vmem:[%s9689_s1 + $0x7d8] sm:$0xf0] }
 0x179   :  { %3848 = vmatpush.bf16.msrb.mxu2 %v5013_v3  ;;  %6113 = vmatmul.msk.bf16.vlgmr.msrb.gmra.mxu0 %vm2800_vm0, %v6691_v39  ;;  %4218 = vst [vmem:[%s9692_s3 + $0x58] sm:$0xff] %v4192_v44  ;;  %v6529_v3 = vld [vmem:[%s9689_s1 + $0xca0] sm:$0xf0]  ;;  %v5645_v61 = vor.u32 %v6453_v46, %v5642_v47  ;;  %v5650_v46 = vld [vmem:[%s9689_s1 + $0xb14] sm:$0xf0] }
 0x17a   :  { %3873 = vmatpush.bf16.msra.mxu0 %v5221_v13  ;;  %v5845_v9 = vor.u32 %v6529_v3, %v5844_v2  ;;  %v5022_v13 = vld [vmem:[%s9689_s1 + $0x63c] sm:$0xf0]  ;;  %v6505_v24 = vld [vmem:[%s9689_s1 + $0xbe4] sm:$0xf]  ;;  %v4620_v47 = vld [vmem:[%s9689_s1 + $0x248] sm:$0xf] }
 0x17b   :  { %3898 = vmatpush.bf16.msrb.mxu3 %v5429_v63  ;;  %v6350_v63 = vld [vmem:[%s9689_s1 + $0x70c] sm:$0xf]  ;;  %v3437_v26 = vpop.f32.mrf.mxu2  ;;  %v5025_v29 = vor.u32 %v6299_v12, %v5022_v13  ;;  %v6555_v12 = vld [vmem:[%s9689_s1 + $0xd74] sm:$0xf]  ;;  %v6050_v13 = vld [vmem:[%s9689_s1 + $0xe3c] sm:$0xf0] }
 0x17c   :  { %3922 = vmatpush.bf16.msra.mxu1 %v5841_v21  ;;  %v5229_v8 = vor.u32 %v6350_v63, %v5226_v1  ;;  %v4409_v21 = vor.u32 %v6171_v11, %v4408_v10  ;;  %v3438_v32 = vadd.f32 %v3437_v26, %v7739_v27  ;;  %v5649_v63 = vor.u32 %v6479_v51, %v5648_v48  ;;  %v5438_v1 = vld [vmem:[%s9689_s1 + $0x974] sm:$0xf0]  ;;  %v6325_v11 = vld [vmem:[%s9689_s1 + $0x640] sm:$0xf0]  ;;  %v6223_v48 = vld [vmem:[%s9689_s1 + $0x310] sm:$0xf0] }
 0x17d   :  { %3849 = vmatpush.bf16.msrb.mxu2 %v4809_v20  ;;  %v3452_v20 = vpop.f32.mrf.mxu3  ;;  %v5028_v10 = vld [vmem:[%s9689_s1 + $0x578] sm:$0xf] }
 0x17e   :  { %6114 = vmatmul.msk.bf16.vlgmr.msra.gmra.mxu3 %vm2800_vm0, %v6691_v39  ;;  %3874 = vmatpush.bf16.msra.mxu0 %v5017_v31  ;;  %v6530_v31 = vld [vmem:[%s9689_s1 + $0xca8] sm:$0xf0]  ;;  %v3451_v43 = vadd.f32 %v9145_v53, %v3438_v32  ;;  %v6197_v53 = vld [vmem:[%s9689_s1 + $0x244] sm:$0xf]  ;;  %v5029_v20 = vor.u32 %v6325_v11, %v5028_v10  ;;  %v4622_v11 = vld [vmem:[%s9689_s1 + $0x314] sm:$0xf0] }
 0x17f   :  { %3899 = vmatpush.bf16.msrb.mxu3 %v5225_v16  ;;  %v3476_v16 = vpop.f32.mrf.mxu1  ;;  %v3463_v28 = vpop.f32.mrf.mxu0  ;;  %v5853_v45 = vor.u32 %v6530_v31, %v5852_v40  ;;  %v6198_v10 = vld [vmem:[%s9689_s1 + $0x24c] sm:$0xf] }
 0x180   :  { %3923 = vmatpush.bf16.msra.mxu1 %v5637_v38  ;;  %v6427_v38 = vld [vmem:[%s9689_s1 + $0x970] sm:$0xf0]  ;;  %v4154_v54 = vmax.f32 %v3451_v43, 0.0 }
 0x181   :  { %3850 = vmatpush.bf16.msrb.mxu2 %v4605_v37  ;;  %v5436_v37 = vld [vmem:[%s9689_s1 + $0x8a8] sm:$0xf] }
 0x182   :  { %3875 = vmatpush.bf16.msra.mxu0 %v4813_v49  ;;  %v4821_v49 = vor.u32 %v6248_v30, %v4818_v36  ;;  %v5437_v50 = vor.u32 %v6427_v38, %v5436_v37  ;;  %v6300_v36 = vld [vmem:[%s9689_s1 + $0x57c] sm:$0xf]  ;;  %v5030_v37 = vld [vmem:[%s9689_s1 + $0x644] sm:$0xf0]  ;;  %v5036_v38 = vld [vmem:[%s9689_s1 + $0x580] sm:$0xf] }
 0x183   :  { %3900 = vmatpush.bf16.msrb.mxu3 %v5021_v34  ;;  %v3464_v34 = vadd.f32 %v3463_v28, %v7739_v27  ;;  %v3439_v2 = vpop.f32.mrf.mxu2  ;;  %v4824_v28 = vld [vmem:[%s9689_s1 + $0x3e0] sm:$0xf]  ;;  %v5033_v51 = vor.u32 %v6300_v36, %v5030_v37 }
 0x184   :  { %3924 = vmatpush.bf16.msra.mxu1 %v5433_v59  ;;  %v6064_v37 = vld [vmem:[%s9689_s1 + $0xd80] sm:$0xf] }
 0x185   :  { %3851 = vmatpush.bf16.msrb.mxu2 %v4401_v58  ;;  %v3477_v44 = vadd.f32 %v3476_v16, %v3464_v34  ;;  %v3489_v60 = vpop.f32.mrf.mxu3  ;;  %v5241_v34 = vor.u32 %v6377_v23, %v5240_v18  ;;  %v6531_v18 = vld [vmem:[%s9689_s1 + $0xcb0] sm:$0xf0]  ;;  %v4418_v23 = vld [vmem:[%s9689_s1 + $0x17c] sm:$0xf0] }
 0x186   :  { %3876 = vmatpush.bf16.msra.mxu0 %v4609_v4  ;;  %v3490_v19 = vadd.f32 %v3489_v60, %v7739_v27  ;;  %v6403_v60 = vld [vmem:[%s9689_s1 + $0x8b4] sm:$0xf] }
 0x187   :  { %3901 = vmatpush.bf16.msrb.mxu3 %v4817_v33  ;;  %6115 = vmatmul.msk.bf16.vlgmr.msrb.gmra.mxu1 %vm2800_vm0, %v6691_v39  ;;  %v4614_v33 = vld [vmem:[%s9689_s1 + $0x30c] sm:$0xf0]  ;;  %v4155_v55 = vmax.f32 %v3477_v44, 0.0  ;;  %v3478_v58 = vpop.f32.mrf.mxu1  ;;  %v3465_v3 = vpop.f32.mrf.mxu0  ;;  %v6326_v44 = vld [vmem:[%s9689_s1 + $0x648] sm:$0xf0] }
 0x188   :  { %3852 = vmatmul.bf16.vlgmr.msrb.gmra.mxu2 %v6847_v52  ;;  %3925 = vmatpush.bf16.msra.mxu1 %v5229_v8  ;;  %v4617_v4 = vor.u32 %v6197_v53, %v4614_v33  ;;  %v6146_v8 = vld [vmem:[%s9689_s1 + $0xac] sm:$0xf]  ;;  %v5037_v53 = vor.u32 %v6326_v44, %v5036_v38  ;;  %v4621_v58 = vor.u32 %v6223_v48, %v4620_v47  ;;  %v5862_v44 = vld [vmem:[%s9689_s1 + $0xcb4] sm:$0xf0] }
 0x189   :  { %3916 = vmatpush.bf16.msra.mxu2 %v6041_v62  ;;  %v4193_v59 = vpack.c.bf16 %v4155_v55, %v4154_v54  ;;  %v6402_v62 = vld [vmem:[%s9689_s1 + $0x8ac] sm:$0xf]  ;;  %v6249_v54 = vld [vmem:[%s9689_s1 + $0x3e4] sm:$0xf]  ;;  %v4826_v55 = vld [vmem:[%s9689_s1 + $0x4ac] sm:$0xf0] }
 0x18a   :  { %3877 = vmatpush.bf16.msra.mxu0 %v4405_v17  ;;  %v5441_v14 = vor.u32 %v6402_v62, %v5438_v1  ;;  %v6351_v17 = vld [vmem:[%s9689_s1 + $0x714] sm:$0xf]  ;;  %v4416_v62 = vld [vmem:[%s9689_s1 + $0xb0] sm:$0xf]  ;;  %v6172_v1 = vld [vmem:[%s9689_s1 + $0x178] sm:$0xf0]  ;;  %v4829_v3 = vor.u32 %v6249_v54, %v4826_v55 }
 0x18b   :  { %3902 = vmatpush.bf16.msrb.mxu3 %v4613_v5  ;;  %v5233_v5 = vor.u32 %v6376_v57, %v5232_v56  ;;  %4219 = vst [vmem:[%s9692_s3 + $0x60] sm:$0xff] %v4193_v59  ;;  %v5237_v31 = vor.u32 %v6351_v17, %v5234_v22  ;;  %v3502_v30 = vpop.f32.mrf.mxu2  ;;  %v4832_v56 = vld [vmem:[%s9689_s1 + $0x3e8] sm:$0xf]  ;;  %v6275_v59 = vld [vmem:[%s9689_s1 + $0x4b0] sm:$0xf0] }
 0x18c   :  { %3926 = vmatpush.bf16.msra.mxu1 %v5025_v29  ;;  %v6274_v29 = vld [vmem:[%s9689_s1 + $0x4a8] sm:$0xf0]  ;;  %v5242_v17 = vld [vmem:[%s9689_s1 + $0x7e4] sm:$0xf0]  ;;  %v4834_v55 = vld [vmem:[%s9689_s1 + $0x4b4] sm:$0xf0] }
 0x18d   :  { %3948 = vmatpush.bf16.msrb.mxu2 %v5845_v9  ;;  %3878 = vmatmul.bf16.vlgmr.msra.gmra.mxu0 %v6847_v52  ;;  %v4410_v9 = vld [vmem:[%s9689_s1 + $0x174] sm:$0xf0]  ;;  %v3491_v40 = vpop.f32.mrf.mxu3  ;;  %v4825_v43 = vor.u32 %v6274_v29, %v4824_v28  ;;  %v5860_v22 = vld [vmem:[%s9689_s1 + $0xbe8] sm:$0xf]  ;;  %v6301_v29 = vld [vmem:[%s9689_s1 + $0x584] sm:$0xf] }
 0x18e   :  { %3942 = vmatpush.bf16.msrb.mxu0 %v6045_v41  ;;  %v4413_v16 = vor.u32 %v6146_v8, %v4410_v9  ;;  %v3503_v41 = vadd.f32 %v3502_v30, %v3490_v19  ;;  %v4833_v8 = vor.u32 %v6275_v59, %v4832_v56  ;;  %v4625_v19 = vor.u32 %v6198_v10, %v4622_v11  ;;  %v6058_v40 = vld [vmem:[%s9689_s1 + $0xe44] sm:$0xf0]  ;;  %v5038_v30 = vld [vmem:[%s9689_s1 + $0x64c] sm:$0xf0]  ;;  %v6582_v38 = vld [vmem:[%s9689_s1 + $0xe48] sm:$0xf0] }
 0x18f   :  { %3903 = vmatpush.bf16.msrb.mxu3 %v4409_v21  ;;  %v6053_v21 = vor.u32 %v6555_v12, %v6050_v13  ;;  %v3515_v26 = vpop.f32.mrf.mxu1  ;;  %v3528_v32 = vpop.f32.mrf.mxu0  ;;  %v4417_v12 = vor.u32 %v6172_v1, %v4416_v62  ;;  %v4628_v13 = vld [vmem:[%s9689_s1 + $0x250] sm:$0xf]  ;;  %v5861_v28 = vor.u32 %v6531_v18, %v5860_v22  ;;  %v5041_v47 = vor.u32 %v6301_v29, %v5038_v30  ;;  %v5452_v56 = vld [vmem:[%s9689_s1 + $0x8b8] sm:$0xf]  ;;  %v5658_v62 = vld [vmem:[%s9689_s1 + $0xb1c] sm:$0xf0] }
 0x190   :  { %3927 = vmatpush.bf16.msra.mxu1 %v4821_v49  ;;  %v4156_v49 = vmax.f32 %v3503_v41, 0.0  ;;  %v6065_v54 = vor.u32 %v6582_v38, %v6064_v37  ;;  %v5664_v1 = vld [vmem:[%s9689_s1 + $0xa58] sm:$0xf]  ;;  %v5248_v10 = vld [vmem:[%s9689_s1 + $0x720] sm:$0xf] }
 0x191   :  { %3949 = vmatpush.bf16.msrb.mxu2 %v5641_v0  ;;  %v3516_v0 = vadd.f32 %v3515_v26, %v7739_v27  ;;  %v6378_v11 = vld [vmem:[%s9689_s1 + $0x7e8] sm:$0xf0]  ;;  %v5460_v22 = vld [vmem:[%s9689_s1 + $0x8c0] sm:$0xf]  ;;  %v6353_v30 = vld [vmem:[%s9689_s1 + $0x724] sm:$0xf] }
 0x192   :  { %3904 = vmatmul.bf16.vlgmr.msrb.gmra.mxu3 %v6847_v52  ;;  %3974 = vmatpush.bf16.msra.mxu0 %v5849_v42  ;;  %v6379_v37 = vld [vmem:[%s9689_s1 + $0x7f0] sm:$0xf0] }
 0x193   :  { %3968 = vmatpush.bf16.msra.mxu3 %v6049_v35  ;;  %v5857_v35 = vor.u32 %v6505_v24, %v5854_v25  ;;  %v3529_v42 = vadd.f32 %v3528_v32, %v3516_v0  ;;  %v3504_v6 = vpop.f32.mrf.mxu2  ;;  %v4424_v24 = vld [vmem:[%s9689_s1 + $0xb8] sm:$0xf]  ;;  %v6173_v25 = vld [vmem:[%s9689_s1 + $0x180] sm:$0xf0]  ;;  %v6556_v0 = vld [vmem:[%s9689_s1 + $0xd7c] sm:$0xf] }
 0x194   :  { %3928 = vmatpush.bf16.msra.mxu1 %v4617_v4  ;;  %v6056_v4 = vld [vmem:[%s9689_s1 + $0xd78] sm:$0xf]  ;;  %v5656_v32 = vld [vmem:[%s9689_s1 + $0xa50] sm:$0xf]  ;;  %v4425_v41 = vor.u32 %v6173_v25, %v4424_v24  ;;  %v4630_v6 = vld [vmem:[%s9689_s1 + $0x31c] sm:$0xf0] }
 0x195   :  { %3950 = vmatpush.bf16.msrb.mxu2 %v5437_v50  ;;  %v4157_v50 = vmax.f32 %v3529_v42, 0.0  ;;  %v9380_v2 = vpop.f32.mrf.mxu3  ;;  %v6061_v42 = vor.u32 %v6556_v0, %v6058_v40  ;;  %v6148_v24 = vld [vmem:[%s9689_s1 + $0xbc] sm:$0xf]  ;;  %v4426_v25 = vld [vmem:[%s9689_s1 + $0x184] sm:$0xf0] }
 0x196   :  { %3975 = vmatpush.bf16.msra.mxu0 %v5645_v61  ;;  %v5446_v61 = vld [vmem:[%s9689_s1 + $0x97c] sm:$0xf0]  ;;  %v6557_v0 = vld [vmem:[%s9689_s1 + $0xd84] sm:$0xf]  ;;  %v6066_v40 = vld [vmem:[%s9689_s1 + $0xe4c] sm:$0xf0] }
 0x197   :  { %4000 = vmatpush.bf16.msrb.mxu3 %v5853_v45  ;;  %v6454_v45 = vld [vmem:[%s9689_s1 + $0xa4c] sm:$0xf]  ;;  %v4194_v57 = vpack.c.bf16 %v4157_v50, %v4156_v49  ;;  %v3530_v7 = vpop.f32.mrf.mxu0  ;;  %v5449_v9 = vor.u32 %v6403_v60, %v5446_v61  ;;  %v5868_v49 = vld [vmem:[%s9689_s1 + $0xbf0] sm:$0xf]  ;;  %v6532_v50 = vld [vmem:[%s9689_s1 + $0xcb8] sm:$0xf0] }
 0x198   :  { %6116 = vmatmul.msk.bf16.vlgmr.msra.gmra.mxu2 %vm2800_vm0, %v6691_v39  ;;  %3929 = vmatpush.bf16.msra.mxu1 %v4413_v16  ;;  %v5653_v33 = vor.u32 %v6454_v45, %v5650_v46  ;;  %v5869_v61 = vor.u32 %v6532_v50, %v5868_v49  ;;  %v6302_v49 = vld [vmem:[%s9689_s1 + $0x58c] sm:$0xf]  ;;  %v5046_v50 = vld [vmem:[%s9689_s1 + $0x654] sm:$0xf0] }
 0x199   :  { %3951 = vmatpush.bf16.msrb.mxu2 %v5233_v5  ;;  %4220 = vst [vmem:[%s9692_s3 + $0x68] sm:$0xff] %v4194_v57  ;;  %v6581_v5 = vld [vmem:[%s9689_s1 + $0xe40] sm:$0xf0] }
 0x19a   :  { %3976 = vmatpush.bf16.msra.mxu0 %v5441_v14  ;;  %v6224_v14 = vld [vmem:[%s9689_s1 + $0x318] sm:$0xf0]  ;;  %v6057_v16 = vor.u32 %v6581_v5, %v6056_v4  ;;  %v6429_v57 = vld [vmem:[%s9689_s1 + $0x980] sm:$0xf0]  ;;  %v6199_v5 = vld [vmem:[%s9689_s1 + $0x254] sm:$0xf] }
 0x19b   :  { %4001 = vmatpush.bf16.msrb.mxu3 %v5649_v63  ;;  %3930 = vmatmul.bf16.vlgmr.msra.gmra.mxu1 %v6847_v52  ;;  %v3517_v63 = vpop.f32.mrf.mxu1  ;;  %v6481_v4 = vld [vmem:[%s9689_s1 + $0xb20] sm:$0xf0] }
 0x19c   :  { %3994 = vmatpush.bf16.msrb.mxu1 %v6053_v21  ;;  %v4629_v21 = vor.u32 %v6224_v14, %v4628_v13  ;;  %v6455_v63 = vld [vmem:[%s9689_s1 + $0xa54] sm:$0xf] }
 0x19d   :  { %3952 = vmatpush.bf16.msrb.mxu2 %v5029_v20  ;;  %6117 = vmatmul.msk.bf16.vlgmr.msrb.gmra.mxu0 %vm2800_vm0, %v6691_v39  ;;  %v6147_v20 = vld [vmem:[%s9689_s1 + $0xb4] sm:$0xf] }
 0x19e   :  { %3977 = vmatpush.bf16.msra.mxu0 %v5237_v31  ;;  %v4421_v36 = vor.u32 %v6147_v20, %v4418_v23  ;;  %v4633_v20 = vor.u32 %v6199_v5, %v4630_v6  ;;  %v6430_v23 = vld [vmem:[%s9689_s1 + $0x988] sm:$0xf0]  ;;  %v6277_v5 = vld [vmem:[%s9689_s1 + $0x4c0] sm:$0xf0] }
 0x19f   :  { %4002 = vmatpush.bf16.msrb.mxu3 %v5445_v15  ;;  %v6352_v15 = vld [vmem:[%s9689_s1 + $0x71c] sm:$0xf]  ;;  %v3541_v45 = vpop.f32.mrf.mxu2  ;;  %v3567_v46 = vpop.f32.mrf.mxu0 }
 0x1a0   :  { %4026 = vmatpush.bf16.msra.mxu1 %v5857_v35  ;;  %v5245_v26 = vor.u32 %v6352_v15, %v5242_v17  ;;  %v3556_v35 = vpop.f32.mrf.mxu3  ;;  %v5665_v15 = vor.u32 %v6481_v4, %v5664_v1  ;;  %v5454_v17 = vld [vmem:[%s9689_s1 + $0x984] sm:$0xf0]  ;;  %v6251_v1 = vld [vmem:[%s9689_s1 + $0x3f4] sm:$0xf]  ;;  %v4848_v4 = vld [vmem:[%s9689_s1 + $0x3f8] sm:$0xf] }
 0x1a1   :  { %3953 = vmatpush.bf16.msrb.mxu2 %v4825_v43  ;;  %v6506_v43 = vld [vmem:[%s9689_s1 + $0xbec] sm:$0xf] }
 0x1a2   :  { %6118 = vmatmul.msk.bf16.vlgmr.msra.gmra.mxu3 %vm2800_vm0, %v6691_v39  ;;  %3978 = vmatpush.bf16.msra.mxu0 %v5033_v51  ;;  %v6250_v51 = vld [vmem:[%s9689_s1 + $0x3ec] sm:$0xf] }
 0x1a3   :  { %4003 = vmatpush.bf16.msrb.mxu3 %v5241_v34  ;;  %v3580_v31 = vpop.f32.mrf.mxu1  ;;  %v6480_v34 = vld [vmem:[%s9689_s1 + $0xb18] sm:$0xf0] }
 0x1a4   :  { %4027 = vmatpush.bf16.msra.mxu1 %v5653_v33  ;;  %v5657_v48 = vor.u32 %v6480_v34, %v5656_v32  ;;  %v3568_v33 = vadd.f32 %v3567_v46, %v7739_v27  ;;  %v5250_v32 = vld [vmem:[%s9689_s1 + $0x7ec] sm:$0xf0]  ;;  %v4429_v34 = vor.u32 %v6148_v24, %v4426_v25  ;;  %v6149_v25 = vld [vmem:[%s9689_s1 + $0xc4] sm:$0xf] }
 0x1a5   :  { %3954 = vmatpush.bf16.msrb.mxu2 %v4621_v58  ;;  %v5865_v58 = vor.u32 %v6506_v43, %v5862_v44  ;;  %v6069_v43 = vor.u32 %v6557_v0, %v6066_v40 }
 0x1a6   :  { %3979 = vmatpush.bf16.msra.mxu0 %v4829_v3  ;;  %v3581_v60 = vadd.f32 %v3580_v31, %v3568_v33  ;;  %v4837_v3 = vor.u32 %v6250_v51, %v4834_v55  ;;  %v5461_v31 = vor.u32 %v6430_v23, %v5460_v22  ;;  %v6328_v55 = vld [vmem:[%s9689_s1 + $0x658] sm:$0xf0] }
 0x1a7   :  { %4004 = vmatpush.bf16.msrb.mxu3 %v5037_v53  ;;  %v3542_v53 = vadd.f32 %v3541_v45, %v7739_v27  ;;  %v3543_v18 = vpop.f32.mrf.mxu2  ;;  %v5253_v45 = vor.u32 %v6353_v30, %v5250_v32 }
 0x1a8   :  { %4028 = vmatpush.bf16.msra.mxu1 %v5449_v9 }
 0x1a9   :  { %3955 = vmatpush.bf16.msrb.mxu2 %v4417_v12  ;;  %v3555_v59 = vadd.f32 %v9380_v2, %v3542_v53  ;;  %v5453_v2 = vor.u32 %v6429_v57, %v5452_v56  ;;  %v5661_v12 = vor.u32 %v6455_v63, %v5658_v62  ;;  %v3593_v14 = vpop.f32.mrf.mxu3 }
 0x1aa   :  { %3980 = vmatpush.bf16.msra.mxu0 %v4625_v19  ;;  %v3569_v19 = vpop.f32.mrf.mxu0  ;;  %v3594_v38 = vadd.f32 %v3593_v14, %v7739_v27  ;;  %v4849_v14 = vor.u32 %v6277_v5, %v4848_v4 }
 0x1ab   :  { %4005 = vmatpush.bf16.msrb.mxu3 %v4833_v8  ;;  %6119 = vmatmul.msk.bf16.vlgmr.msrb.gmra.mxu1 %vm2800_vm0, %v6691_v39  ;;  %v4158_v7 = vmax.f32 %v3555_v59, 0.0  ;;  %v4159_v8 = vmax.f32 %v3581_v60, 0.0  ;;  %v3582_v9 = vpop.f32.mrf.mxu1  ;;  %v6225_v59 = vld [vmem:[%s9689_s1 + $0x320] sm:$0xf0]  ;;  %v5049_v60 = vor.u32 %v6302_v49, %v5046_v50  ;;  %v4644_v19 = vld [vmem:[%s9689_s1 + $0x260] sm:$0xf] }
 0x1ac   :  { %3956 = vmatmul.bf16.vlgmr.msrb.gmra.mxu2 %v6847_v52  ;;  %4029 = vmatpush.bf16.msra.mxu1 %v5245_v26  ;;  %v5044_v26 = vld [vmem:[%s9689_s1 + $0x588] sm:$0xf] }
 0x1ad   :  { %4020 = vmatpush.bf16.msra.mxu2 %v6057_v16  ;;  %v4195_v13 = vpack.c.bf16 %v4159_v8, %v4158_v7  ;;  %v6404_v16 = vld [vmem:[%s9689_s1 + $0x8bc] sm:$0xf]  ;;  %v4432_v7 = vld [vmem:[%s9689_s1 + $0xc0] sm:$0xf]  ;;  %v6174_v8 = vld [vmem:[%s9689_s1 + $0x188] sm:$0xf0] }
 0x1ae   :  { %3981 = vmatpush.bf16.msra.mxu0 %v4421_v36  ;;  %v5457_v29 = vor.u32 %v6404_v16, %v5454_v17  ;;  %v5256_v36 = vld [vmem:[%s9689_s1 + $0x728] sm:$0xf]  ;;  %v4433_v18 = vor.u32 %v6174_v8, %v4432_v7 }
 0x1af   :  { %4006 = vmatpush.bf16.msrb.mxu3 %v4629_v21  ;;  %v5249_v21 = vor.u32 %v6378_v11, %v5248_v10  ;;  %4221 = vst [vmem:[%s9692_s3 + $0x70] sm:$0xff] %v4195_v13  ;;  %v3606_v51 = vpop.f32.mrf.mxu2  ;;  %v6072_v11 = vld [vmem:[%s9689_s1 + $0xd88] sm:$0xf] }
 0x1b0   :  { %4030 = vmatpush.bf16.msra.mxu1 %v5041_v47  ;;  %v3607_v56 = vadd.f32 %v3606_v51, %v3594_v38  ;;  %v4638_v16 = vld [vmem:[%s9689_s1 + $0x324] sm:$0xf0] }
 0x1b1   :  { %4052 = vmatpush.bf16.msrb.mxu2 %v5861_v28  ;;  %3982 = vmatmul.bf16.vlgmr.msra.gmra.mxu0 %v6847_v52  ;;  %v6327_v28 = vld [vmem:[%s9689_s1 + $0x650] sm:$0xf0]  ;;  %v3595_v47 = vpop.f32.mrf.mxu3 }
 0x1b2   :  { %4046 = vmatpush.bf16.msrb.mxu0 %v6061_v42  ;;  %v5045_v35 = vor.u32 %v6327_v28, %v5044_v26  ;;  %v6276_v42 = vld [vmem:[%s9689_s1 + $0x4b8] sm:$0xf0]  ;;  %v3632_v53 = vpop.f32.mrf.mxu0  ;;  %v4434_v26 = vld [vmem:[%s9689_s1 + $0x18c] sm:$0xf0]  ;;  %v4440_v28 = vld [vmem:[%s9689_s1 + $0xc8] sm:$0xf] }
 0x1b3   :  { %4007 = vmatpush.bf16.msrb.mxu3 %v4425_v41  ;;  %v4840_v41 = vld [vmem:[%s9689_s1 + $0x3f0] sm:$0xf]  ;;  %v3619_v44 = vpop.f32.mrf.mxu1  ;;  %v4437_v40 = vor.u32 %v6149_v25, %v4434_v26 }
 0x1b4   :  { %4031 = vmatpush.bf16.msra.mxu1 %v4837_v3  ;;  %v3620_v46 = vadd.f32 %v3619_v44, %v7739_v27  ;;  %v4841_v33 = vor.u32 %v6276_v42, %v4840_v41  ;;  %v4842_v3 = vld [vmem:[%s9689_s1 + $0x4bc] sm:$0xf0] }
 0x1b5   :  { %4053 = vmatpush.bf16.msrb.mxu2 %v5657_v48  ;;  %v5257_v48 = vor.u32 %v6379_v37, %v5256_v36  ;;  %v4845_v10 = vor.u32 %v6251_v1, %v4842_v3 }
 0x1b6   :  { %4008 = vmatmul.bf16.vlgmr.msrb.gmra.mxu3 %v6847_v52  ;;  %4078 = vmatpush.bf16.msra.mxu0 %v5865_v58  ;;  %v3633_v57 = vadd.f32 %v3632_v53, %v3620_v46  ;;  %v4636_v58 = vld [vmem:[%s9689_s1 + $0x258] sm:$0xf] }
 0x1b7   :  { %4072 = vmatpush.bf16.msra.mxu3 %v6065_v54  ;;  %v5052_v54 = vld [vmem:[%s9689_s1 + $0x590] sm:$0xf]  ;;  %v3608_v17 = vpop.f32.mrf.mxu2 }
 0x1b8   :  { %4032 = vmatpush.bf16.msra.mxu1 %v4633_v20  ;;  %v4161_v63 = vmax.f32 %v3633_v57, 0.0  ;;  %v5053_v62 = vor.u32 %v6328_v55, %v5052_v54  ;;  %v6226_v20 = vld [vmem:[%s9689_s1 + $0x328] sm:$0xf0] }
 0x1b9   :  { %4054 = vmatpush.bf16.msrb.mxu2 %v5453_v2  ;;  %v4637_v2 = vor.u32 %v6225_v59, %v4636_v58  ;;  %v3658_v13 = vpop.f32.mrf.mxu3  ;;  %v4645_v24 = vor.u32 %v6226_v20, %v4644_v19 }
 0x1ba   :  { %4079 = vmatpush.bf16.msra.mxu0 %v5661_v12  ;;  %v6583_v12 = vld [vmem:[%s9689_s1 + $0xe50] sm:$0xf0]  ;;  %v3634_v22 = vpop.f32.mrf.mxu0 }
 0x1bb   :  { %4104 = vmatpush.bf16.msrb.mxu3 %v5869_v61  ;;  %v4160_v61 = vmax.f32 %v3607_v56, 0.0  ;;  %v3621_v9 = vpop.f32.mrf.mxu1 }
 0x1bc   :  { %6120 = vmatmul.msk.bf16.vlgmr.msra.gmra.mxu2 %vm2800_vm0, %v6691_v39  ;;  %4033 = vmatpush.bf16.msra.mxu1 %v4429_v34 }
 0x1bd   :  { %4055 = vmatpush.bf16.msrb.mxu2 %v5249_v21  ;;  %v4196_v6 = vpack.c.bf16 %v4161_v63, %v4160_v61  ;;  %v6073_v21 = vor.u32 %v6583_v12, %v6072_v11 }
 0x1be   :  { %4080 = vmatpush.bf16.msra.mxu0 %v5457_v29  ;;  %v6175_v29 = vld [vmem:[%s9689_s1 + $0x190] sm:$0xf0] }
 0x1bf   :  { %4105 = vmatpush.bf16.msrb.mxu3 %v5665_v15  ;;  %4034 = vmatmul.bf16.vlgmr.msra.gmra.mxu1 %v6847_v52  ;;  %4222 = vst [vmem:[%s9692_s3 + $0x78] sm:$0xff] %v4196_v6  ;;  %v6200_v15 = vld [vmem:[%s9689_s1 + $0x25c] sm:$0xf]  ;;  %v4441_v30 = vor.u32 %v6175_v29, %v4440_v28 }
 0x1c0   :  { %4098 = vmatpush.bf16.msrb.mxu1 %v6069_v43  ;;  %v4641_v23 = vor.u32 %v6200_v15, %v4638_v16 }
 0x1c1   :  { %4056 = vmatpush.bf16.msrb.mxu2 %v5045_v35  ;;  %6121 = vmatmul.msk.bf16.vlgmr.msrb.gmra.mxu0 %vm2800_vm0, %v6691_v39 }
 0x1c2   :  { %4081 = vmatpush.bf16.msra.mxu0 %v5253_v45  ;;  %v3671_v34 = vpop.f32.mrf.mxu0 }
 0x1c3   :  { %4106 = vmatpush.bf16.msrb.mxu3 %v5461_v31  ;;  %v3684_v0 = vpop.f32.mrf.mxu1  ;;  %v3660_v31 = vpop.f32.mrf.mxu3  ;;  %v3672_v36 = vadd.f32 %v3671_v34, %v7739_v27 }
 0x1c4   :  { %v3645_v32 = vpop.f32.mrf.mxu2 }
 0x1c5   :  { %4057 = vmatpush.bf16.msrb.mxu2 %v4841_v33  ;;  %v3646_v35 = vadd.f32 %v3645_v32, %v7739_v27  ;;  %v3685_v38 = vadd.f32 %v3684_v0, %v3672_v36 }
 0x1c6   :  { %6122 = vmatmul.msk.bf16.vlgmr.msra.gmra.mxu3 %vm2800_vm0, %v6691_v39  ;;  %4082 = vmatpush.bf16.msra.mxu0 %v5049_v60 }
 0x1c7   :  { %4107 = vmatpush.bf16.msrb.mxu3 %v5257_v48  ;;  %v3659_v37 = vadd.f32 %v3658_v13, %v3646_v35  ;;  %v4163_v42 = vmax.f32 %v3685_v38, 0.0 }
 0x1c9   :  { %4058 = vmatpush.bf16.msrb.mxu2 %v4637_v2  ;;  %v4162_v41 = vmax.f32 %v3659_v37, 0.0 }
 0x1ca   :  { %4083 = vmatpush.bf16.msra.mxu0 %v4845_v10  ;;  %v3673_v47 = vpop.f32.mrf.mxu0 }
 0x1cb   :  { %4108 = vmatpush.bf16.msrb.mxu3 %v5053_v62  ;;  %v3686_v43 = vpop.f32.mrf.mxu1  ;;  %v4197_v44 = vpack.c.bf16 %v4163_v42, %v4162_v41 }
 0x1cc   :  { %v3647_v46 = vpop.f32.mrf.mxu2 }
 0x1cd   :  { %4059 = vmatpush.bf16.msrb.mxu2 %v4433_v18  ;;  %v3697_v45 = vpop.f32.mrf.mxu3  ;;  %4223 = vst [vmem:[%s9692_s3 + $0x80] sm:$0xff] %v4197_v44 }
 0x1ce   :  { %4084 = vmatpush.bf16.msra.mxu0 %v4641_v23  ;;  %v3698_v48 = vadd.f32 %v3697_v45, %v7739_v27 }
 0x1cf   :  { %4109 = vmatpush.bf16.msrb.mxu3 %v4849_v14  ;;  %6123 = vmatmul.msk.bf16.vlgmr.msrb.gmra.mxu1 %vm2800_vm0, %v6691_v39 }
 0x1d0   :  { %4060 = vmatmul.bf16.vlgmr.msrb.gmra.mxu2 %v6847_v52 }
 0x1d1   :  { %4124 = vmatpush.bf16.msra.mxu2 %v6073_v21 }
 0x1d2   :  { %4085 = vmatpush.bf16.msra.mxu0 %v4437_v40 }
 0x1d3   :  { %4110 = vmatpush.bf16.msrb.mxu3 %v4645_v24  ;;  %v3723_v49 = vpop.f32.mrf.mxu1 }
 0x1d4   :  { %v3724_v50 = vadd.f32 %v3723_v49, %v7739_v27  ;;  %v3710_v53 = vpop.f32.mrf.mxu2 }
 0x1d5   :  { %4086 = vmatmul.bf16.vlgmr.msra.gmra.mxu0 %v6847_v52  ;;  %v3699_v51 = vpop.f32.mrf.mxu3  ;;  %v3711_v33 = vadd.f32 %v3710_v53, %v3698_v48 }
 0x1d7   :  { %4111 = vmatpush.bf16.msrb.mxu3 %v4441_v30  ;;  %v4164_v55 = vmax.f32 %v3711_v33, 0.0 }
 0x1da   :  { %4112 = vmatmul.bf16.vlgmr.msrb.gmra.mxu3 %v6847_v52  ;;  %v3736_v52 = vpop.f32.mrf.mxu0 }
 0x1db   :  { %v3737_v54 = vadd.f32 %v3736_v52, %v3724_v50  ;;  %v3725_v58 = vpop.f32.mrf.mxu1 }
 0x1dc   :  { %v3712_v60 = vpop.f32.mrf.mxu2 }
 0x1dd   :  { %v4165_v56 = vmax.f32 %v3737_v54, 0.0  ;;  %v3762_v59 = vpop.f32.mrf.mxu3 }
 0x1df   :  { %v4198_v57 = vpack.c.bf16 %v4165_v56, %v4164_v55 }
 0x1e0   :  { %6124 = vmatmul.msk.bf16.vlgmr.msra.gmra.mxu2 %vm2800_vm0, %v6691_v39 }
 0x1e1   :  { %4224 = vst [vmem:[%s9692_s3 + $0x88] sm:$0xff] %v4198_v57 }
 0x1e2   :  { %v3738_v61 = vpop.f32.mrf.mxu0 }
 0x1e3   :  { %v3788_v63 = vpop.f32.mrf.mxu1 }
 0x1e5   :  { %v3764_v39 = vpop.f32.mrf.mxu3 }
 0x1e7   :  { %v3749_v62 = vpop.f32.mrf.mxu2 }
 0x1e8   :  { %v3750_v3 = vadd.f32 %v3749_v62, %v7739_v27 }
 0x1ea   :  { %v3775_v1 = vpop.f32.mrf.mxu0  ;;  %v3763_v4 = vadd.f32 %v3762_v59, %v3750_v3 }
 0x1eb   :  { %v3776_v2 = vadd.f32 %v3775_v1, %v7739_v27  ;;  %v3790_v8 = vpop.f32.mrf.mxu1 }
 0x1ec   :  { %v4166_v6 = vmax.f32 %v3763_v4, 0.0 }
 0x1ed   :  { %v3789_v5 = vadd.f32 %v3788_v63, %v3776_v2 }
 0x1ef   :  { %v4167_v7 = vmax.f32 %v3789_v5, 0.0  ;;  %v3751_v11 = vpop.f32.mrf.mxu2 }
 0x1f1   :  { %v4199_v9 = vpack.c.bf16 %v4167_v7, %v4166_v6  ;;  %v3801_v10 = vpop.f32.mrf.mxu3 }
 0x1f2   :  { %v3777_v12 = vpop.f32.mrf.mxu0  ;;  %v3802_v13 = vadd.f32 %v3801_v10, %v7739_v27 }
 0x1f3   :  { %4225 = vst [vmem:[%s9692_s3 + $0x90] sm:$0xff] %v4199_v9 }
 0x1f4   :  { %v3827_v14 = vpop.f32.mrf.mxu1 }
 0x1f5   :  { %v3828_v15 = vadd.f32 %v3827_v14, %v7739_v27 }
 0x1f7   :  { %v3814_v17 = vpop.f32.mrf.mxu2 }
 0x1f8   :  { %v3815_v18 = vadd.f32 %v3814_v17, %v3802_v13 }
 0x1f9   :  { %v3803_v16 = vpop.f32.mrf.mxu3 }
 0x1fa   :  { %v3840_v22 = vpop.f32.mrf.mxu0  ;;  %v4168_v20 = vmax.f32 %v3815_v18, 0.0 }
 0x1fb   :  { %v3841_v19 = vadd.f32 %v3840_v22, %v3828_v15 }
 0x1fc   :  { %v3829_v24 = vpop.f32.mrf.mxu1 }
 0x1fd   :  { %v4169_v21 = vmax.f32 %v3841_v19, 0.0 }
 0x1ff   :  { %v4200_v23 = vpack.c.bf16 %v4169_v21, %v4168_v20  ;;  %v3816_v26 = vpop.f32.mrf.mxu2 }
 0x201   :  { %4226 = vst [vmem:[%s9692_s3 + $0x98] sm:$0xff] %v4200_v23  ;;  %v3866_v25 = vpop.f32.mrf.mxu3 }
 0x202   :  { %v3842_v28 = vpop.f32.mrf.mxu0 }
 0x204   :  { %v3892_v29 = vpop.f32.mrf.mxu1 }
 0x209   :  { %v3868_v0 = vpop.f32.mrf.mxu3 }
 0x20a   :  { %v3879_v31 = vpop.f32.mrf.mxu0 }
 0x20b   :  { %v3853_v40 = vpop.f32.mrf.mxu2  ;;  %v3880_v32 = vadd.f32 %v3879_v31, %v7739_v27 }
 0x20c   :  { %v3854_v30 = vadd.f32 %v3853_v40, %v7739_v27  ;;  %v3894_v38 = vpop.f32.mrf.mxu1 }
 0x20d   :  { %v3893_v35 = vadd.f32 %v3892_v29, %v3880_v32 }
 0x20e   :  { %v3867_v34 = vadd.f32 %v3866_v25, %v3854_v30 }
 0x20f   :  { %v4171_v37 = vmax.f32 %v3893_v35, 0.0 }
 0x210   :  { %v4170_v36 = vmax.f32 %v3867_v34, 0.0 }
 0x212   :  { %v4201_v41 = vpack.c.bf16 %v4171_v37, %v4170_v36  ;;  %v3881_v44 = vpop.f32.mrf.mxu0 }
 0x213   :  { %v3855_v43 = vpop.f32.mrf.mxu2 }
 0x214   :  { %4227 = vst [vmem:[%s9692_s3 + $0xa0] sm:$0xff] %v4201_v41 }
 0x215   :  { %v3905_v42 = vpop.f32.mrf.mxu3 }
 0x216   :  { %v3906_v45 = vadd.f32 %v3905_v42, %v7739_v27 }
 0x218   :  { %v3931_v46 = vpop.f32.mrf.mxu1 }
 0x219   :  { %v3932_v47 = vadd.f32 %v3931_v46, %v7739_v27 }
 0x21a   :  { %v3944_v50 = vpop.f32.mrf.mxu0 }
 0x21b   :  { %v3918_v49 = vpop.f32.mrf.mxu2  ;;  %v3945_v53 = vadd.f32 %v3944_v50, %v3932_v47 }
 0x21c   :  { %v3919_v51 = vadd.f32 %v3918_v49, %v3906_v45 }
 0x21d   :  { %v3907_v48 = vpop.f32.mrf.mxu3  ;;  %v4173_v33 = vmax.f32 %v3945_v53, 0.0 }
 0x21e   :  { %v4172_v52 = vmax.f32 %v3919_v51, 0.0 }
 0x220   :  { %v4202_v54 = vpack.c.bf16 %v4173_v33, %v4172_v52  ;;  %v3933_v55 = vpop.f32.mrf.mxu1 }
 0x222   :  { %4228 = vst [vmem:[%s9692_s3 + $0xa8] sm:$0xff] %v4202_v54  ;;  %v3946_v58 = vpop.f32.mrf.mxu0 }
 0x223   :  { %v3920_v57 = vpop.f32.mrf.mxu2 }
 0x225   :  { %v3970_v56 = vpop.f32.mrf.mxu3 }
 0x228   :  { %v3996_v59 = vpop.f32.mrf.mxu1 }
 0x22d   :  { %v3972_v60 = vpop.f32.mrf.mxu3 }
 0x22e   :  { %v3983_v63 = vpop.f32.mrf.mxu0 }
 0x22f   :  { %v3957_v61 = vpop.f32.mrf.mxu2  ;;  %v3984_v62 = vadd.f32 %v3983_v63, %v7739_v27 }
 0x230   :  { %v3958_v39 = vadd.f32 %v3957_v61, %v7739_v27  ;;  %v3998_v5 = vpop.f32.mrf.mxu1 }
 0x231   :  { %v3997_v3 = vadd.f32 %v3996_v59, %v3984_v62 }
 0x232   :  { %v3971_v1 = vadd.f32 %v3970_v56, %v3958_v39 }
 0x233   :  { %v4175_v4 = vmax.f32 %v3997_v3, 0.0 }
 0x234   :  { %v4174_v2 = vmax.f32 %v3971_v1, 0.0 }
 0x236   :  { %v4203_v6 = vpack.c.bf16 %v4175_v4, %v4174_v2  ;;  %v3985_v9 = vpop.f32.mrf.mxu0 }
 0x237   :  { %v3959_v8 = vpop.f32.mrf.mxu2 }
 0x238   :  { %4229 = vst [vmem:[%s9692_s3 + $0xb0] sm:$0xff] %v4203_v6 }
 0x239   :  { %v4009_v7 = vpop.f32.mrf.mxu3 }
 0x23a   :  { %v4010_v10 = vadd.f32 %v4009_v7, %v7739_v27 }
 0x23c   :  { %v4035_v11 = vpop.f32.mrf.mxu1 }
 0x23d   :  { %v4036_v12 = vadd.f32 %v4035_v11, %v7739_v27 }
 0x23e   :  { %v4048_v15 = vpop.f32.mrf.mxu0 }
 0x23f   :  { %v4022_v14 = vpop.f32.mrf.mxu2  ;;  %v4049_v17 = vadd.f32 %v4048_v15, %v4036_v12 }
 0x240   :  { %v4023_v16 = vadd.f32 %v4022_v14, %v4010_v10 }
 0x241   :  { %v4011_v13 = vpop.f32.mrf.mxu3  ;;  %v4177_v18 = vmax.f32 %v4049_v17, 0.0 }
 0x242   :  { %v4176_v22 = vmax.f32 %v4023_v16, 0.0 }
 0x244   :  { %v4204_v19 = vpack.c.bf16 %v4177_v18, %v4176_v22  ;;  %v4037_v20 = vpop.f32.mrf.mxu1 }
 0x246   :  { %4230 = vst [vmem:[%s9692_s3 + $0xb8] sm:$0xff] %v4204_v19  ;;  %v4050_v24 = vpop.f32.mrf.mxu0 }
 0x247   :  { %v4024_v23 = vpop.f32.mrf.mxu2 }
 0x249   :  { %v4074_v21 = vpop.f32.mrf.mxu3 }
 0x24c   :  { %v4100_v25 = vpop.f32.mrf.mxu1 }
 0x251   :  { %v4076_v26 = vpop.f32.mrf.mxu3 }
 0x252   :  { %v4087_v29 = vpop.f32.mrf.mxu0 }
 0x253   :  { %v4061_v28 = vpop.f32.mrf.mxu2  ;;  %v4088_v40 = vadd.f32 %v4087_v29, %v7739_v27 }
 0x254   :  { %v4062_v0 = vadd.f32 %v4061_v28, %v7739_v27  ;;  %v4102_v35 = vpop.f32.mrf.mxu1 }
 0x255   :  { %v4101_v30 = vadd.f32 %v4100_v25, %v4088_v40 }
 0x256   :  { %v4075_v31 = vadd.f32 %v4074_v21, %v4062_v0 }
 0x257   :  { %v4179_v34 = vmax.f32 %v4101_v30, 0.0 }
 0x258   :  { %v4178_v32 = vmax.f32 %v4075_v31, 0.0 }
 0x25a   :  { %v4205_v36 = vpack.c.bf16 %v4179_v34, %v4178_v32  ;;  %v4089_v41 = vpop.f32.mrf.mxu0 }
 0x25b   :  { %v4063_v38 = vpop.f32.mrf.mxu2 }
 0x25c   :  { %4231 = vst [vmem:[%s9692_s3 + $0xc0] sm:$0xff] %v4205_v36 }
 0x25d   :  { %v4113_v37 = vpop.f32.mrf.mxu3 }
 0x25e   :  { %v4114_v42 = vadd.f32 %v4113_v37, %v7739_v27 }
 0x263   :  { %v4126_v44 = vpop.f32.mrf.mxu2 }
 0x264   :  { %v4127_v45 = vadd.f32 %v4126_v44, %v4114_v42 }
 0x265   :  { %v4115_v43 = vpop.f32.mrf.mxu3 }
 0x266   :  { %v4180_v46 = vmax.f32 %v4127_v45, 0.0 }
 0x268   :  { %v4206_v47 = vpack.c.bf16 %v4180_v46, %v4180_v46 }
 0x26a   :  { %4233 = vst.msk [vmem:[%s9692_s3 + $0xc8] sm:$0xf] %vm4232_vm1, %v4206_v47 }
 0x26b   :  { %v4128_v48 = vpop.f32.mrf.mxu2 }

// kernel: _lambda_.5
= control target key start
LH: loop header
LB: loop body
LE: loop exit
PB: predicated region body
PF: predicated region fallthrough
CT: control target
= control target key end

     0   :  { %vm386_vm0 = vcmask 1043456   ;;  %v902_v50 = vmov 0   ;;  %vm382_vm1 = vcmask 588800   ;;  %vm621_vm2 = vcmask 683008   ;;  %s1339_s1 = inlined_call_operand.vmem [shape: bf16[72,1620], index: 1, kind: input, shape index: {}]   ;;  %s1340_s2 = inlined_call_operand.vmem [shape: f32[8,1], index: 2, kind: input, shape index: {}]   ;;  %s1341_s0 = inlined_call_operand.vmem [shape: bf16[8,72], index: 0, kind: input, shape index: {}]   ;;  %s1342_s3 = inlined_call_operand.vmem [shape: bf16[8,1620], index: 3, kind: output, shape index: {}]  }
   0x1   :  { %v72_v0 = vld [vmem:[%s1339_s1 + $0x1a0] sm:$0xff]  ;;  %v73_v1 = vld [vmem:[%s1339_s1 + $0x1a8] sm:$0xff]  ;;  %v785_v6 = vld [vmem:[%s1339_s1 + $0x138] sm:$0xf]  ;;  %901 = vset.pattern.permute.xlu0 %v902_v50 }
   0x2   :  { %v252_v2 = vunpack.c.l.b16 %v72_v0  ;;  %v253_v3 = vunpack.c.h.b16 %v72_v0  ;;  %v254_v4 = vunpack.c.l.b16 %v73_v1  ;;  %v255_v5 = vunpack.c.h.b16 %v73_v1  ;;  %v893_v7 = vld [vmem:[%s1339_s1 + $0x168] sm:$0xf0]  ;;  %v887_v12 = vld [vmem:[%s1339_s1 + $0x13c] sm:$0xf]  ;;  %v787_v13 = vld [vmem:[%s1339_s1 + $0x16c] sm:$0xf0] }
   0x3   :  { %v793_v14 = vld [vmem:[%s1339_s1 + $0x140] sm:$0xf]  ;;  %v894_v15 = vld [vmem:[%s1339_s1 + $0x170] sm:$0xf0]  ;;  %v888_v16 = vld [vmem:[%s1339_s1 + $0x144] sm:$0xf]  ;;  %v786_v22 = vor.u32 %v893_v7, %v785_v6  ;;  %v790_v23 = vor.u32 %v887_v12, %v787_v13 }
   0x4   :  { %v317_v8 = vpack.c.b16 %v252_v2, %v252_v2  ;;  %v318_v9 = vpack.c.b16 %v253_v3, %v253_v3  ;;  %v319_v10 = vpack.c.b16 %v254_v4, %v254_v4  ;;  %v320_v11 = vpack.c.b16 %v255_v5, %v255_v5  ;;  %v795_v17 = vld [vmem:[%s1339_s1 + $0x174] sm:$0xf0]  ;;  %v733_v24 = vld [vmem:[%s1339_s1 + $0xd0] sm:$0xf]  ;;  %v880_v25 = vld [vmem:[%s1339_s1 + $0x100] sm:$0xf0] }
   0x5   :  { %v794_v26 = vor.u32 %v894_v15, %v793_v14  ;;  %v798_v27 = vor.u32 %v888_v16, %v795_v17  ;;  %v874_v28 = vld [vmem:[%s1339_s1 + $0xd4] sm:$0xf]  ;;  %v735_v29 = vld [vmem:[%s1339_s1 + $0x104] sm:$0xf0]  ;;  %v741_v30 = vld [vmem:[%s1339_s1 + $0xd8] sm:$0xf]  ;;  %v734_v35 = vor.u32 %v880_v25, %v733_v24 }
   0x6   :  { %v388_v18 = vsel %vm386_vm0, %v317_v8, 0  ;;  %v391_v19 = vsel %vm386_vm0, %v318_v9, 0  ;;  %v394_v20 = vsel %vm386_vm0, %v319_v10, 0  ;;  %v397_v21 = vsel %vm386_vm0, %v320_v11, 0  ;;  %v881_v31 = vld [vmem:[%s1339_s1 + $0x108] sm:$0xf0] }
   0x7   :  { %429 = vmatpush.bf16.msra.mxu0 %v388_v18  ;;  %442 = vmatpush.bf16.msra.mxu1 %v391_v19  ;;  %v875_v32 = vld [vmem:[%s1339_s1 + $0xdc] sm:$0xf]  ;;  %v743_v33 = vld [vmem:[%s1339_s1 + $0x10c] sm:$0xf0]  ;;  %v681_v34 = vld [vmem:[%s1339_s1 + $0x68] sm:$0xf]  ;;  %v738_v36 = vor.u32 %v874_v28, %v735_v29  ;;  %v742_v40 = vor.u32 %v881_v31, %v741_v30 }
   0x8   :  { %455 = vmatpush.bf16.msra.mxu2 %v394_v20  ;;  %468 = vmatpush.bf16.msra.mxu3 %v397_v21  ;;  %v867_v37 = vld [vmem:[%s1339_s1 + $0x98] sm:$0xf0]  ;;  %v861_v38 = vld [vmem:[%s1339_s1 + $0x6c] sm:$0xf]  ;;  %v74_v39 = vld [vmem:[%s1339_s1 + $0x1b0] sm:$0xff]  ;;  %v746_v41 = vor.u32 %v875_v32, %v743_v33 }
   0x9   :  { %v683_v42 = vld [vmem:[%s1339_s1 + $0x9c] sm:$0xf0]  ;;  %v689_v43 = vld [vmem:[%s1339_s1 + $0x70] sm:$0xf]  ;;  %v868_v44 = vld [vmem:[%s1339_s1 + $0xa0] sm:$0xf0]  ;;  %v256_v47 = vunpack.c.l.b16 %v74_v39  ;;  %v257_v48 = vunpack.c.h.b16 %v74_v39  ;;  %v682_v51 = vor.u32 %v867_v37, %v681_v34 }
   0xa   :  { %v862_v45 = vld [vmem:[%s1339_s1 + $0x74] sm:$0xf]  ;;  %v691_v46 = vld [vmem:[%s1339_s1 + $0xa4] sm:$0xf0]  ;;  %v75_v49 = vld [vmem:[%s1339_s1 + $0x1b8] sm:$0xff]  ;;  %v686_v52 = vor.u32 %v861_v38, %v683_v42  ;;  %v690_v55 = vor.u32 %v868_v44, %v689_v43 }
   0xb   :  { %430 = vmatpush.bf16.msra.mxu0 %v786_v22  ;;  %443 = vmatpush.bf16.msra.mxu1 %v790_v23  ;;  %v629_v53 = vld [vmem:[%s1339_s1] sm:$0xf]  ;;  %v258_v54 = vunpack.c.l.b16 %v75_v49  ;;  %v694_v56 = vor.u32 %v862_v45, %v691_v46  ;;  %v854_v57 = vld [vmem:[%s1339_s1 + $0x30] sm:$0xf0]  ;;  %v848_v58 = vld [vmem:[%s1339_s1 + $0x4] sm:$0xf]  ;;  %v259_v60 = vunpack.c.h.b16 %v75_v49  ;;  %v321_v61 = vpack.c.b16 %v256_v47, %v256_v47 }
   0xc   :  { %456 = vmatpush.bf16.msra.mxu2 %v794_v26  ;;  %469 = vmatpush.bf16.msra.mxu3 %v798_v27  ;;  %v631_v59 = vld [vmem:[%s1339_s1 + $0x34] sm:$0xf0]  ;;  %v322_v62 = vpack.c.b16 %v257_v48, %v257_v48  ;;  %v637_v63 = vld [vmem:[%s1339_s1 + $0x8] sm:$0xf]  ;;  %v855_v0 = vld [vmem:[%s1339_s1 + $0x38] sm:$0xf0]  ;;  %v630_v4 = vor.u32 %v854_v57, %v629_v53 }
   0xd   :  { %v849_v1 = vld [vmem:[%s1339_s1 + $0xc] sm:$0xf]  ;;  %v639_v2 = vld [vmem:[%s1339_s1 + $0x3c] sm:$0xf0]  ;;  %v634_v5 = vor.u32 %v848_v58, %v631_v59  ;;  %v323_v6 = vpack.c.b16 %v258_v54, %v258_v54  ;;  %v324_v7 = vpack.c.b16 %v259_v60, %v259_v60  ;;  %v801_v8 = vld [vmem:[%s1339_s1 + $0x148] sm:$0xf]  ;;  %v638_v12 = vor.u32 %v855_v0, %v637_v63 }
   0xe   :  { %v79_v3 = vld [vmem:[%s1340_s2] sm:$0xff]  ;;  %v895_v9 = vld [vmem:[%s1339_s1 + $0x178] sm:$0xf0]  ;;  %v400_v10 = vsel %vm386_vm0, %v321_v61, 0  ;;  %v403_v11 = vsel %vm386_vm0, %v322_v62, 0  ;;  %v642_v13 = vor.u32 %v849_v1, %v639_v2  ;;  %v77_v45 = vld [vmem:[%s1339_s1 + $0x1c8] sm:$0xff] }
   0xf   :  { %431 = vmatpush.bf16.msra.mxu0 %v734_v35  ;;  %444 = vmatpush.bf16.msra.mxu1 %v738_v36  ;;  %v889_v14 = vld [vmem:[%s1339_s1 + $0x14c] sm:$0xf]  ;;  %v803_v15 = vld [vmem:[%s1339_s1 + $0x17c] sm:$0xf0]  ;;  %v809_v17 = vld [vmem:[%s1339_s1 + $0x150] sm:$0xf]  ;;  %v802_v22 = vor.u32 %v895_v9, %v801_v8  ;;  %v262_v57 = vunpack.c.l.b16 %v77_v45  ;;  %v263_v58 = vunpack.c.h.b16 %v77_v45 }
  0x10   :  { %457 = vmatpush.bf16.msra.mxu2 %v742_v40  ;;  %470 = vmatpush.bf16.msra.mxu3 %v746_v41  ;;  %v1055_v16 = vld [vmem:[%s1341_s0] sm:$0xf]  ;;  %v406_v18 = vsel %vm386_vm0, %v323_v6, 0  ;;  %v896_v19 = vld [vmem:[%s1339_s1 + $0x180] sm:$0xf0]  ;;  %v409_v21 = vsel %vm386_vm0, %v324_v7, 0  ;;  %v806_v23 = vor.u32 %v889_v14, %v803_v15 }
  0x11   :  { %82 = vperm.xlu0 %901, %v79_v3   ;;  %v890_v20 = vld [vmem:[%s1339_s1 + $0x154] sm:$0xf]  ;;  %v811_v24 = vld [vmem:[%s1339_s1 + $0x184] sm:$0xf0]  ;;  %v749_v25 = vld [vmem:[%s1339_s1 + $0xe0] sm:$0xf]  ;;  %v810_v29 = vor.u32 %v896_v19, %v809_v17  ;;  %v328_v6 = vpack.c.b16 %v263_v58, %v263_v58 }
  0x12   :  { %v882_v26 = vld [vmem:[%s1339_s1 + $0x110] sm:$0xf0]  ;;  %v876_v27 = vld [vmem:[%s1339_s1 + $0xe4] sm:$0xf]  ;;  %v751_v28 = vld [vmem:[%s1339_s1 + $0x114] sm:$0xf0]  ;;  %v814_v30 = vor.u32 %v890_v20, %v811_v24 }
  0x13   :  { %432 = vmatpush.bf16.msra.mxu0 %v682_v51  ;;  %445 = vmatpush.bf16.msra.mxu1 %v686_v52  ;;  %v757_v31 = vld [vmem:[%s1339_s1 + $0xe8] sm:$0xf]  ;;  %v883_v32 = vld [vmem:[%s1339_s1 + $0x118] sm:$0xf0]  ;;  %v76_v33 = vld [vmem:[%s1339_s1 + $0x1c0] sm:$0xff]  ;;  %v750_v34 = vor.u32 %v882_v26, %v749_v25  ;;  %v754_v35 = vor.u32 %v876_v27, %v751_v28  ;;  %v421_v19 = vsel %vm386_vm0, %v328_v6, 0 }
  0x14   :  { %458 = vmatpush.bf16.msra.mxu2 %v690_v55  ;;  %471 = vmatpush.bf16.msra.mxu3 %v694_v56  ;;  %v877_v36 = vld [vmem:[%s1339_s1 + $0xec] sm:$0xf]  ;;  %v759_v37 = vld [vmem:[%s1339_s1 + $0x11c] sm:$0xf0]  ;;  %v697_v38 = vld [vmem:[%s1339_s1 + $0x78] sm:$0xf]  ;;  %v758_v42 = vor.u32 %v883_v32, %v757_v31  ;;  %v260_v43 = vunpack.c.l.b16 %v76_v33  ;;  %v261_v44 = vunpack.c.h.b16 %v76_v33 }
  0x15   :  { %v869_v39 = vld [vmem:[%s1339_s1 + $0xa8] sm:$0xf0]  ;;  %v863_v40 = vld [vmem:[%s1339_s1 + $0x7c] sm:$0xf]  ;;  %v699_v41 = vld [vmem:[%s1339_s1 + $0xac] sm:$0xf0]  ;;  %v762_v46 = vor.u32 %v877_v36, %v759_v37 }
  0x16   :  { %v705_v47 = vld [vmem:[%s1339_s1 + $0x80] sm:$0xf]  ;;  %v870_v48 = vld [vmem:[%s1339_s1 + $0xb0] sm:$0xf0]  ;;  %v698_v49 = vor.u32 %v869_v39, %v697_v38  ;;  %v702_v50 = vor.u32 %v863_v40, %v699_v41  ;;  %v864_v51 = vld [vmem:[%s1339_s1 + $0x84] sm:$0xf]  ;;  %v325_v60 = vpack.c.b16 %v260_v43, %v260_v43  ;;  %v326_v61 = vpack.c.b16 %v261_v44, %v261_v44 }
  0x17   :  { %433 = vmatpush.bf16.msra.mxu0 %v630_v4  ;;  %446 = vmatpush.bf16.msra.mxu1 %v634_v5  ;;  %v707_v52 = vld [vmem:[%s1339_s1 + $0xb4] sm:$0xf0]  ;;  %v645_v53 = vld [vmem:[%s1339_s1 + $0x10] sm:$0xf]  ;;  %v856_v54 = vld [vmem:[%s1339_s1 + $0x40] sm:$0xf0]  ;;  %v706_v59 = vor.u32 %v870_v48, %v705_v47  ;;  %v327_v5 = vpack.c.b16 %v262_v57, %v262_v57 }
  0x18   :  { %459 = vmatpush.bf16.msra.mxu2 %v638_v12  ;;  %472 = vmatpush.bf16.msra.mxu3 %v642_v13  ;;  %v850_v55 = vld [vmem:[%s1339_s1 + $0x14] sm:$0xf]  ;;  %v647_v56 = vld [vmem:[%s1339_s1 + $0x44] sm:$0xf0]  ;;  %v710_v62 = vor.u32 %v864_v51, %v707_v52  ;;  %v653_v63 = vld [vmem:[%s1339_s1 + $0x18] sm:$0xf]  ;;  %v646_v1 = vor.u32 %v856_v54, %v645_v53 }
  0x19   :  { %v857_v0 = vld [vmem:[%s1339_s1 + $0x48] sm:$0xf0]  ;;  %v650_v2 = vor.u32 %v850_v55, %v647_v56  ;;  %v851_v3 = vld [vmem:[%s1339_s1 + $0x1c] sm:$0xf]  ;;  %v655_v4 = vld [vmem:[%s1339_s1 + $0x4c] sm:$0xf0] }
  0x1a   :  { %835 = vmatmul.msk.bf16.vlgmr.msra.gmra.mxu0 %vm382_vm1, %v1055_v16  ;;  %836 = vmatmul.msk.bf16.vlgmr.msra.gmra.mxu1 %vm382_vm1, %v1055_v16  ;;  %v412_v7 = vsel %vm386_vm0, %v325_v60, 0  ;;  %v415_v8 = vsel %vm386_vm0, %v326_v61, 0  ;;  %v654_v9 = vor.u32 %v857_v0, %v653_v63  ;;  %v658_v12 = vor.u32 %v851_v3, %v655_v4  ;;  %v891_v13 = vld [vmem:[%s1339_s1 + $0x15c] sm:$0xf]  ;;  %v819_v14 = vld [vmem:[%s1339_s1 + $0x18c] sm:$0xf0] }
  0x1b   :  { %481 = vmatpush.bf16.msrb.mxu0 %v400_v10  ;;  %494 = vmatpush.bf16.msrb.mxu1 %v403_v11  ;;  %v817_v10 = vld [vmem:[%s1339_s1 + $0x158] sm:$0xf]  ;;  %v897_v11 = vld [vmem:[%s1339_s1 + $0x188] sm:$0xf0]  ;;  %v825_v15 = vld [vmem:[%s1339_s1 + $0x160] sm:$0xf] }
  0x1c   :  { %507 = vmatpush.bf16.msrb.mxu2 %v406_v18  ;;  %520 = vmatpush.bf16.msrb.mxu3 %v409_v21  ;;  %v898_v17 = vld [vmem:[%s1339_s1 + $0x190] sm:$0xf0]  ;;  %v418_v18 = vsel %vm386_vm0, %v327_v5, 0  ;;  %v818_v20 = vor.u32 %v897_v11, %v817_v10  ;;  %v892_v21 = vld [vmem:[%s1339_s1 + $0x164] sm:$0xf] }
  0x1d   :  { %837 = vmatmul.msk.bf16.vlgmr.msra.gmra.mxu2 %vm382_vm1, %v1055_v16  ;;  %838 = vmatmul.msk.bf16.vlgmr.msra.gmra.mxu3 %vm382_vm1, %v1055_v16  ;;  %v765_v24 = vld [vmem:[%s1339_s1 + $0xf0] sm:$0xf]  ;;  %v884_v25 = vld [vmem:[%s1339_s1 + $0x120] sm:$0xf0]  ;;  %v878_v26 = vld [vmem:[%s1339_s1 + $0xf4] sm:$0xf]  ;;  %v826_v28 = vor.u32 %v898_v17, %v825_v15 }
  0x1e   :  { %v767_v27 = vld [vmem:[%s1339_s1 + $0x124] sm:$0xf0]  ;;  %v78_v31 = vld [vmem:[%s1339_s1 + $0x1d0] sm:$0xf]  ;;  %v766_v32 = vor.u32 %v884_v25, %v765_v24  ;;  %v885_v33 = vld [vmem:[%s1339_s1 + $0x128] sm:$0xf0] }
  0x1f   :  { %482 = vmatpush.bf16.msrb.mxu0 %v802_v22  ;;  %495 = vmatpush.bf16.msrb.mxu1 %v806_v23  ;;  %v827_v22 = vld [vmem:[%s1339_s1 + $0x194] sm:$0xf0]  ;;  %v822_v23 = vor.u32 %v891_v13, %v819_v14  ;;  %v770_v36 = vor.u32 %v878_v26, %v767_v27  ;;  %v713_v37 = vld [vmem:[%s1339_s1 + $0x88] sm:$0xf]  ;;  %v871_v38 = vld [vmem:[%s1339_s1 + $0xb8] sm:$0xf0]  ;;  %v264_v41 = vunpack.c.l.b16 %v78_v31 }
  0x20   :  { %508 = vmatpush.bf16.msrb.mxu2 %v810_v29  ;;  %521 = vmatpush.bf16.msrb.mxu3 %v814_v30  ;;  %v830_v29 = vor.u32 %v892_v21, %v827_v22  ;;  %v773_v30 = vld [vmem:[%s1339_s1 + $0xf8] sm:$0xf]  ;;  %v865_v39 = vld [vmem:[%s1339_s1 + $0x8c] sm:$0xf]  ;;  %v715_v40 = vld [vmem:[%s1339_s1 + $0xbc] sm:$0xf0]  ;;  %v714_v45 = vor.u32 %v871_v38, %v713_v37 }
  0x21   :  { %v721_v44 = vld [vmem:[%s1339_s1 + $0x90] sm:$0xf]  ;;  %v866_v47 = vld [vmem:[%s1339_s1 + $0x94] sm:$0xf]  ;;  %v723_v48 = vld [vmem:[%s1339_s1 + $0xc4] sm:$0xf0]  ;;  %v329_v54 = vpack.c.b16 %v264_v41, %v264_v41 }
  0x22   :  { %v858_v51 = vld [vmem:[%s1339_s1 + $0x50] sm:$0xf0]  ;;  %v852_v52 = vld [vmem:[%s1339_s1 + $0x24] sm:$0xf]  ;;  %v663_v53 = vld [vmem:[%s1339_s1 + $0x54] sm:$0xf0]  ;;  %v726_v56 = vor.u32 %v866_v47, %v723_v48 }
  0x23   :  { %483 = vmatpush.bf16.msrb.mxu0 %v750_v34  ;;  %496 = vmatpush.bf16.msrb.mxu1 %v754_v35  ;;  %v879_v34 = vld [vmem:[%s1339_s1 + $0xfc] sm:$0xf]  ;;  %v775_v35 = vld [vmem:[%s1339_s1 + $0x12c] sm:$0xf0]  ;;  %v669_v58 = vld [vmem:[%s1339_s1 + $0x28] sm:$0xf]  ;;  %v666_v60 = vor.u32 %v852_v52, %v663_v53 }
  0x24   :  { %509 = vmatpush.bf16.msrb.mxu2 %v758_v42  ;;  %522 = vmatpush.bf16.msrb.mxu3 %v762_v46  ;;  %v774_v42 = vor.u32 %v885_v33, %v773_v30  ;;  %v778_v43 = vor.u32 %v879_v34, %v775_v35  ;;  %v872_v46 = vld [vmem:[%s1339_s1 + $0xc0] sm:$0xf0]  ;;  %v853_v61 = vld [vmem:[%s1339_s1 + $0x2c] sm:$0xf]  ;;  %v424_v63 = vsel %vm386_vm0, %v329_v54, 0 }
  0x25   :  { %v722_v55 = vor.u32 %v872_v46, %v721_v44  ;;  %v833_v0 = vld [vmem:[%s1339_s1 + $0x168] sm:$0xf]  ;;  %v781_v5 = vld [vmem:[%s1339_s1 + $0x100] sm:$0xf]  ;;  %v886_v6 = vld [vmem:[%s1339_s1 + $0x130] sm:$0xf0] }
  0x26   :  { %v677_v11 = vld [vmem:[%s1339_s1 + $0x30] sm:$0xf] }
  0x27   :  { %484 = vmatpush.bf16.msrb.mxu0 %v698_v49  ;;  %497 = vmatpush.bf16.msrb.mxu1 %v702_v50  ;;  %v718_v49 = vor.u32 %v865_v39, %v715_v40  ;;  %v661_v50 = vld [vmem:[%s1339_s1 + $0x20] sm:$0xf] }
  0x28   :  { %510 = vmatpush.bf16.msrb.mxu2 %v706_v59  ;;  %523 = vmatpush.bf16.msrb.mxu3 %v710_v62  ;;  %v662_v57 = vor.u32 %v858_v51, %v661_v50  ;;  %v859_v59 = vld [vmem:[%s1339_s1 + $0x58] sm:$0xf0]  ;;  %v671_v62 = vld [vmem:[%s1339_s1 + $0x5c] sm:$0xf0] }
  0x29   :  { %v674_v3 = vor.u32 %v853_v61, %v671_v62 }
  0x2b   :  { %485 = vmatpush.bf16.msrb.mxu0 %v646_v1  ;;  %498 = vmatpush.bf16.msrb.mxu1 %v650_v2  ;;  %v899_v1 = vld [vmem:[%s1339_s1 + $0x198] sm:$0xf0]  ;;  %v670_v2 = vor.u32 %v859_v59, %v669_v58 }
  0x2c   :  { %511 = vmatpush.bf16.msrb.mxu2 %v654_v9  ;;  %524 = vmatpush.bf16.msrb.mxu3 %v658_v12  ;;  %v834_v4 = vor.u32 %v899_v1, %v833_v0  ;;  %v873_v9 = vld [vmem:[%s1339_s1 + $0xc8] sm:$0xf0]  ;;  %v860_v12 = vld [vmem:[%s1339_s1 + $0x60] sm:$0xf0] }
  0x2d   :  { %v678_v13 = vor.u32 %v860_v12, %v677_v11 }
  0x2e   :  { %839 = vmatmul.msk.bf16.vlgmr.msrb.gmra.mxu0 %vm382_vm1, %v1055_v16  ;;  %840 = vmatmul.msk.bf16.vlgmr.msrb.gmra.mxu1 %vm382_vm1, %v1055_v16 }
  0x2f   :  { %533 = vmatpush.bf16.msra.mxu0 %v412_v7  ;;  %546 = vmatpush.bf16.msra.mxu1 %v415_v8  ;;  %v782_v7 = vor.u32 %v886_v6, %v781_v5  ;;  %v729_v8 = vld [vmem:[%s1339_s1 + $0x98] sm:$0xf] }
  0x30   :  { %559 = vmatpush.bf16.msra.mxu2 %v418_v18  ;;  %572 = vmatpush.bf16.msra.mxu3 %v421_v19  ;;  %v730_v10 = vor.u32 %v873_v9, %v729_v8 }
  0x31   :  { %841 = vmatmul.msk.bf16.vlgmr.msrb.gmra.mxu2 %vm382_vm1, %v1055_v16  ;;  %842 = vmatmul.msk.bf16.vlgmr.msrb.gmra.mxu3 %vm382_vm1, %v1055_v16 }
  0x33   :  { %534 = vmatpush.bf16.msra.mxu0 %v818_v20  ;;  %547 = vmatpush.bf16.msra.mxu1 %v822_v23 }
  0x34   :  { %560 = vmatpush.bf16.msra.mxu2 %v826_v28  ;;  %573 = vmatpush.bf16.msra.mxu3 %v830_v29 }
  0x37   :  { %535 = vmatpush.bf16.msra.mxu0 %v766_v32  ;;  %548 = vmatpush.bf16.msra.mxu1 %v770_v36 }
  0x38   :  { %561 = vmatpush.bf16.msra.mxu2 %v774_v42  ;;  %574 = vmatpush.bf16.msra.mxu3 %v778_v43 }
  0x3b   :  { %536 = vmatpush.bf16.msra.mxu0 %v714_v45  ;;  %549 = vmatpush.bf16.msra.mxu1 %v718_v49 }
  0x3c   :  { %562 = vmatpush.bf16.msra.mxu2 %v722_v55  ;;  %575 = vmatpush.bf16.msra.mxu3 %v726_v56 }
  0x3f   :  { %537 = vmatpush.bf16.msra.mxu0 %v662_v57  ;;  %550 = vmatpush.bf16.msra.mxu1 %v666_v60 }
  0x40   :  { %563 = vmatpush.bf16.msra.mxu2 %v670_v2  ;;  %576 = vmatpush.bf16.msra.mxu3 %v674_v3 }
  0x42   :  { %843 = vmatmul.msk.bf16.vlgmr.msra.gmra.mxu0 %vm382_vm1, %v1055_v16  ;;  %844 = vmatmul.msk.bf16.vlgmr.msra.gmra.mxu1 %vm382_vm1, %v1055_v16 }
  0x43   :  { %585 = vmatpush.bf16.msrb.mxu0 %v424_v63  ;;  %845 = vmatmul.msk.bf16.vlgmr.msra.gmra.mxu2 %vm382_vm1, %v1055_v16 }
  0x44   :  { %846 = vmatmul.msk.bf16.vlgmr.msra.gmra.mxu3 %vm382_vm1, %v1055_v16 }
  0x47   :  { %586 = vmatpush.bf16.msrb.mxu0 %v834_v4 }
  0x4b   :  { %587 = vmatpush.bf16.msrb.mxu0 %v782_v7 }
  0x4f   :  { %588 = vmatpush.bf16.msrb.mxu0 %v730_v10 }
  0x53   :  { %589 = vmatpush.bf16.msrb.mxu0 %v678_v13 }
  0x56   :  { %847 = vmatmul.msk.bf16.vlgmr.msrb.gmra.mxu0 %vm382_vm1, %v1055_v16 }
  0x83   :  { %v1303_v14 = vpop.permute.xlu0 %82 }
  0x97   :  { %v435_v15 = vpop.f32.mrf.mxu0  ;;  %v448_v18 = vpop.f32.mrf.mxu1 }
  0x98   :  { %v436_v17 = vadd.f32 %v435_v15, %v1303_v14  ;;  %v449_v19 = vadd.f32 %v448_v18, %v1303_v14 }
  0x9a   :  { %v595_v20 = vmax.f32 %v436_v17, 0.0  ;;  %v596_v21 = vmax.f32 %v449_v19, 0.0 }
  0x9c   :  { %v608_v22 = vpack.c.bf16 %v596_v21, %v595_v20 }
  0x9e   :  { %615 = vst [vmem:[%s1342_s3] sm:$0xff] %v608_v22 }
  0x9f   :  { %v437_v23 = vpop.f32.mrf.mxu0  ;;  %v450_v24 = vpop.f32.mrf.mxu1 }
  0xa0   :  { %v461_v25 = vpop.f32.mrf.mxu2  ;;  %v474_v26 = vpop.f32.mrf.mxu3 }
  0xa1   :  { %v462_v16 = vadd.f32 %v461_v25, %v1303_v14  ;;  %v475_v27 = vadd.f32 %v474_v26, %v1303_v14 }
  0xa3   :  { %v597_v28 = vmax.f32 %v462_v16, 0.0  ;;  %v598_v29 = vmax.f32 %v475_v27, 0.0 }
  0xa5   :  { %v609_v30 = vpack.c.bf16 %v598_v29, %v597_v28 }
  0xa7   :  { %616 = vst [vmem:[%s1342_s3 + $0x8] sm:$0xff] %v609_v30 }
  0xa8   :  { %v463_v32 = vpop.f32.mrf.mxu2  ;;  %v476_v34 = vpop.f32.mrf.mxu3 }
  0xab   :  { %v487_v31 = vpop.f32.mrf.mxu0  ;;  %v500_v35 = vpop.f32.mrf.mxu1 }
  0xac   :  { %v488_v33 = vadd.f32 %v487_v31, %v1303_v14  ;;  %v501_v37 = vadd.f32 %v500_v35, %v1303_v14 }
  0xae   :  { %v599_v36 = vmax.f32 %v488_v33, 0.0  ;;  %v600_v38 = vmax.f32 %v501_v37, 0.0 }
  0xb0   :  { %v610_v39 = vpack.c.bf16 %v600_v38, %v599_v36 }
  0xb2   :  { %617 = vst [vmem:[%s1342_s3 + $0x10] sm:$0xff] %v610_v39 }
  0xb3   :  { %v489_v40 = vpop.f32.mrf.mxu0  ;;  %v502_v42 = vpop.f32.mrf.mxu1 }
  0xb4   :  { %v513_v41 = vpop.f32.mrf.mxu2  ;;  %v526_v44 = vpop.f32.mrf.mxu3 }
  0xb5   :  { %v514_v43 = vadd.f32 %v513_v41, %v1303_v14  ;;  %v527_v45 = vadd.f32 %v526_v44, %v1303_v14 }
  0xb7   :  { %v601_v46 = vmax.f32 %v514_v43, 0.0  ;;  %v602_v47 = vmax.f32 %v527_v45, 0.0 }
  0xb9   :  { %v611_v48 = vpack.c.bf16 %v602_v47, %v601_v46 }
  0xbb   :  { %618 = vst [vmem:[%s1342_s3 + $0x18] sm:$0xff] %v611_v48 }
  0xbc   :  { %v515_v50 = vpop.f32.mrf.mxu2  ;;  %v528_v52 = vpop.f32.mrf.mxu3 }
  0xbf   :  { %v539_v49 = vpop.f32.mrf.mxu0  ;;  %v552_v53 = vpop.f32.mrf.mxu1 }
  0xc0   :  { %v540_v51 = vadd.f32 %v539_v49, %v1303_v14  ;;  %v553_v54 = vadd.f32 %v552_v53, %v1303_v14 }
  0xc2   :  { %v603_v55 = vmax.f32 %v540_v51, 0.0  ;;  %v604_v56 = vmax.f32 %v553_v54, 0.0 }
  0xc4   :  { %v612_v57 = vpack.c.bf16 %v604_v56, %v603_v55 }
  0xc6   :  { %619 = vst [vmem:[%s1342_s3 + $0x20] sm:$0xff] %v612_v57  ;;  %v565_v59 = vpop.f32.mrf.mxu2 }
  0xc7   :  { %v541_v58 = vpop.f32.mrf.mxu0  ;;  %v554_v60 = vpop.f32.mrf.mxu1  ;;  %v566_v61 = vadd.f32 %v565_v59, %v1303_v14 }
  0xc8   :  { %v578_v62 = vpop.f32.mrf.mxu3 }
  0xc9   :  { %v579_v63 = vadd.f32 %v578_v62, %v1303_v14  ;;  %v605_v0 = vmax.f32 %v566_v61, 0.0 }
  0xcb   :  { %v606_v1 = vmax.f32 %v579_v63, 0.0 }
  0xcd   :  { %v613_v2 = vpack.c.bf16 %v606_v1, %v605_v0 }
  0xce   :  { %v567_v3 = vpop.f32.mrf.mxu2 }
  0xcf   :  { %620 = vst [vmem:[%s1342_s3 + $0x28] sm:$0xff] %v613_v2 }
  0xd0   :  { %v580_v5 = vpop.f32.mrf.mxu3 }
  0xd3   :  { %v591_v4 = vpop.f32.mrf.mxu0 }
  0xd4   :  { %v592_v6 = vadd.f32 %v591_v4, %v1303_v14 }
  0xd6   :  { %v607_v7 = vmax.f32 %v592_v6, 0.0 }
  0xd8   :  { %v614_v8 = vpack.c.bf16 %v607_v7, %v607_v7 }
  0xda   :  { %622 = vst.msk [vmem:[%s1342_s3 + $0x30] sm:$0xf] %vm621_vm2, %v614_v8 }
  0xdb   :  { %v593_v9 = vpop.f32.mrf.mxu0 }

// kernel: _lambda_.6
= control target key start
LH: loop header
LB: loop body
LE: loop exit
PB: predicated region body
PF: predicated region fallthrough
CT: control target
= control target key end

     0   :  { %vm74_vm0 = vcmask 1043456   ;;  %v370_v2 = vmov 0   ;;  %vm70_vm1 = vcmask 64512   ;;  %vm346_vm2 = vcmask 785408   ;;  %s501_s1 = inlined_call_operand.vmem [shape: bf16[8,2016], index: 1, kind: input, shape index: {}]   ;;  %s502_s2 = inlined_call_operand.vmem [shape: f32[8,1], index: 2, kind: input, shape index: {}]   ;;  %s503_s0 = inlined_call_operand.vmem [shape: bf16[8,8], index: 0, kind: input, shape index: {}]   ;;  %s504_s3 = inlined_call_operand.vmem [shape: f32[8,2016], index: 3, kind: output, shape index: {}]  }
   0x1   :  { %v16_v0 = vld [vmem:[%s501_s1] sm:$0xff]  ;;  %v17_v1 = vld [vmem:[%s501_s1 + $0x8] sm:$0xff]  ;;  %369 = vset.pattern.permute.xlu0 %v370_v2  ;;  %v19_v7 = vld [vmem:[%s501_s1 + $0x18] sm:$0xff] }
   0x2   :  { %v38_v3 = vunpack.c.l.b16 %v16_v0  ;;  %v39_v4 = vunpack.c.h.b16 %v16_v0  ;;  %v40_v5 = vunpack.c.l.b16 %v17_v1  ;;  %v41_v6 = vunpack.c.h.b16 %v17_v1  ;;  %v18_v8 = vld [vmem:[%s501_s1 + $0x10] sm:$0xff]  ;;  %v24_v13 = vld [vmem:[%s502_s2] sm:$0xff]  ;;  %v21_v22 = vld [vmem:[%s501_s1 + $0x28] sm:$0xff] }
   0x3   :  { %v44_v9 = vunpack.c.l.b16 %v19_v7  ;;  %v45_v10 = vunpack.c.h.b16 %v19_v7  ;;  %v42_v11 = vunpack.c.l.b16 %v18_v8  ;;  %v43_v12 = vunpack.c.h.b16 %v18_v8  ;;  %27 = vperm.xlu0 %369, %v24_v13   ;;  %v20_v23 = vld [vmem:[%s501_s1 + $0x20] sm:$0xff]  ;;  %v23_v45 = vld [vmem:[%s501_s1 + $0x38] sm:$0xff]  ;;  %v22_v46 = vld [vmem:[%s501_s1 + $0x30] sm:$0xff] }
   0x4   :  { %v54_v14 = vpack.c.b16 %v38_v3, %v38_v3  ;;  %v55_v15 = vpack.c.b16 %v39_v4, %v39_v4  ;;  %v56_v16 = vpack.c.b16 %v40_v5, %v40_v5  ;;  %v57_v17 = vpack.c.b16 %v41_v6, %v41_v6  ;;  %v15_v28 = vld [vmem:[%s503_s0] sm:$0xf] }
   0x5   :  { %v60_v18 = vpack.c.b16 %v44_v9, %v44_v9  ;;  %v61_v19 = vpack.c.b16 %v45_v10, %v45_v10  ;;  %v58_v20 = vpack.c.b16 %v42_v11, %v42_v11  ;;  %v59_v21 = vpack.c.b16 %v43_v12, %v43_v12 }
   0x6   :  { %v76_v24 = vsel %vm74_vm0, %v54_v14, 0  ;;  %v79_v25 = vsel %vm74_vm0, %v55_v15, 0  ;;  %v82_v26 = vsel %vm74_vm0, %v56_v16, 0  ;;  %v85_v27 = vsel %vm74_vm0, %v57_v17, 0 }
   0x7   :  { %130 = vmatpush.bf16.msra.mxu0 %v76_v24  ;;  %143 = vmatpush.bf16.msra.mxu1 %v79_v25  ;;  %v94_v29 = vsel %vm74_vm0, %v60_v18, 0  ;;  %v97_v30 = vsel %vm74_vm0, %v61_v19, 0  ;;  %v48_v31 = vunpack.c.l.b16 %v21_v22  ;;  %v49_v32 = vunpack.c.h.b16 %v21_v22 }
   0x8   :  { %156 = vmatpush.bf16.msra.mxu2 %v82_v26  ;;  %169 = vmatpush.bf16.msra.mxu3 %v85_v27  ;;  %v46_v33 = vunpack.c.l.b16 %v20_v23  ;;  %v47_v34 = vunpack.c.h.b16 %v20_v23  ;;  %v88_v35 = vsel %vm74_vm0, %v58_v20, 0  ;;  %v91_v36 = vsel %vm74_vm0, %v59_v21, 0 }
   0x9   :  { %v64_v37 = vpack.c.b16 %v48_v31, %v48_v31  ;;  %v65_v38 = vpack.c.b16 %v49_v32, %v49_v32  ;;  %v52_v47 = vunpack.c.l.b16 %v23_v45  ;;  %v53_v48 = vunpack.c.h.b16 %v23_v45 }
   0xa   :  { %352 = vmatmul.msk.bf16.vlgmr.msra.gmra.mxu0 %vm70_vm1, %v15_v28  ;;  %353 = vmatmul.msk.bf16.vlgmr.msra.gmra.mxu1 %vm70_vm1, %v15_v28  ;;  %v62_v39 = vpack.c.b16 %v46_v33, %v46_v33  ;;  %v63_v40 = vpack.c.b16 %v47_v34, %v47_v34  ;;  %v50_v49 = vunpack.c.l.b16 %v22_v46  ;;  %v51_v50 = vunpack.c.h.b16 %v22_v46 }
   0xb   :  { %354 = vmatmul.msk.bf16.vlgmr.msra.gmra.mxu2 %vm70_vm1, %v15_v28  ;;  %355 = vmatmul.msk.bf16.vlgmr.msra.gmra.mxu3 %vm70_vm1, %v15_v28  ;;  %v106_v41 = vsel %vm74_vm0, %v64_v37, 0  ;;  %v109_v42 = vsel %vm74_vm0, %v65_v38, 0  ;;  %v68_v51 = vpack.c.b16 %v52_v47, %v52_v47  ;;  %v69_v52 = vpack.c.b16 %v53_v48, %v53_v48 }
   0xc   :  { %208 = vmatpush.bf16.msrb.mxu2 %v94_v29  ;;  %221 = vmatpush.bf16.msrb.mxu3 %v97_v30  ;;  %v100_v43 = vsel %vm74_vm0, %v62_v39, 0  ;;  %v103_v44 = vsel %vm74_vm0, %v63_v40, 0  ;;  %v66_v53 = vpack.c.b16 %v50_v49, %v50_v49  ;;  %v67_v54 = vpack.c.b16 %v51_v50, %v51_v50 }
   0xd   :  { %182 = vmatpush.bf16.msrb.mxu0 %v88_v35  ;;  %195 = vmatpush.bf16.msrb.mxu1 %v91_v36  ;;  %v118_v55 = vsel %vm74_vm0, %v68_v51, 0  ;;  %v121_v56 = vsel %vm74_vm0, %v69_v52, 0 }
   0xe   :  { %v112_v57 = vsel %vm74_vm0, %v66_v53, 0  ;;  %v115_v58 = vsel %vm74_vm0, %v67_v54, 0 }
  0x10   :  { %260 = vmatpush.bf16.msra.mxu2 %v106_v41  ;;  %273 = vmatpush.bf16.msra.mxu3 %v109_v42 }
  0x11   :  { %234 = vmatpush.bf16.msra.mxu0 %v100_v43  ;;  %247 = vmatpush.bf16.msra.mxu1 %v103_v44 }
  0x1a   :  { %356 = vmatmul.msk.bf16.vlgmr.msrb.gmra.mxu0 %vm70_vm1, %v15_v28  ;;  %357 = vmatmul.msk.bf16.vlgmr.msrb.gmra.mxu1 %vm70_vm1, %v15_v28 }
  0x1b   :  { %358 = vmatmul.msk.bf16.vlgmr.msrb.gmra.mxu2 %vm70_vm1, %v15_v28  ;;  %359 = vmatmul.msk.bf16.vlgmr.msrb.gmra.mxu3 %vm70_vm1, %v15_v28 }
  0x1c   :  { %312 = vmatpush.bf16.msrb.mxu2 %v118_v55  ;;  %325 = vmatpush.bf16.msrb.mxu3 %v121_v56 }
  0x1d   :  { %286 = vmatpush.bf16.msrb.mxu0 %v112_v57  ;;  %299 = vmatpush.bf16.msrb.mxu1 %v115_v58 }
  0x2a   :  { %360 = vmatmul.msk.bf16.vlgmr.msra.gmra.mxu0 %vm70_vm1, %v15_v28  ;;  %361 = vmatmul.msk.bf16.vlgmr.msra.gmra.mxu1 %vm70_vm1, %v15_v28 }
  0x2b   :  { %362 = vmatmul.msk.bf16.vlgmr.msra.gmra.mxu2 %vm70_vm1, %v15_v28  ;;  %363 = vmatmul.msk.bf16.vlgmr.msra.gmra.mxu3 %vm70_vm1, %v15_v28 }
  0x3a   :  { %364 = vmatmul.msk.bf16.vlgmr.msrb.gmra.mxu0 %vm70_vm1, %v15_v28  ;;  %365 = vmatmul.msk.bf16.vlgmr.msrb.gmra.mxu1 %vm70_vm1, %v15_v28 }
  0x3b   :  { %366 = vmatmul.msk.bf16.vlgmr.msrb.gmra.mxu2 %vm70_vm1, %v15_v28  ;;  %367 = vmatmul.msk.bf16.vlgmr.msrb.gmra.mxu3 %vm70_vm1, %v15_v28 }
  0x75   :  { %v28_v59 = vpop.permute.xlu0 %27 }
  0x87   :  { %v132_v60 = vpop.f32.mrf.mxu0  ;;  %v145_v61 = vpop.f32.mrf.mxu1 }
  0x88   :  { %v133_v62 = vadd.f32 %v132_v60, %v28_v59  ;;  %v146_v63 = vadd.f32 %v145_v61, %v28_v59 }
  0x8a   :  { %331 = vst [vmem:[%s504_s3] sm:$0xff] %v133_v62 }
  0x8b   :  { %332 = vst [vmem:[%s504_s3 + $0x8] sm:$0xff] %v146_v63 }
  0x8e   :  { %v158_v0 = vpop.f32.mrf.mxu2  ;;  %v171_v1 = vpop.f32.mrf.mxu3 }
  0x8f   :  { %v159_v2 = vadd.f32 %v158_v0, %v28_v59  ;;  %v172_v3 = vadd.f32 %v171_v1, %v28_v59  ;;  %v134_v4 = vpop.f32.mrf.mxu0  ;;  %v147_v5 = vpop.f32.mrf.mxu1 }
  0x91   :  { %333 = vst [vmem:[%s504_s3 + $0x10] sm:$0xff] %v159_v2 }
  0x92   :  { %334 = vst [vmem:[%s504_s3 + $0x18] sm:$0xff] %v172_v3 }
  0x96   :  { %v160_v6 = vpop.f32.mrf.mxu2  ;;  %v173_v7 = vpop.f32.mrf.mxu3 }
  0x97   :  { %v184_v8 = vpop.f32.mrf.mxu0  ;;  %v197_v9 = vpop.f32.mrf.mxu1 }
  0x98   :  { %v185_v10 = vadd.f32 %v184_v8, %v28_v59  ;;  %v198_v11 = vadd.f32 %v197_v9, %v28_v59 }
  0x9a   :  { %335 = vst [vmem:[%s504_s3 + $0x20] sm:$0xff] %v185_v10 }
  0x9b   :  { %336 = vst [vmem:[%s504_s3 + $0x28] sm:$0xff] %v198_v11 }
  0x9e   :  { %v210_v12 = vpop.f32.mrf.mxu2  ;;  %v223_v13 = vpop.f32.mrf.mxu3 }
  0x9f   :  { %v211_v14 = vadd.f32 %v210_v12, %v28_v59  ;;  %v224_v15 = vadd.f32 %v223_v13, %v28_v59  ;;  %v186_v16 = vpop.f32.mrf.mxu0  ;;  %v199_v17 = vpop.f32.mrf.mxu1 }
  0xa1   :  { %337 = vst [vmem:[%s504_s3 + $0x30] sm:$0xff] %v211_v14 }
  0xa2   :  { %338 = vst [vmem:[%s504_s3 + $0x38] sm:$0xff] %v224_v15 }
  0xa6   :  { %v212_v18 = vpop.f32.mrf.mxu2  ;;  %v225_v19 = vpop.f32.mrf.mxu3 }
  0xa7   :  { %v236_v20 = vpop.f32.mrf.mxu0  ;;  %v249_v21 = vpop.f32.mrf.mxu1 }
  0xa8   :  { %v237_v22 = vadd.f32 %v236_v20, %v28_v59  ;;  %v250_v23 = vadd.f32 %v249_v21, %v28_v59 }
  0xaa   :  { %339 = vst [vmem:[%s504_s3 + $0x40] sm:$0xff] %v237_v22 }
  0xab   :  { %340 = vst [vmem:[%s504_s3 + $0x48] sm:$0xff] %v250_v23 }
  0xae   :  { %v262_v24 = vpop.f32.mrf.mxu2  ;;  %v275_v25 = vpop.f32.mrf.mxu3 }
  0xaf   :  { %v263_v26 = vadd.f32 %v262_v24, %v28_v59  ;;  %v276_v27 = vadd.f32 %v275_v25, %v28_v59  ;;  %v238_v28 = vpop.f32.mrf.mxu0  ;;  %v251_v29 = vpop.f32.mrf.mxu1 }
  0xb1   :  { %341 = vst [vmem:[%s504_s3 + $0x50] sm:$0xff] %v263_v26 }
  0xb2   :  { %342 = vst [vmem:[%s504_s3 + $0x58] sm:$0xff] %v276_v27 }
  0xb6   :  { %v264_v30 = vpop.f32.mrf.mxu2  ;;  %v277_v31 = vpop.f32.mrf.mxu3 }
  0xb7   :  { %v288_v32 = vpop.f32.mrf.mxu0  ;;  %v301_v33 = vpop.f32.mrf.mxu1 }
  0xb8   :  { %v289_v34 = vadd.f32 %v288_v32, %v28_v59  ;;  %v302_v35 = vadd.f32 %v301_v33, %v28_v59 }
  0xba   :  { %343 = vst [vmem:[%s504_s3 + $0x60] sm:$0xff] %v289_v34 }
  0xbb   :  { %344 = vst [vmem:[%s504_s3 + $0x68] sm:$0xff] %v302_v35 }
  0xbe   :  { %v314_v36 = vpop.f32.mrf.mxu2  ;;  %v327_v37 = vpop.f32.mrf.mxu3 }
  0xbf   :  { %v315_v38 = vadd.f32 %v314_v36, %v28_v59  ;;  %v328_v39 = vadd.f32 %v327_v37, %v28_v59  ;;  %v290_v40 = vpop.f32.mrf.mxu0  ;;  %v303_v41 = vpop.f32.mrf.mxu1 }
  0xc1   :  { %345 = vst [vmem:[%s504_s3 + $0x70] sm:$0xff] %v315_v38 }
  0xc2   :  { %347 = vst.msk [vmem:[%s504_s3 + $0x78] sm:$0xff] %vm346_vm2, %v328_v39 }
  0xc6   :  { %v316_v42 = vpop.f32.mrf.mxu2  ;;  %v329_v43 = vpop.f32.mrf.mxu3 }

// kernel: _lambda_.7
= control target key start
LH: loop header
LB: loop body
LE: loop exit
PB: predicated region body
PF: predicated region fallthrough
CT: control target
= control target key end

     0   :  { %s594_s18 = smov 0   ;;  %s651_s0 = inlined_call_operand.vmem [shape: f32[5,8,8], index: 0, kind: input, shape index: {}]   ;;  %s652_s1 = inlined_call_operand.vmem [shape: f32[8,576], index: 1, kind: input, shape index: {}]   ;;  %s653_s2 = inlined_call_operand.vmem [shape: f32[5,8,144], index: 2, kind: input, shape index: {}]   ;;  %s654_s3 = inlined_call_operand.vmem [shape: f32[8,1], index: 3, kind: input, shape index: {}]   ;;  %s655_s4 = inlined_call_operand.vmem [shape: f32[5,8,576], index: 4, kind: output, shape index: {0}]   ;;  %s656_s5 = inlined_call_operand.vmem [shape: f32[5,8,144], index: 5, kind: output, shape index: {1}]  }
   0x1 LB: > { %s522_s19 = sadd.s32 4294967295, %s561_s18   ;;  %p526_p0 = scmp.ge.s32.totalorder %s561_s18, 1  ;;  %s561_s18 = sphi %s594_s18, %s16_s18  }
   0x2   : > { %p199_p1 = scmp.lt.s32.totalorder %s561_s18, 6 }
   0x4   : > { %p200_p2 = pnand %p526_p0, %p199_p1 }
   0x5   : > { %p236_p3 = scmp.lt.s32.totalorder (!%p200_p2), %s522_s19, 4 }
   0x6   : > { %203 = sbr.rel (%p200_p2) target bundleno = 158 (0x9e), region = 36 }
   0xb   : > { %v259_v0 = vld [vmem:[%s652_s1 + $0x10] sm:$0xff]  ;;  %v257_v1 = vld [vmem:[%s652_s1] sm:$0xff]  ;;  %v258_v2 = vld [vmem:[%s652_s1 + $0x8] sm:$0xff]  ;;  %s658_s19 = smov (!%p236_p3, %s522_s19), 4  ;;  %v563_v6 = vmov 0   ;;  %vm267_vm0 = vcmask 64512  }
   0xc   : > { %326 = vmatpush.msra.mxu2 %v259_v0  ;;  %286 = vmatpush.msra.mxu0 %v257_v1  ;;  %v261_v3 = vld [vmem:[%s652_s1 + $0x20] sm:$0xff]  ;;  %v260_v4 = vld [vmem:[%s652_s1 + $0x18] sm:$0xff]  ;;  %s527_s7 = sshll.u32 %s658_s19, 3  ;;  %s542_s8 = sshll.u32 %s658_s19, 4  ;;  %vm375_vm1 = vcmask 523264   ;;  %vm420_vm2 = vcmask 130048  }
   0xd   : > { %v256_v5 = vld [vmem:[%s654_s3] sm:$0xff]  ;;  %306 = vmatpush.msra.mxu1 %v258_v2  ;;  %346 = vmatpush.msra.mxu3 %v260_v4  ;;  %s239_s11 = scalar_lea.vmem %s651_s0, %s527_s7  ;;  %s244_s14 = scalar_lea.vmem %s653_s2, %s542_s8 }
   0xe   : > { %366 = vmatpush.msrb.mxu0 %v261_v3  ;;  %554 = vset.pattern.permute.xlu0 %v563_v6  ;;  %v255_v7 = vld [vmem:[%s239_s11] sm:$0xff]  ;;  %v378_v8 = vld [vmem:[%s244_s14 + $0x8] sm:$0xff]  ;;  %s544_s15 = smul.u32 40, %s658_s19  ;;  %s254_s23 = scalar_lea.vmem %s656_s5, %s542_s8 }
   0xf   : > { %264 = vperm.xlu0 %554, %v256_v5   ;;  %v377_v9 = vld [vmem:[%s244_s14] sm:$0xff]  ;;  %535 = vmatmul.msk.f32.vlgmr.msra.gmra.mxu2 %vm267_vm0, %v255_v7 }
  0x10   : > { %533 = vmatmul.msk.f32.vlgmr.msra.gmra.mxu0 %vm267_vm0, %v255_v7  ;;  %414 = vmatpush.msrb.mxu2 %v378_v8  ;;  %s249_s20 = scalar_lea.vmem %s655_s4, %s544_s15 }
  0x11   : > { %534 = vmatmul.msk.f32.vlgmr.msra.gmra.mxu1 %vm267_vm0, %v255_v7  ;;  %536 = vmatmul.msk.f32.vlgmr.msra.gmra.mxu3 %vm267_vm0, %v255_v7 }
  0x12   : > { %394 = vmatpush.msrb.mxu1 %v377_v9 }
  0x17   : > { %539 = vmatmul.msk.f32.vlgmr.msrb.gmra.mxu2 %vm267_vm0, %v255_v7 }
  0x18   : > { %537 = vmatmul.msk.f32.vlgmr.msrb.gmra.mxu0 %vm267_vm0, %v255_v7 }
  0x19   : > { %538 = vmatmul.msk.f32.vlgmr.msrb.gmra.mxu1 %vm267_vm0, %v255_v7 }
  0x81   : > { %v265_v10 = vpop.permute.xlu0 %264 }
  0x8d   : > { %v288_v11 = vpop.f32.mrf.mxu0 }
  0x8e   : > { %v289_v12 = vadd.f32 %v288_v11, %v265_v10  ;;  %v308_v13 = vpop.f32.mrf.mxu1 }
  0x8f   : > { %v309_v14 = vadd.f32 %v308_v13, %v265_v10 }
  0x90   : > { %371 = vst [vmem:[%s249_s20] sm:$0xff] %v289_v12 }
  0x91   : > { %372 = vst [vmem:[%s249_s20 + $0x8] sm:$0xff] %v309_v14 }
  0x92   : > { %v328_v15 = vpop.f32.mrf.mxu2 }
  0x93   : > { %v329_v16 = vadd.f32 %v328_v15, %v265_v10 }
  0x94   : > { %v348_v17 = vpop.f32.mrf.mxu3 }
  0x95   : > { %v368_v18 = vpop.f32.mrf.mxu0  ;;  %373 = vst [vmem:[%s249_s20 + $0x10] sm:$0xff] %v329_v16  ;;  %v349_v19 = vadd.f32 %v348_v17, %v265_v10 }
  0x96   : > { %v369_v20 = vadd.f32 %v368_v18, %v265_v10  ;;  %v396_v21 = vpop.f32.mrf.mxu1 }
  0x97   : > { %v397_v22 = vadd.f32 %v396_v21, %v265_v10  ;;  %374 = vst [vmem:[%s249_s20 + $0x18] sm:$0xff] %v349_v19 }
  0x98   : > { %376 = vst.msk [vmem:[%s249_s20 + $0x20] sm:$0xff] %vm375_vm1, %v369_v20 }
  0x99   : > { %419 = vst [vmem:[%s254_s23] sm:$0xff] %v397_v22 }
  0x9a   : > { %v416_v23 = vpop.f32.mrf.mxu2 }
  0x9b   : > { %v417_v24 = vadd.f32 %v416_v23, %v265_v10 }
  0x9d   : > { %421 = vst.msk [vmem:[%s254_s23 + $0x8] sm:$0xff] %vm420_vm2, %v417_v24 }
  0x9e PF: > { %s16_s18 = sadd.s32 1, %s561_s18  }
  0x9f   : > { %p13_p4 = scmp.ge.s32.totalorder %s16_s18, 7  }
  0xa1   :  { %15 = sbr.rel (!%p13_p4) target bundleno = 1 (0x1), region = 81 }

</bundles_post_ra>
